<compile_context>
chip_gen: v7x
topology: tpu7x:2x2x1
jax: 0.10.0
libtpu: 0.0.40
codegen_flags: <defaults>
</compile_context>

<pallas_src>
import numpy as np
import jax
import jax.numpy as jnp
from jax import lax
from jax.experimental import pallas as pl
from jax.experimental.pallas import tpu as pltpu

EPSILON = 0.05
SINKHORN_ITERATIONS = 20
_MASK_NEG = -1e30            # "minus infinity" for masked (cross-pair) logits
_REFINED_TAIL_ITERS = 2      # last iterations use Newton-refined reciprocals


def _recip_approx(x):
    # EUP approximate reciprocal (separate bundle slot, off the VALU).
    return pl.reciprocal(x, approx=True)


def _recip_refined(x):
    # approx reciprocal + one Newton step -> ~f32 accuracy for the final Q.
    r = pl.reciprocal(x, approx=True)
    return r * (2.0 - x * r)


def _alignment_loss_kernel(mask_ref, seg_ref, cl_ref, seq_ref, out_ref):
    """One grid step processes Gb (cl, seq) pairs packed block-diagonally.

    mask_ref : (Gb*M, Gb*N) f32 — 1 on the per-pair diagonal blocks, else 0.
    seg_ref  : (Gb,   Gb*N) f32 — seg[g, j] = 1 iff column j belongs to pair g.
    cl_ref   : (1, Gb*N, D)      seq_ref : (1, Gb*M, D)
    out_ref  : (1, Gb, 128)      per-pair loss broadcast across 128 lanes.
    """
    cl = cl_ref[0].astype(jnp.float32)        # (Gb*N, D)
    seq = seq_ref[0].astype(jnp.float32)      # (Gb*M, D)
    mask = mask_ref[...]
    GbN, D = cl.shape
    Gb = seg_ref.shape[0]
    N = GbN // Gb

    # All Gb similarity matrices with a single MXU matmul; 1/eps folded into
    # the small LHS.  logits[i, j] = seq_flat[i] . cl_flat[j] / eps.
    logits = lax.dot_general(seq * (1.0 / EPSILON), cl,
                             (((1,), (1,)), ((), ())),
                             preferred_element_type=jnp.float32)   # (Gb*M, Gb*N)

    # Keep only the per-pair diagonal blocks.  Off-block entries become exact
    # zeros after exp, so full-row / full-column sums of the packed matrix are
    # exactly the per-pair Sinkhorn sums (full lane / sublane occupancy).
    logits = jnp.where(mask > 0.0, logits, jnp.float32(_MASK_NEG))
    # Per-(pair,row) max subtraction: absorbed exactly by the first row
    # normalization; makes exp overflow-safe and every row keeps a 1.0 entry.
    logits = logits - jnp.max(logits, axis=1, keepdims=True)
    Q = jnp.exp(logits)                        # (Gb*M, Gb*N), block-diagonal

    # Sinkhorn.  The reference's /sum(Q), per-iteration /K and /B, and trailing
    # *B are global / per-pair scalar scalings absorbed by the very next
    # normalization, so they are dropped (mathematically identical).
    # Intermediate iterations: raw approx reciprocal (scale error corrected by
    # the next normalization).  Last iterations: Newton-refined reciprocal.
    def sinkhorn_body(_, Q):
        Q = Q * _recip_approx(jnp.sum(Q, axis=1, keepdims=True))   # rows -> 1
        Q = Q * _recip_approx(jnp.sum(Q, axis=0, keepdims=True))   # cols -> 1
        return Q

    Q = lax.fori_loop(0, SINKHORN_ITERATIONS - _REFINED_TAIL_ITERS,
                      sinkhorn_body, Q, unroll=True)
    for _ in range(_REFINED_TAIL_ITERS):
        Q = Q * _recip_refined(jnp.sum(Q, axis=1, keepdims=True))
        Q = Q * _recip_refined(jnp.sum(Q, axis=0, keepdims=True))

    # aligned[j] = sum_i Q[i, j] * seq[i]; block-diagonal Q keeps pairs
    # independent.  NT contraction (dim 0 x dim 0) — same pattern as the dv
    # matmul in the reference flash-attention backward kernel.
    aligned = lax.dot_general(Q, seq, (((0,), (0,)), ((), ())),
                              preferred_element_type=jnp.float32)   # (Gb*N, D)
    diff = aligned - cl
    per_row = jnp.sum(diff * diff, axis=1, keepdims=True)           # (Gb*N, 1)
    # Segmented per-pair reduction on the (otherwise idle) MXU.
    losses = lax.dot_general(seg_ref[...], per_row,
                             (((1,), (0,)), ((), ())),
                             preferred_element_type=jnp.float32)    # (Gb, 1)
    losses = losses * (1.0 / (N * D))                                # MSE mean
    # Lane-dense, unmasked store: all Gb losses in one (Gb, 128) block.
    out_ref[0] = jnp.broadcast_to(losses, (Gb, 128))


def alignment_loss_with_sinkhorn_batched(cl_seq2intents, seq2intents,
                                         pairs_per_step=None):
    """cl_seq2intents: (G, N, D), seq2intents: (G, M, D) -> (G,) f32 losses."""
    G, N, D = cl_seq2intents.shape
    G2, M, D2 = seq2intents.shape
    assert G == G2 and D == D2

    if pairs_per_step is None:
        # Pack pairs so the block-diagonal Sinkhorn matrix fills ~128 lanes
        # and ~128 sublanes.
        Gb = max(1, 128 // max(N, M))
        Gb = min(Gb, G)
        # Keep >= 2 grid steps so the "parallel" axis shards across both
        # TensorCores on v7x (harmless on single-TC v5e/v6e).
        if G >= 2:
            Gb = min(Gb, -(-G // 2))
    else:
        Gb = max(1, pairs_per_step)

    steps = -(-G // Gb)
    Gpad = steps * Gb
    if Gpad != G:
        pad = Gpad - G
        cl_seq2intents = jnp.concatenate(
            [cl_seq2intents, jnp.zeros((pad, N, D), cl_seq2intents.dtype)], 0)
        seq2intents = jnp.concatenate(
            [seq2intents, jnp.zeros((pad, M, D), seq2intents.dtype)], 0)

    # Pack Gb pairs per grid step (pure leading-dim reshape, done by XLA).
    cl_packed = cl_seq2intents.reshape(steps, Gb * N, D)
    seq_packed = seq2intents.reshape(steps, Gb * M, D)

    # Static block-diagonal mask and per-pair segment-sum matrix (host-built
    # constants; avoids in-kernel iota/integer-division lowering).
    row_g = np.arange(Gb * M) // M
    col_g = np.arange(Gb * N) // N
    mask = jnp.asarray((row_g[:, None] == col_g[None, :]).astype(np.float32))
    seg = jnp.asarray(
        (np.arange(Gb)[:, None] == col_g[None, :]).astype(np.float32))

    out = pl.pallas_call(
        _alignment_loss_kernel,
        out_shape=jax.ShapeDtypeStruct((steps, Gb, 128), jnp.float32),
        grid_spec=pltpu.PrefetchScalarGridSpec(
            num_scalar_prefetch=0,
            grid=(steps,),
            in_specs=[
                pl.BlockSpec((Gb * M, Gb * N), lambda s: (0, 0)),
                pl.BlockSpec((Gb, Gb * N), lambda s: (0, 0)),
                pl.BlockSpec((1, Gb * N, D), lambda s: (s, 0, 0)),
                pl.BlockSpec((1, Gb * M, D), lambda s: (s, 0, 0)),
            ],
            out_specs=pl.BlockSpec((1, Gb, 128), lambda s: (s, 0, 0)),
        ),
        compiler_params=pltpu.CompilerParams(
            dimension_semantics=("parallel",)),
    )(mask, seg, cl_packed, seq_packed)

    return out[:, :, 0].reshape(Gpad)[:G]


def alignment_loss_with_sinkhorn(cl_seq2intents, seq2intents):
    """Single (N, D)/(M, D) pair -> scalar f32 loss (matches the nn.Module)."""
    return alignment_loss_with_sinkhorn_batched(
        cl_seq2intents[None], seq2intents[None])[0]


def _reference(cl, seq):
    # Faithful translation of the PyTorch forward (single pair).
    scores = jnp.exp(cl @ seq.T / EPSILON)
    Q = scores.T
    K, B = Q.shape
    Q = Q / jnp.sum(Q)
    for _ in range(SINKHORN_ITERATIONS):
        Q = Q / jnp.sum(Q, axis=1, keepdims=True)
        Q = Q / K
        Q = Q / jnp.sum(Q, axis=0, keepdims=True)
        Q = Q / B
    Q = Q * B
    assignment = Q.T
    aligned = assignment @ seq
    return jnp.mean((aligned - cl) ** 2)


if __name__ == "__main__":
    G, N, M, D = 32, 8, 8, 32   # pairs, intents per pair, seq rows, hidden

    key = jax.random.PRNGKey(0)
    k1, k2 = jax.random.split(key)
    cl = jax.random.normal(k1, (G, N, D), dtype=jnp.float32)
    seq = jax.random.normal(k2, (G, M, D), dtype=jnp.float32)
    # L2-normalize rows so the divide-free reference stays finite in float32
    # (the kernel itself is overflow-safe via per-row max subtraction).
    cl = cl / jnp.linalg.norm(cl, axis=-1, keepdims=True)
    seq = seq / jnp.linalg.norm(seq, axis=-1, keepdims=True)

    losses = alignment_loss_with_sinkhorn_batched(cl, seq)
    jax.block_until_ready(losses)

    ref = jnp.stack([_reference(cl[g], seq[g]) for g in range(G)])
    assert jnp.allclose(losses, ref, rtol=1e-3, atol=1e-5), (losses, ref)

    # Also exercise the single-pair API (same signature as the PyTorch module).
    loss0 = alignment_loss_with_sinkhorn(cl[0], seq[0])
    jax.block_until_ready(loss0)
    assert jnp.allclose(loss0, ref[0], rtol=1e-3, atol=1e-5), (loss0, ref[0])

    print("KERNEL_OK")
</pallas_src>

<mosaic_0001>
module attributes {stable_mosaic.version = 11 : i64} {
  func.func @_alignment_loss_kernel(%arg0: i32, %arg1: memref<128x128xf32, #tpu.memory_space<vmem>>, %arg2: memref<16x128xf32, #tpu.memory_space<vmem>>, %arg3: memref<1x128x32xf32, #tpu.memory_space<vmem>>, %arg4: memref<1x128x32xf32, #tpu.memory_space<vmem>>, %arg5: memref<1x16x128xf32, #tpu.memory_space<vmem>>) attributes {dimension_semantics = [#tpu.dimension_semantics<parallel>], iteration_bounds = array<i64: 2>, scalar_prefetch = 0 : i64, scratch_operands = 0 : i64, tpu.core_type = #tpu.core_type<tc>, window_params = [{pipeline_mode = #tpu.pipeline_mode<synchronous>, transform_indices = @transform_0, window_bounds = array<i64: 128, 128>}, {pipeline_mode = #tpu.pipeline_mode<synchronous>, transform_indices = @transform_1, window_bounds = array<i64: 16, 128>}, {transform_indices = @transform_2, window_bounds = array<i64: 1, 128, 32>}, {transform_indices = @transform_3, window_bounds = array<i64: 1, 128, 32>}, {transform_indices = @transform_4, window_bounds = array<i64: 1, 16, 128>}]} {
    %c0 = arith.constant 0 : index
    %c0_0 = arith.constant 0 : index
    %c0_1 = arith.constant 0 : index
    %0 = vector.load %arg3[%c0, %c0_0, %c0_1] : memref<1x128x32xf32, #tpu.memory_space<vmem>>, vector<1x128x32xf32>
    %1 = vector.shape_cast %0 : vector<1x128x32xf32> to vector<128x32xf32>
    %c0_2 = arith.constant 0 : index
    %c0_3 = arith.constant 0 : index
    %c0_4 = arith.constant 0 : index
    %2 = vector.load %arg4[%c0_2, %c0_3, %c0_4] : memref<1x128x32xf32, #tpu.memory_space<vmem>>, vector<1x128x32xf32>
    %3 = vector.shape_cast %2 : vector<1x128x32xf32> to vector<128x32xf32>
    %c0_5 = arith.constant 0 : index
    %c0_6 = arith.constant 0 : index
    %4 = vector.load %arg1[%c0_5, %c0_6] : memref<128x128xf32, #tpu.memory_space<vmem>>, vector<128x128xf32>
    %cst = arith.constant 2.000000e+01 : f32
    %5 = vector.broadcast %cst : f32 to vector<128x32xf32>
    %6 = arith.mulf %3, %5 : vector<128x32xf32>
    %cst_7 = arith.constant dense<0.000000e+00> : vector<128x128xf32>
    %7 = tpu.matmul %6, %1, %cst_7 {dimension_numbers = #tpu.dot_dimension_numbers<[1], [1], [0], [0], [0, 0, 1, 0], [], []>} : vector<128x32xf32>, vector<128x32xf32>, vector<128x128xf32> -> vector<128x128xf32>
    %cst_8 = arith.constant 0.000000e+00 : f32
    %8 = vector.broadcast %cst_8 : f32 to vector<128x128xf32>
    %9 = arith.cmpf ogt, %4, %8 : vector<128x128xf32>
    %cst_9 = arith.constant -1.000000e+30 : f32
    %10 = vector.broadcast %cst_9 : f32 to vector<128x128xf32>
    %11 = arith.select %9, %7, %10 : vector<128x128xi1>, vector<128x128xf32>
    %cst_10 = arith.constant dense<0xFF800000> : vector<128xf32>
    %12 = vector.multi_reduction <maximumf>, %11, %cst_10 [1] : vector<128x128xf32> to vector<128xf32>
    %13 = vector.shape_cast %12 : vector<128xf32> to vector<128x1xf32>
    %14 = vector.broadcast %13 : vector<128x1xf32> to vector<128x128xf32>
    %15 = arith.subf %11, %14 : vector<128x128xf32>
    %16 = math.exp %15 : vector<128x128xf32>
    %c0_i32 = arith.constant 0 : i32
    %cst_11 = arith.constant dense<0.000000e+00> : vector<128xf32>
    %17 = vector.multi_reduction <add>, %16, %cst_11 [1] : vector<128x128xf32> to vector<128xf32>
    %18 = vector.shape_cast %17 : vector<128xf32> to vector<128x1xf32>
    %19 = tpu.reciprocal %18 {approx = true} : vector<128x1xf32> -> vector<128x1xf32>
    %20 = vector.broadcast %19 : vector<128x1xf32> to vector<128x128xf32>
    %21 = arith.mulf %16, %20 : vector<128x128xf32>
    %cst_12 = arith.constant dense<0.000000e+00> : vector<128xf32>
    %22 = vector.multi_reduction <add>, %21, %cst_12 [0] : vector<128x128xf32> to vector<128xf32>
    %23 = vector.shape_cast %22 : vector<128xf32> to vector<1x128xf32>
    %24 = tpu.reciprocal %23 {approx = true} : vector<1x128xf32> -> vector<1x128xf32>
    %25 = vector.broadcast %24 : vector<1x128xf32> to vector<128x128xf32>
    %26 = arith.mulf %21, %25 : vector<128x128xf32>
    %c1_i32 = arith.constant 1 : i32
    %cst_13 = arith.constant dense<0.000000e+00> : vector<128xf32>
    %27 = vector.multi_reduction <add>, %26, %cst_13 [1] : vector<128x128xf32> to vector<128xf32>
    %28 = vector.shape_cast %27 : vector<128xf32> to vector<128x1xf32>
    %29 = tpu.reciprocal %28 {approx = true} : vector<128x1xf32> -> vector<128x1xf32>
    %30 = vector.broadcast %29 : vector<128x1xf32> to vector<128x128xf32>
    %31 = arith.mulf %26, %30 : vector<128x128xf32>
    %cst_14 = arith.constant dense<0.000000e+00> : vector<128xf32>
    %32 = vector.multi_reduction <add>, %31, %cst_14 [0] : vector<128x128xf32> to vector<128xf32>
    %33 = vector.shape_cast %32 : vector<128xf32> to vector<1x128xf32>
    %34 = tpu.reciprocal %33 {approx = true} : vector<1x128xf32> -> vector<1x128xf32>
    %35 = vector.broadcast %34 : vector<1x128xf32> to vector<128x128xf32>
    %36 = arith.mulf %31, %35 : vector<128x128xf32>
    %c2_i32 = arith.constant 2 : i32
    %cst_15 = arith.constant dense<0.000000e+00> : vector<128xf32>
    %37 = vector.multi_reduction <add>, %36, %cst_15 [1] : vector<128x128xf32> to vector<128xf32>
    %38 = vector.shape_cast %37 : vector<128xf32> to vector<128x1xf32>
    %39 = tpu.reciprocal %38 {approx = true} : vector<128x1xf32> -> vector<128x1xf32>
    %40 = vector.broadcast %39 : vector<128x1xf32> to vector<128x128xf32>
    %41 = arith.mulf %36, %40 : vector<128x128xf32>
    %cst_16 = arith.constant dense<0.000000e+00> : vector<128xf32>
    %42 = vector.multi_reduction <add>, %41, %cst_16 [0] : vector<128x128xf32> to vector<128xf32>
    %43 = vector.shape_cast %42 : vector<128xf32> to vector<1x128xf32>
    %44 = tpu.reciprocal %43 {approx = true} : vector<1x128xf32> -> vector<1x128xf32>
    %45 = vector.broadcast %44 : vector<1x128xf32> to vector<128x128xf32>
    %46 = arith.mulf %41, %45 : vector<128x128xf32>
    %c3_i32 = arith.constant 3 : i32
    %cst_17 = arith.constant dense<0.000000e+00> : vector<128xf32>
    %47 = vector.multi_reduction <add>, %46, %cst_17 [1] : vector<128x128xf32> to vector<128xf32>
    %48 = vector.shape_cast %47 : vector<128xf32> to vector<128x1xf32>
    %49 = tpu.reciprocal %48 {approx = true} : vector<128x1xf32> -> vector<128x1xf32>
    %50 = vector.broadcast %49 : vector<128x1xf32> to vector<128x128xf32>
    %51 = arith.mulf %46, %50 : vector<128x128xf32>
    %cst_18 = arith.constant dense<0.000000e+00> : vector<128xf32>
    %52 = vector.multi_reduction <add>, %51, %cst_18 [0] : vector<128x128xf32> to vector<128xf32>
    %53 = vector.shape_cast %52 : vector<128xf32> to vector<1x128xf32>
    %54 = tpu.reciprocal %53 {approx = true} : vector<1x128xf32> -> vector<1x128xf32>
    %55 = vector.broadcast %54 : vector<1x128xf32> to vector<128x128xf32>
    %56 = arith.mulf %51, %55 : vector<128x128xf32>
    %c4_i32 = arith.constant 4 : i32
    %cst_19 = arith.constant dense<0.000000e+00> : vector<128xf32>
    %57 = vector.multi_reduction <add>, %56, %cst_19 [1] : vector<128x128xf32> to vector<128xf32>
    %58 = vector.shape_cast %57 : vector<128xf32> to vector<128x1xf32>
    %59 = tpu.reciprocal %58 {approx = true} : vector<128x1xf32> -> vector<128x1xf32>
    %60 = vector.broadcast %59 : vector<128x1xf32> to vector<128x128xf32>
    %61 = arith.mulf %56, %60 : vector<128x128xf32>
    %cst_20 = arith.constant dense<0.000000e+00> : vector<128xf32>
    %62 = vector.multi_reduction <add>, %61, %cst_20 [0] : vector<128x128xf32> to vector<128xf32>
    %63 = vector.shape_cast %62 : vector<128xf32> to vector<1x128xf32>
    %64 = tpu.reciprocal %63 {approx = true} : vector<1x128xf32> -> vector<1x128xf32>
    %65 = vector.broadcast %64 : vector<1x128xf32> to vector<128x128xf32>
    %66 = arith.mulf %61, %65 : vector<128x128xf32>
    %c5_i32 = arith.constant 5 : i32
    %cst_21 = arith.constant dense<0.000000e+00> : vector<128xf32>
    %67 = vector.multi_reduction <add>, %66, %cst_21 [1] : vector<128x128xf32> to vector<128xf32>
    %68 = vector.shape_cast %67 : vector<128xf32> to vector<128x1xf32>
    %69 = tpu.reciprocal %68 {approx = true} : vector<128x1xf32> -> vector<128x1xf32>
    %70 = vector.broadcast %69 : vector<128x1xf32> to vector<128x128xf32>
    %71 = arith.mulf %66, %70 : vector<128x128xf32>
    %cst_22 = arith.constant dense<0.000000e+00> : vector<128xf32>
    %72 = vector.multi_reduction <add>, %71, %cst_22 [0] : vector<128x128xf32> to vector<128xf32>
    %73 = vector.shape_cast %72 : vector<128xf32> to vector<1x128xf32>
    %74 = tpu.reciprocal %73 {approx = true} : vector<1x128xf32> -> vector<1x128xf32>
    %75 = vector.broadcast %74 : vector<1x128xf32> to vector<128x128xf32>
    %76 = arith.mulf %71, %75 : vector<128x128xf32>
    %c6_i32 = arith.constant 6 : i32
    %cst_23 = arith.constant dense<0.000000e+00> : vector<128xf32>
    %77 = vector.multi_reduction <add>, %76, %cst_23 [1] : vector<128x128xf32> to vector<128xf32>
    %78 = vector.shape_cast %77 : vector<128xf32> to vector<128x1xf32>
    %79 = tpu.reciprocal %78 {approx = true} : vector<128x1xf32> -> vector<128x1xf32>
    %80 = vector.broadcast %79 : vector<128x1xf32> to vector<128x128xf32>
    %81 = arith.mulf %76, %80 : vector<128x128xf32>
    %cst_24 = arith.constant dense<0.000000e+00> : vector<128xf32>
    %82 = vector.multi_reduction <add>, %81, %cst_24 [0] : vector<128x128xf32> to vector<128xf32>
    %83 = vector.shape_cast %82 : vector<128xf32> to vector<1x128xf32>
    %84 = tpu.reciprocal %83 {approx = true} : vector<1x128xf32> -> vector<1x128xf32>
    %85 = vector.broadcast %84 : vector<1x128xf32> to vector<128x128xf32>
    %86 = arith.mulf %81, %85 : vector<128x128xf32>
    %c7_i32 = arith.constant 7 : i32
    %cst_25 = arith.constant dense<0.000000e+00> : vector<128xf32>
    %87 = vector.multi_reduction <add>, %86, %cst_25 [1] : vector<128x128xf32> to vector<128xf32>
    %88 = vector.shape_cast %87 : vector<128xf32> to vector<128x1xf32>
    %89 = tpu.reciprocal %88 {approx = true} : vector<128x1xf32> -> vector<128x1xf32>
    %90 = vector.broadcast %89 : vector<128x1xf32> to vector<128x128xf32>
    %91 = arith.mulf %86, %90 : vector<128x128xf32>
    %cst_26 = arith.constant dense<0.000000e+00> : vector<128xf32>
    %92 = vector.multi_reduction <add>, %91, %cst_26 [0] : vector<128x128xf32> to vector<128xf32>
    %93 = vector.shape_cast %92 : vector<128xf32> to vector<1x128xf32>
    %94 = tpu.reciprocal %93 {approx = true} : vector<1x128xf32> -> vector<1x128xf32>
    %95 = vector.broadcast %94 : vector<1x128xf32> to vector<128x128xf32>
    %96 = arith.mulf %91, %95 : vector<128x128xf32>
    %c8_i32 = arith.constant 8 : i32
    %cst_27 = arith.constant dense<0.000000e+00> : vector<128xf32>
    %97 = vector.multi_reduction <add>, %96, %cst_27 [1] : vector<128x128xf32> to vector<128xf32>
    %98 = vector.shape_cast %97 : vector<128xf32> to vector<128x1xf32>
    %99 = tpu.reciprocal %98 {approx = true} : vector<128x1xf32> -> vector<128x1xf32>
    %100 = vector.broadcast %99 : vector<128x1xf32> to vector<128x128xf32>
    %101 = arith.mulf %96, %100 : vector<128x128xf32>
    %cst_28 = arith.constant dense<0.000000e+00> : vector<128xf32>
    %102 = vector.multi_reduction <add>, %101, %cst_28 [0] : vector<128x128xf32> to vector<128xf32>
    %103 = vector.shape_cast %102 : vector<128xf32> to vector<1x128xf32>
    %104 = tpu.reciprocal %103 {approx = true} : vector<1x128xf32> -> vector<1x128xf32>
    %105 = vector.broadcast %104 : vector<1x128xf32> to vector<128x128xf32>
    %106 = arith.mulf %101, %105 : vector<128x128xf32>
    %c9_i32 = arith.constant 9 : i32
    %cst_29 = arith.constant dense<0.000000e+00> : vector<128xf32>
    %107 = vector.multi_reduction <add>, %106, %cst_29 [1] : vector<128x128xf32> to vector<128xf32>
    %108 = vector.shape_cast %107 : vector<128xf32> to vector<128x1xf32>
    %109 = tpu.reciprocal %108 {approx = true} : vector<128x1xf32> -> vector<128x1xf32>
    %110 = vector.broadcast %109 : vector<128x1xf32> to vector<128x128xf32>
    %111 = arith.mulf %106, %110 : vector<128x128xf32>
    %cst_30 = arith.constant dense<0.000000e+00> : vector<128xf32>
    %112 = vector.multi_reduction <add>, %111, %cst_30 [0] : vector<128x128xf32> to vector<128xf32>
    %113 = vector.shape_cast %112 : vector<128xf32> to vector<1x128xf32>
    %114 = tpu.reciprocal %113 {approx = true} : vector<1x128xf32> -> vector<1x128xf32>
    %115 = vector.broadcast %114 : vector<1x128xf32> to vector<128x128xf32>
    %116 = arith.mulf %111, %115 : vector<128x128xf32>
    %c10_i32 = arith.constant 10 : i32
    %cst_31 = arith.constant dense<0.000000e+00> : vector<128xf32>
    %117 = vector.multi_reduction <add>, %116, %cst_31 [1] : vector<128x128xf32> to vector<128xf32>
    %118 = vector.shape_cast %117 : vector<128xf32> to vector<128x1xf32>
    %119 = tpu.reciprocal %118 {approx = true} : vector<128x1xf32> -> vector<128x1xf32>
    %120 = vector.broadcast %119 : vector<128x1xf32> to vector<128x128xf32>
    %121 = arith.mulf %116, %120 : vector<128x128xf32>
    %cst_32 = arith.constant dense<0.000000e+00> : vector<128xf32>
    %122 = vector.multi_reduction <add>, %121, %cst_32 [0] : vector<128x128xf32> to vector<128xf32>
    %123 = vector.shape_cast %122 : vector<128xf32> to vector<1x128xf32>
    %124 = tpu.reciprocal %123 {approx = true} : vector<1x128xf32> -> vector<1x128xf32>
    %125 = vector.broadcast %124 : vector<1x128xf32> to vector<128x128xf32>
    %126 = arith.mulf %121, %125 : vector<128x128xf32>
    %c11_i32 = arith.constant 11 : i32
    %cst_33 = arith.constant dense<0.000000e+00> : vector<128xf32>
    %127 = vector.multi_reduction <add>, %126, %cst_33 [1] : vector<128x128xf32> to vector<128xf32>
    %128 = vector.shape_cast %127 : vector<128xf32> to vector<128x1xf32>
    %129 = tpu.reciprocal %128 {approx = true} : vector<128x1xf32> -> vector<128x1xf32>
    %130 = vector.broadcast %129 : vector<128x1xf32> to vector<128x128xf32>
    %131 = arith.mulf %126, %130 : vector<128x128xf32>
    %cst_34 = arith.constant dense<0.000000e+00> : vector<128xf32>
    %132 = vector.multi_reduction <add>, %131, %cst_34 [0] : vector<128x128xf32> to vector<128xf32>
    %133 = vector.shape_cast %132 : vector<128xf32> to vector<1x128xf32>
    %134 = tpu.reciprocal %133 {approx = true} : vector<1x128xf32> -> vector<1x128xf32>
    %135 = vector.broadcast %134 : vector<1x128xf32> to vector<128x128xf32>
    %136 = arith.mulf %131, %135 : vector<128x128xf32>
    %c12_i32 = arith.constant 12 : i32
    %cst_35 = arith.constant dense<0.000000e+00> : vector<128xf32>
    %137 = vector.multi_reduction <add>, %136, %cst_35 [1] : vector<128x128xf32> to vector<128xf32>
    %138 = vector.shape_cast %137 : vector<128xf32> to vector<128x1xf32>
    %139 = tpu.reciprocal %138 {approx = true} : vector<128x1xf32> -> vector<128x1xf32>
    %140 = vector.broadcast %139 : vector<128x1xf32> to vector<128x128xf32>
    %141 = arith.mulf %136, %140 : vector<128x128xf32>
    %cst_36 = arith.constant dense<0.000000e+00> : vector<128xf32>
    %142 = vector.multi_reduction <add>, %141, %cst_36 [0] : vector<128x128xf32> to vector<128xf32>
    %143 = vector.shape_cast %142 : vector<128xf32> to vector<1x128xf32>
    %144 = tpu.reciprocal %143 {approx = true} : vector<1x128xf32> -> vector<1x128xf32>
    %145 = vector.broadcast %144 : vector<1x128xf32> to vector<128x128xf32>
    %146 = arith.mulf %141, %145 : vector<128x128xf32>
    %c13_i32 = arith.constant 13 : i32
    %cst_37 = arith.constant dense<0.000000e+00> : vector<128xf32>
    %147 = vector.multi_reduction <add>, %146, %cst_37 [1] : vector<128x128xf32> to vector<128xf32>
    %148 = vector.shape_cast %147 : vector<128xf32> to vector<128x1xf32>
    %149 = tpu.reciprocal %148 {approx = true} : vector<128x1xf32> -> vector<128x1xf32>
    %150 = vector.broadcast %149 : vector<128x1xf32> to vector<128x128xf32>
    %151 = arith.mulf %146, %150 : vector<128x128xf32>
    %cst_38 = arith.constant dense<0.000000e+00> : vector<128xf32>
    %152 = vector.multi_reduction <add>, %151, %cst_38 [0] : vector<128x128xf32> to vector<128xf32>
    %153 = vector.shape_cast %152 : vector<128xf32> to vector<1x128xf32>
    %154 = tpu.reciprocal %153 {approx = true} : vector<1x128xf32> -> vector<1x128xf32>
    %155 = vector.broadcast %154 : vector<1x128xf32> to vector<128x128xf32>
    %156 = arith.mulf %151, %155 : vector<128x128xf32>
    %c14_i32 = arith.constant 14 : i32
    %cst_39 = arith.constant dense<0.000000e+00> : vector<128xf32>
    %157 = vector.multi_reduction <add>, %156, %cst_39 [1] : vector<128x128xf32> to vector<128xf32>
    %158 = vector.shape_cast %157 : vector<128xf32> to vector<128x1xf32>
    %159 = tpu.reciprocal %158 {approx = true} : vector<128x1xf32> -> vector<128x1xf32>
    %160 = vector.broadcast %159 : vector<128x1xf32> to vector<128x128xf32>
    %161 = arith.mulf %156, %160 : vector<128x128xf32>
    %cst_40 = arith.constant dense<0.000000e+00> : vector<128xf32>
    %162 = vector.multi_reduction <add>, %161, %cst_40 [0] : vector<128x128xf32> to vector<128xf32>
    %163 = vector.shape_cast %162 : vector<128xf32> to vector<1x128xf32>
    %164 = tpu.reciprocal %163 {approx = true} : vector<1x128xf32> -> vector<1x128xf32>
    %165 = vector.broadcast %164 : vector<1x128xf32> to vector<128x128xf32>
    %166 = arith.mulf %161, %165 : vector<128x128xf32>
    %c15_i32 = arith.constant 15 : i32
    %cst_41 = arith.constant dense<0.000000e+00> : vector<128xf32>
    %167 = vector.multi_reduction <add>, %166, %cst_41 [1] : vector<128x128xf32> to vector<128xf32>
    %168 = vector.shape_cast %167 : vector<128xf32> to vector<128x1xf32>
    %169 = tpu.reciprocal %168 {approx = true} : vector<128x1xf32> -> vector<128x1xf32>
    %170 = vector.broadcast %169 : vector<128x1xf32> to vector<128x128xf32>
    %171 = arith.mulf %166, %170 : vector<128x128xf32>
    %cst_42 = arith.constant dense<0.000000e+00> : vector<128xf32>
    %172 = vector.multi_reduction <add>, %171, %cst_42 [0] : vector<128x128xf32> to vector<128xf32>
    %173 = vector.shape_cast %172 : vector<128xf32> to vector<1x128xf32>
    %174 = tpu.reciprocal %173 {approx = true} : vector<1x128xf32> -> vector<1x128xf32>
    %175 = vector.broadcast %174 : vector<1x128xf32> to vector<128x128xf32>
    %176 = arith.mulf %171, %175 : vector<128x128xf32>
    %c16_i32 = arith.constant 16 : i32
    %cst_43 = arith.constant dense<0.000000e+00> : vector<128xf32>
    %177 = vector.multi_reduction <add>, %176, %cst_43 [1] : vector<128x128xf32> to vector<128xf32>
    %178 = vector.shape_cast %177 : vector<128xf32> to vector<128x1xf32>
    %179 = tpu.reciprocal %178 {approx = true} : vector<128x1xf32> -> vector<128x1xf32>
    %180 = vector.broadcast %179 : vector<128x1xf32> to vector<128x128xf32>
    %181 = arith.mulf %176, %180 : vector<128x128xf32>
    %cst_44 = arith.constant dense<0.000000e+00> : vector<128xf32>
    %182 = vector.multi_reduction <add>, %181, %cst_44 [0] : vector<128x128xf32> to vector<128xf32>
    %183 = vector.shape_cast %182 : vector<128xf32> to vector<1x128xf32>
    %184 = tpu.reciprocal %183 {approx = true} : vector<1x128xf32> -> vector<1x128xf32>
    %185 = vector.broadcast %184 : vector<1x128xf32> to vector<128x128xf32>
    %186 = arith.mulf %181, %185 : vector<128x128xf32>
    %c17_i32 = arith.constant 17 : i32
    %cst_45 = arith.constant dense<0.000000e+00> : vector<128xf32>
    %187 = vector.multi_reduction <add>, %186, %cst_45 [1] : vector<128x128xf32> to vector<128xf32>
    %188 = vector.shape_cast %187 : vector<128xf32> to vector<128x1xf32>
    %189 = tpu.reciprocal %188 {approx = true} : vector<128x1xf32> -> vector<128x1xf32>
    %190 = vector.broadcast %189 : vector<128x1xf32> to vector<128x128xf32>
    %191 = arith.mulf %186, %190 : vector<128x128xf32>
    %cst_46 = arith.constant dense<0.000000e+00> : vector<128xf32>
    %192 = vector.multi_reduction <add>, %191, %cst_46 [0] : vector<128x128xf32> to vector<128xf32>
    %193 = vector.shape_cast %192 : vector<128xf32> to vector<1x128xf32>
    %194 = tpu.reciprocal %193 {approx = true} : vector<1x128xf32> -> vector<1x128xf32>
    %195 = vector.broadcast %194 : vector<1x128xf32> to vector<128x128xf32>
    %196 = arith.mulf %191, %195 : vector<128x128xf32>
    %cst_47 = arith.constant dense<0.000000e+00> : vector<128xf32>
    %197 = vector.multi_reduction <add>, %196, %cst_47 [1] : vector<128x128xf32> to vector<128xf32>
    %198 = vector.shape_cast %197 : vector<128xf32> to vector<128x1xf32>
    %199 = tpu.reciprocal %198 {approx = true} : vector<128x1xf32> -> vector<128x1xf32>
    %200 = arith.mulf %198, %199 : vector<128x1xf32>
    %cst_48 = arith.constant 2.000000e+00 : f32
    %201 = vector.broadcast %cst_48 : f32 to vector<128x1xf32>
    %202 = arith.subf %201, %200 : vector<128x1xf32>
    %203 = arith.mulf %199, %202 : vector<128x1xf32>
    %204 = vector.broadcast %203 : vector<128x1xf32> to vector<128x128xf32>
    %205 = arith.mulf %196, %204 : vector<128x128xf32>
    %cst_49 = arith.constant dense<0.000000e+00> : vector<128xf32>
    %206 = vector.multi_reduction <add>, %205, %cst_49 [0] : vector<128x128xf32> to vector<128xf32>
    %207 = vector.shape_cast %206 : vector<128xf32> to vector<1x128xf32>
    %208 = tpu.reciprocal %207 {approx = true} : vector<1x128xf32> -> vector<1x128xf32>
    %209 = arith.mulf %207, %208 : vector<1x128xf32>
    %cst_50 = arith.constant 2.000000e+00 : f32
    %210 = vector.broadcast %cst_50 : f32 to vector<1x128xf32>
    %211 = arith.subf %210, %209 : vector<1x128xf32>
    %212 = arith.mulf %208, %211 : vector<1x128xf32>
    %213 = vector.broadcast %212 : vector<1x128xf32> to vector<128x128xf32>
    %214 = arith.mulf %205, %213 : vector<128x128xf32>
    %cst_51 = arith.constant dense<0.000000e+00> : vector<128xf32>
    %215 = vector.multi_reduction <add>, %214, %cst_51 [1] : vector<128x128xf32> to vector<128xf32>
    %216 = vector.shape_cast %215 : vector<128xf32> to vector<128x1xf32>
    %217 = tpu.reciprocal %216 {approx = true} : vector<128x1xf32> -> vector<128x1xf32>
    %218 = arith.mulf %216, %217 : vector<128x1xf32>
    %cst_52 = arith.constant 2.000000e+00 : f32
    %219 = vector.broadcast %cst_52 : f32 to vector<128x1xf32>
    %220 = arith.subf %219, %218 : vector<128x1xf32>
    %221 = arith.mulf %217, %220 : vector<128x1xf32>
    %222 = vector.broadcast %221 : vector<128x1xf32> to vector<128x128xf32>
    %223 = arith.mulf %214, %222 : vector<128x128xf32>
    %cst_53 = arith.constant dense<0.000000e+00> : vector<128xf32>
    %224 = vector.multi_reduction <add>, %223, %cst_53 [0] : vector<128x128xf32> to vector<128xf32>
    %225 = vector.shape_cast %224 : vector<128xf32> to vector<1x128xf32>
    %226 = tpu.reciprocal %225 {approx = true} : vector<1x128xf32> -> vector<1x128xf32>
    %227 = arith.mulf %225, %226 : vector<1x128xf32>
    %cst_54 = arith.constant 2.000000e+00 : f32
    %228 = vector.broadcast %cst_54 : f32 to vector<1x128xf32>
    %229 = arith.subf %228, %227 : vector<1x128xf32>
    %230 = arith.mulf %226, %229 : vector<1x128xf32>
    %231 = vector.broadcast %230 : vector<1x128xf32> to vector<128x128xf32>
    %232 = arith.mulf %223, %231 : vector<128x128xf32>
    %cst_55 = arith.constant dense<0.000000e+00> : vector<128x32xf32>
    %233 = tpu.matmul %232, %3, %cst_55 {dimension_numbers = #tpu.dot_dimension_numbers<[0], [0], [1], [1], [0, 1, 1, 1], [], []>} : vector<128x128xf32>, vector<128x32xf32>, vector<128x32xf32> -> vector<128x32xf32>
    %234 = arith.subf %233, %1 : vector<128x32xf32>
    %235 = arith.mulf %234, %234 : vector<128x32xf32>
    %cst_56 = arith.constant dense<0.000000e+00> : vector<128xf32>
    %236 = vector.multi_reduction <add>, %235, %cst_56 [1] : vector<128x32xf32> to vector<128xf32>
    %237 = vector.shape_cast %236 : vector<128xf32> to vector<128x1xf32>
    %c0_57 = arith.constant 0 : index
    %c0_58 = arith.constant 0 : index
    %238 = vector.load %arg2[%c0_57, %c0_58] : memref<16x128xf32, #tpu.memory_space<vmem>>, vector<16x128xf32>
    %cst_59 = arith.constant dense<0.000000e+00> : vector<16x1xf32>
    %239 = tpu.matmul %238, %237, %cst_59 {dimension_numbers = #tpu.dot_dimension_numbers<[1], [0], [0], [1], [0, 0, 1, 1], [], []>} : vector<16x128xf32>, vector<128x1xf32>, vector<16x1xf32> -> vector<16x1xf32>
    %cst_60 = arith.constant 3.906250e-03 : f32
    %240 = vector.broadcast %cst_60 : f32 to vector<16x1xf32>
    %241 = arith.mulf %239, %240 : vector<16x1xf32>
    %242 = vector.shape_cast %241 : vector<16x1xf32> to vector<16x1xf32>
    %243 = vector.broadcast %242 : vector<16x1xf32> to vector<16x128xf32>
    %c0_61 = arith.constant 0 : index
    %c0_62 = arith.constant 0 : index
    %c0_63 = arith.constant 0 : index
    %244 = vector.load %arg5[%c0_61, %c0_62, %c0_63] : memref<1x16x128xf32, #tpu.memory_space<vmem>>, vector<1x16x128xf32>
    %245 = vector.shape_cast %244 : vector<1x16x128xf32> to vector<16x128xf32>
    %246 = vector.shape_cast %243 : vector<16x128xf32> to vector<1x16x128xf32>
    tpu.vector_store %arg5[%c0_61, %c0_62, %c0_63], %246 {strides = array<i32>} : memref<1x16x128xf32, #tpu.memory_space<vmem>>, vector<1x16x128xf32>,
    return
  }
  func.func @transform_0(%arg0: i32) -> (i32, i32) {
    %c0_i32 = arith.constant 0 : i32
    %c0_i32_0 = arith.constant 0 : i32
    %c0_i32_1 = arith.constant 0 : i32
    return %c0_i32, %c0_i32_0 : i32, i32
  }
  func.func @transform_1(%arg0: i32) -> (i32, i32) {
    %c0_i32 = arith.constant 0 : i32
    %c0_i32_0 = arith.constant 0 : i32
    %c0_i32_1 = arith.constant 0 : i32
    return %c0_i32, %c0_i32_0 : i32, i32
  }
  func.func @transform_2(%arg0: i32) -> (i32, i32, i32) {
    %c0_i32 = arith.constant 0 : i32
    %c0_i32_0 = arith.constant 0 : i32
    %c0_i32_1 = arith.constant 0 : i32
    return %arg0, %c0_i32, %c0_i32_0 : i32, i32, i32
  }
  func.func @transform_3(%arg0: i32) -> (i32, i32, i32) {
    %c0_i32 = arith.constant 0 : i32
    %c0_i32_0 = arith.constant 0 : i32
    %c0_i32_1 = arith.constant 0 : i32
    return %arg0, %c0_i32, %c0_i32_0 : i32, i32, i32
  }
  func.func @transform_4(%arg0: i32) -> (i32, i32, i32) {
    %c0_i32 = arith.constant 0 : i32
    %c0_i32_0 = arith.constant 0 : i32
    %c0_i32_1 = arith.constant 0 : i32
    return %arg0, %c0_i32, %c0_i32_0 : i32, i32, i32
  }
}

</mosaic_0001>

<bundles_post_ra>
// kernel: tpu_custom_call.1
= control target key start
LH: loop header
LB: loop body
LE: loop exit
PB: predicated region body
PF: predicated region fallthrough
CT: control target
= control target key end

     0   :  { %9 = vsyncpa [#allocation3], 0  ;;  %s6097_s0 = inlined_call_operand.vmem [shape: f32[128,128], index: 0, kind: input, shape index: {}]   ;;  %s6098_s1 = inlined_call_operand.vmem [shape: f32[16,128], index: 1, kind: input, shape index: {}]   ;;  %s6099_s2 = inlined_call_operand.vmem [shape: f32[2,128,32], index: 2, kind: input, shape index: {}]   ;;  %s6100_s3 = inlined_call_operand.vmem [shape: f32[2,128,32], index: 3, kind: input, shape index: {}]   ;;  %s6101_s4 = inlined_call_operand.hbm [shape: f32[2,16,128], index: 4, kind: output, shape index: {}]  }
   0x1   :  { %11 = vsyncpa [#allocation3 + $0x1], 0  ;;  %s4483_s15 = smov 0   ;;  %s4485_s16 = smov 0  }
   0x2   :  { %s4487_s17 = smov 0   ;;  %s4489_s18 = smov 0  }
   0x3 LB: > { %s4504_s19 = sadd.s32 4294967295, %s4452_s18   ;;  %s3212_s20 = sadd.s32 4294967294, %s4452_s18   ;;  %s4452_s18 = sphi %s4489_s18, %s6109_s18   ;;  %s4448_s17 = sphi %s4487_s17, %s6108_s17   ;;  %s4444_s16 = sphi %s4485_s16, %s6107_s16   ;;  %s4440_s15 = sphi %s4483_s15, %s6106_s15  }
   0x4   : > { %s4508_s21 = sadd.s32 1, %s4452_s18   ;;  %s118_s22 = sadd.s32 1, %s4448_s17 }
   0x5   : > { %s115_s23 = ssub.s32 %s4452_s18, %s4508_s21  ;;  %p128_p0 = scmp.ne.s32.totalorder %s4448_s17, %s4444_s16 }
   0x6   : > { %p116_p1 = scmp.eq.s32.totalorder %s115_s23, 0  ;;  %p129_p2 = scmp.eq.s32.totalorder %s4504_s19, 1 }
   0x7   : > { %p134_p3 = scmp.ne.s32.totalorder %s4444_s16, %s4440_s15  ;;  %p135_p4 = scmp.eq.s32.totalorder %s3212_s20, 1 }
   0x8   : > { %s4519_s24 = scalar_select %p116_p1, %s4448_s17, %s118_s22  }
   0x9   : > { %p4521_p5 = por %p129_p2, %p128_p0  ;;  %p4525_p6 = por %p135_p4, %p134_p3 }
   0xa   : > { %p3215_p7 = scmp.ge.s32.totalorder %s4452_s18, 1  ;;  %p175_p8 = scmp.lt.s32.totalorder %s4452_s18, 3 }
   0xc   : > { %p176_p9 = pnand %p3215_p7, %p175_p8 }
   0xd   : > { %p206_p10 = scmp.lt.s32.totalorder (!%p176_p9), %s4504_s19, 1  ;;  %vm280_vm0 = vcmask (!%p176_p9), 261120   ;;  %v248_v57 = vld [vmem:[%s6097_s0] sm:$0xff] (!%p176_p9)  ;;  %v249_v59 = vld [vmem:[%s6097_s0 + $0x8] sm:$0xff] (!%p176_p9)  ;;  %v250_v60 = vld [vmem:[%s6097_s0 + $0x10] sm:$0xff] (!%p176_p9)  ;;  %s203_s13 = sand.u32 (!%p176_p9), 1, %s4444_s16  }
   0xe   : > { %179 = sbr.rel (%p176_p9) target bundleno = 5669 (0x1625), region = 36  ;;  %vm4540_vm1 = vmpackc.low (!%p176_p9), %vm280_vm0, %vm280_vm0  ;;  %vm522_vm2 = vcmp.gt.f32.partialorder (!%p176_p9), %v248_v57, 0.0  ;;  %vm523_vm3 = vcmp.gt.f32.partialorder (!%p176_p9), %v249_v59, 0.0  ;;  %vm524_vm4 = vcmp.gt.f32.partialorder (!%p176_p9), %v250_v60, 0.0  ;;  %v251_v0 = vld [vmem:[%s6097_s0 + $0x18] sm:$0xff] (!%p176_p9)  ;;  %s3216_s14 = sshll.u32 (!%p176_p9), %s203_s13, 4 }
   0xf   : > { %vm525_vm5 = vcmp.gt.f32.partialorder (!%p176_p9), %v251_v0, 0.0  ;;  %s205_s20 = scalar_lea.vmem (!%p176_p9), [#allocation2], %s3216_s14  ;;  %s3260_s23 = sshll.u32 (!%p176_p9), %s4504_s19, 8 }
  0x10   : > { %s3138_s22 = sshll.u32 (!%p176_p9), %s205_s20, 4  ;;  %s6054_s29 = scalar_lea.hbm (!%p176_p9), %s6101_s4, %s3260_s23  ;;  %s6049_s22 = int_to_ptr.vmem [resolvable:$true] %s3138_s22 }
  0x11   : > { %s6056_s30 = scalar_lea.sflag (!%p176_p9), [#allocation3], %s203_s13  ;;  %s4390_s6 = scalar_lea.vmem (!%p176_p9), %s6049_s22, 256 }
  0x12   : > { %p4391_p11 = scmp.ne.s32.totalorder (!%p176_p9), %s6049_s22, %s4390_s6 }
  0x14   : > { %p4392_p12 = pnand (!%p176_p9), %p4391_p11, %p4521_p5 }
  0x15   : > { %s207_s27 = scalar_select %p206_p10, %s4504_s19, 1 }
  0x16   : > { %p4393_p13 = pneg %p4392_p12  ;;  %s4455_s19 = smov [#allocation2]  }
  0x17   : > { %s3258_s28 = sshll.u32 %s207_s27, 7  ;;  %s4394_s7 = sshll.u32 %s4455_s19, 4  ;;  %s4395_s7 = int_to_ptr.vmem [resolvable:$false] %s4394_s7 }
  0x18   : > { %s4536_s5 = scalar_lea.vmem %s6099_s2, %s3258_s28  ;;  %s4551_s8 = scalar_lea.vmem %s6100_s3, %s3258_s28 }
  0x19   : > { %v216_v1 = vld [vmem:[%s4536_s5] sm:$0xff]  ;;  %v217_v2 = vld [vmem:[%s4536_s5 + $0x8] sm:$0xff]  ;;  %v218_v3 = vld [vmem:[%s4536_s5 + $0x10] sm:$0xff]  ;;  %s4396_s9 = scalar_lea.vmem %s4395_s7, 512  ;;  %p4397_p0 = scmp.lt.s32.totalorder %s6049_s22, %s4395_s7 }
  0x1a   : > { %v3490_v4 = vpack.c.bf16 %v217_v2, %v216_v1  ;;  %v219_v5 = vld [vmem:[%s4536_s5 + $0x18] sm:$0xff]  ;;  %v232_v7 = vld [vmem:[%s4551_s8] sm:$0xff]  ;;  %v221_v9 = vld [vmem:[%s4536_s5 + $0x28] sm:$0xff]  ;;  %p4398_p1 = scmp.lt.s32.totalorder %s4396_s9, %s4390_s6 }
  0x1b   : > { %v3496_v6 = vpack.c.bf16 %v219_v5, %v218_v3  ;;  %v220_v8 = vld [vmem:[%s4536_s5 + $0x20] sm:$0xff]  ;;  %v264_v10 = vmul.f32 20.0, %v232_v7  ;;  %v222_v12 = vld [vmem:[%s4536_s5 + $0x30] sm:$0xff]  ;;  %v223_v13 = vld [vmem:[%s4536_s5 + $0x38] sm:$0xff] }
  0x1c   : > { %3492 = vmatprep.subr.msk.bf16.mxu0 %vm4540_vm1, %v3490_v4  ;;  %v3502_v11 = vpack.c.bf16 %v221_v9, %v220_v8  ;;  %v3508_v14 = vpack.c.bf16 %v223_v13, %v222_v12  ;;  %v224_v15 = vld [vmem:[%s4536_s5 + $0x40] sm:$0xff]  ;;  %v225_v16 = vld [vmem:[%s4536_s5 + $0x48] sm:$0xff]  ;;  %v226_v18 = vld [vmem:[%s4536_s5 + $0x50] sm:$0xff]  ;;  %p4399_p2 = por %p4398_p1, %p4397_p0 }
  0x1d   : > { %3495 = vmatpush3.bf16.xpose.msk.msra.mxu0 %vm4540_vm1, %v3490_v4  ;;  %3375 = vmatprep.mubr.msk.f32.mxu0 %vm280_vm0, %v264_v10  ;;  %v3514_v17 = vpack.c.bf16 %v225_v16, %v224_v15  ;;  %v227_v19 = vld [vmem:[%s4536_s5 + $0x58] sm:$0xff]  ;;  %v228_v21 = vld [vmem:[%s4536_s5 + $0x60] sm:$0xff]  ;;  %v229_v22 = vld [vmem:[%s4536_s5 + $0x68] sm:$0xff] }
  0x1e   : > { %3498 = vmatprep.subr.msk.bf16.mxu0 %vm4540_vm1, %v3496_v6  ;;  %v3520_v20 = vpack.c.bf16 %v227_v19, %v226_v18  ;;  %v3526_v23 = vpack.c.bf16 %v229_v22, %v228_v21  ;;  %v230_v24 = vld [vmem:[%s4536_s5 + $0x70] sm:$0xff]  ;;  %v231_v25 = vld [vmem:[%s4536_s5 + $0x78] sm:$0xff]  ;;  %v233_v27 = vld [vmem:[%s4551_s8 + $0x8] sm:$0xff]  ;;  %p4400_p3 = pnand %p4399_p2, %p4393_p13 }
  0x1f   : > { %v3532_v26 = vpack.c.bf16 %v231_v25, %v230_v24  ;;  %v234_v28 = vld [vmem:[%s4551_s8 + $0x10] sm:$0xff]  ;;  %v265_v29 = vmul.f32 20.0, %v233_v27  ;;  %v235_v31 = vld [vmem:[%s4551_s8 + $0x18] sm:$0xff]  ;;  %v236_v32 = vld [vmem:[%s4551_s8 + $0x20] sm:$0xff] }
  0x20   : > { %v266_v30 = vmul.f32 20.0, %v234_v28  ;;  %v267_v33 = vmul.f32 20.0, %v235_v31  ;;  %v268_v34 = vmul.f32 20.0, %v236_v32  ;;  %v237_v35 = vld [vmem:[%s4551_s8 + $0x28] sm:$0xff]  ;;  %v238_v36 = vld [vmem:[%s4551_s8 + $0x30] sm:$0xff]  ;;  %v239_v39 = vld [vmem:[%s4551_s8 + $0x38] sm:$0xff] }
  0x21   : > { %v269_v37 = vmul.f32 20.0, %v237_v35  ;;  %v270_v38 = vmul.f32 20.0, %v238_v36  ;;  %v240_v40 = vld [vmem:[%s4551_s8 + $0x40] sm:$0xff]  ;;  %v271_v41 = vmul.f32 20.0, %v239_v39  ;;  %v241_v43 = vld [vmem:[%s4551_s8 + $0x48] sm:$0xff]  ;;  %v242_v44 = vld [vmem:[%s4551_s8 + $0x50] sm:$0xff] }
  0x22   : > { %v272_v42 = vmul.f32 20.0, %v240_v40  ;;  %v273_v45 = vmul.f32 20.0, %v241_v43  ;;  %v274_v46 = vmul.f32 20.0, %v242_v44  ;;  %v243_v47 = vld [vmem:[%s4551_s8 + $0x58] sm:$0xff]  ;;  %v244_v48 = vld [vmem:[%s4551_s8 + $0x60] sm:$0xff]  ;;  %v245_v51 = vld [vmem:[%s4551_s8 + $0x68] sm:$0xff] }
  0x23   : > { %v275_v49 = vmul.f32 20.0, %v243_v47  ;;  %v276_v50 = vmul.f32 20.0, %v244_v48  ;;  %v246_v52 = vld [vmem:[%s4551_s8 + $0x70] sm:$0xff]  ;;  %v277_v53 = vmul.f32 20.0, %v245_v51  ;;  %v247_v55 = vld [vmem:[%s4551_s8 + $0x78] sm:$0xff]  ;;  %v252_v1 = vld [vmem:[%s6097_s0 + $0x20] sm:$0xff] }
  0x24   : > { %v278_v54 = vmul.f32 20.0, %v246_v52  ;;  %v279_v56 = vmul.f32 20.0, %v247_v55  ;;  %vm526_vm6 = vcmp.gt.f32.partialorder %v252_v1, 0.0  ;;  %v254_v7 = vld [vmem:[%s6097_s0 + $0x30] sm:$0xff]  ;;  %v255_v12 = vld [vmem:[%s6097_s0 + $0x38] sm:$0xff]  ;;  %v256_v13 = vld [vmem:[%s6097_s0 + $0x40] sm:$0xff] }
  0x25   : > { %3501 = vmatpush3.bf16.xpose.msk.msra.mxu0 %vm4540_vm1, %v3496_v6  ;;  %v253_v6 = vld [vmem:[%s6097_s0 + $0x28] sm:$0xff]  ;;  %vm528_vm8 = vcmp.gt.f32.partialorder %v254_v7, 0.0  ;;  %vm529_vm9 = vcmp.gt.f32.partialorder %v255_v12, 0.0  ;;  %vm530_vm10 = vcmp.gt.f32.partialorder %v256_v13, 0.0  ;;  %v258_v19 = vld [vmem:[%s6097_s0 + $0x50] sm:$0xff]  ;;  %v259_v24 = vld [vmem:[%s6097_s0 + $0x58] sm:$0xff] }
  0x26   : > { %3504 = vmatprep.subr.msk.bf16.mxu0 %vm4540_vm1, %v3502_v11  ;;  %vm527_vm7 = vcmp.gt.f32.partialorder %v253_v6, 0.0  ;;  %v257_v18 = vld [vmem:[%s6097_s0 + $0x48] sm:$0xff]  ;;  %vm532_vm12 = vcmp.gt.f32.partialorder %v258_v19, 0.0  ;;  %v260_v25 = vld [vmem:[%s6097_s0 + $0x60] sm:$0xff]  ;;  %vm533_vm13 = vcmp.gt.f32.partialorder %v259_v24, 0.0  ;;  %v262_v31 = vld [vmem:[%s6097_s0 + $0x70] sm:$0xff] }
  0x27   : > { %vm531_vm11 = vcmp.gt.f32.partialorder %v257_v18, 0.0  ;;  %vm534_vm14 = vcmp.gt.f32.partialorder %v260_v25, 0.0  ;;  %v263_v36 = vld [vmem:[%s6097_s0 + $0x78] sm:$0xff] }
  0x2d   : > { %3507 = vmatpush3.bf16.xpose.msk.msra.mxu0 %vm4540_vm1, %v3502_v11 }
  0x2e   : > { %3510 = vmatprep.subr.msk.bf16.mxu0 %vm4540_vm1, %v3508_v14 }
  0x35   : > { %3513 = vmatpush3.bf16.xpose.msk.msra.mxu0 %vm4540_vm1, %v3508_v14 }
  0x36   : > { %3516 = vmatprep.subr.msk.bf16.mxu0 %vm4540_vm1, %v3514_v17 }
  0x3d   : > { %3519 = vmatpush3.bf16.xpose.msk.msra.mxu0 %vm4540_vm1, %v3514_v17 }
  0x3e   : > { %3522 = vmatprep.subr.msk.bf16.mxu0 %vm4540_vm1, %v3520_v20 }
  0x45   : > { %3525 = vmatpush3.bf16.xpose.msk.msra.mxu0 %vm4540_vm1, %v3520_v20 }
  0x46   : > { %3528 = vmatprep.subr.msk.bf16.mxu0 %vm4540_vm1, %v3526_v23 }
  0x4d   : > { %3531 = vmatpush3.bf16.xpose.msk.msra.mxu0 %vm4540_vm1, %v3526_v23 }
  0x4e   : > { %3534 = vmatprep.subr.msk.bf16.mxu0 %vm4540_vm1, %v3532_v26 }
  0x55   : > { %3537 = vmatpush3.bf16.xpose.msk.msra.mxu0 %vm4540_vm1, %v3532_v26  ;;  %vm536_vm1 = vcmp.gt.f32.partialorder %v262_v31, 0.0 }
  0x5c   : > { %3376 = vmatmul.mubr.msk.f32.vlgmr.msra.gmra.mrb[0].mxu0 %vm280_vm0, %v265_v29 }
  0x5d   : > { %3378 = vmatprep.mubr.msk.f32.mxu0 %vm280_vm0, %v266_v30  ;;  %v261_v30 = vld [vmem:[%s6097_s0 + $0x68] sm:$0xff] }
  0x5e   : > { %vm535_vm15 = vcmp.gt.f32.partialorder %v261_v30, 0.0 }
  0x60   : > { %3379 = vmatmul.mubr.msk.f32.gmra.mrb[2].mxu0 %vm280_vm0, %v267_v33 }
  0x61   : > { %3381 = vmatprep.mubr.msk.f32.mxu0 %vm280_vm0, %v268_v34 }
  0x64   : > { %3382 = vmatmul.mubr.msk.f32.gmra.mrb[4].mxu0 %vm280_vm0, %v269_v37 }
  0x65   : > { %3384 = vmatprep.mubr.msk.f32.mxu0 %vm280_vm0, %v270_v38 }
  0x68   : > { %3385 = vmatmul.mubr.msk.f32.gmra.mrb[6].mxu0 %vm280_vm0, %v271_v41 }
  0x69   : > { %3387 = vmatprep.mubr.msk.f32.mxu0 %vm280_vm0, %v272_v42 }
  0x6c   : > { %3388 = vmatmul.mubr.msk.f32.gmra.mrb[8].mxu0 %vm280_vm0, %v273_v45 }
  0x6d   : > { %3390 = vmatprep.mubr.msk.f32.mxu0 %vm280_vm0, %v274_v46 }
  0x70   : > { %3391 = vmatmul.mubr.msk.f32.gmra.mrb[10].mxu0 %vm280_vm0, %v275_v49 }
  0x71   : > { %3393 = vmatprep.mubr.msk.f32.mxu0 %vm280_vm0, %v276_v50 }
  0x74   : > { %3394 = vmatmul.mubr.msk.f32.gmra.mrb[12].mxu0 %vm280_vm0, %v277_v53 }
  0x75   : > { %3396 = vmatprep.mubr.msk.f32.mxu0 %vm280_vm0, %v278_v54 }
  0x78   : > { %3397 = vmatmul.mubr.msk.f32.gmra.mrb[14].mxu0 %vm280_vm0, %v279_v56 }
 0x12f   : > { %v3377_v58 = vpop.f32.mrb[0].mxu0 }
 0x130   : > { %v443_v61 = vpop.f32.mrb[1].mxu0  ;;  %v4647_v3 = vsel %vm523_vm3, %v3377_v58, -1e+30 }
 0x131   : > { %v4638_v62 = vsel %vm522_vm2, %v443_v61, -1e+30  ;;  %vm537_vm2 = vcmp.gt.f32.partialorder %v263_v36, 0.0 }
 0x132   : > { %554 = vmax.xlane.f32.xlu0 %v4638_v62 }
 0x133   : > { %v3380_v63 = vpop.f32.mrb[2].mxu0 }
 0x134   : > { %v453_v2 = vpop.f32.mrb[3].mxu0  ;;  %v4659_v9 = vsel %vm525_vm5, %v3380_v63, -1e+30 }
 0x135   : > { %v4649_v4 = vsel %vm524_vm4, %v453_v2, -1e+30 }
 0x136   : > { %556 = vmax.xlane.f32.xlu0 %v4647_v3  ;;  %558 = vmax.xlane.f32.xlu1 %v4649_v4 }
 0x137   : > { %v3383_v5 = vpop.f32.mrb[4].mxu0 }
 0x138   : > { %v463_v8 = vpop.f32.mrb[5].mxu0  ;;  %v4671_v15 = vsel %vm527_vm7, %v3383_v5, -1e+30 }
 0x139   : > { %v4661_v10 = vsel %vm526_vm6, %v463_v8, -1e+30 }
 0x13a   : > { %560 = vmax.xlane.f32.xlu1 %v4659_v9  ;;  %562 = vmax.xlane.f32.xlu0 %v4661_v10 }
 0x13b   : > { %v3386_v11 = vpop.f32.mrb[6].mxu0 }
 0x13c   : > { %v473_v14 = vpop.f32.mrb[7].mxu0  ;;  %v4683_v21 = vsel %vm529_vm9, %v3386_v11, -1e+30 }
 0x13d   : > { %v4673_v16 = vsel %vm528_vm8, %v473_v14, -1e+30 }
 0x13e   : > { %564 = vmax.xlane.f32.xlu1 %v4671_v15  ;;  %566 = vmax.xlane.f32.xlu0 %v4673_v16 }
 0x13f   : > { %v3389_v17 = vpop.f32.mrb[8].mxu0 }
 0x140   : > { %v483_v20 = vpop.f32.mrb[9].mxu0  ;;  %v4695_v27 = vsel %vm531_vm11, %v3389_v17, -1e+30 }
 0x141   : > { %v4685_v22 = vsel %vm530_vm10, %v483_v20, -1e+30 }
 0x142   : > { %568 = vmax.xlane.f32.xlu1 %v4683_v21  ;;  %570 = vmax.xlane.f32.xlu0 %v4685_v22 }
 0x143   : > { %v3392_v23 = vpop.f32.mrb[10].mxu0 }
 0x144   : > { %v493_v26 = vpop.f32.mrb[11].mxu0  ;;  %v4707_v33 = vsel %vm533_vm13, %v3392_v23, -1e+30 }
 0x145   : > { %v4697_v28 = vsel %vm532_vm12, %v493_v26, -1e+30 }
 0x146   : > { %572 = vmax.xlane.f32.xlu1 %v4695_v27  ;;  %574 = vmax.xlane.f32.xlu0 %v4697_v28 }
 0x147   : > { %v3395_v29 = vpop.f32.mrb[12].mxu0 }
 0x148   : > { %v503_v32 = vpop.f32.mrb[13].mxu0  ;;  %v4716_v38 = vsel %vm535_vm15, %v3395_v29, -1e+30 }
 0x149   : > { %v4709_v34 = vsel %vm534_vm14, %v503_v32, -1e+30 }
 0x14a   : > { %576 = vmax.xlane.f32.xlu1 %v4707_v33  ;;  %578 = vmax.xlane.f32.xlu0 %v4709_v34 }
 0x14b   : > { %v3398_v35 = vpop.f32.mrb[14].mxu0 }
 0x14c   : > { %v513_v37 = vpop.f32.mrb[15].mxu0  ;;  %v4722_v40 = vsel %vm537_vm2, %v3398_v35, -1e+30 }
 0x14d   : > { %v4718_v39 = vsel %vm536_vm1, %v513_v37, -1e+30 }
 0x14e   : > { %580 = vmax.xlane.f32.xlu1 %v4716_v38  ;;  %582 = vmax.xlane.f32.xlu0 %v4718_v39 }
 0x152   : > { %584 = vmax.xlane.f32.xlu1 %v4722_v40 }
 0x1bf   : > { %v555_v41 = vpop.xlane.xlu0 %554 }
 0x1c0   : > { %v586_v42 = vsub.f32 %v4638_v62, %v555_v41 }
 0x1c2   : > { %v602_v43 = vmul.f32 1.442695, %v586_v42 }
 0x1c3   : > { %v557_v44 = vpop.xlane.xlu0 %556  ;;  %v559_v45 = vpop.xlane.xlu1 %558 }
 0x1c4   : > { %3646 = vpow2.f32 %v602_v43  ;;  %v587_v46 = vsub.f32 %v4647_v3, %v557_v44  ;;  %v588_v47 = vsub.f32 %v4649_v4, %v559_v45 }
 0x1c6   : > { %v604_v48 = vmul.f32 1.442695, %v587_v46  ;;  %v606_v49 = vmul.f32 1.442695, %v588_v47 }
 0x1c7   : > { %v561_v50 = vpop.xlane.xlu1 %560  ;;  %v563_v51 = vpop.xlane.xlu0 %562 }
 0x1c8   : > { %3648 = vpow2.f32 %v604_v48  ;;  %v589_v52 = vsub.f32 %v4659_v9, %v561_v50  ;;  %v590_v53 = vsub.f32 %v4661_v10, %v563_v51 }
 0x1c9   : > { %3650 = vpow2.f32 %v606_v49 }
 0x1ca   : > { %v608_v54 = vmul.f32 1.442695, %v589_v52  ;;  %v610_v55 = vmul.f32 1.442695, %v590_v53 }
 0x1cb   : > { %v565_v56 = vpop.xlane.xlu1 %564  ;;  %v567_v57 = vpop.xlane.xlu0 %566 }
 0x1cc   : > { %3652 = vpow2.f32 %v608_v54  ;;  %v591_v58 = vsub.f32 %v4671_v15, %v565_v56  ;;  %v592_v59 = vsub.f32 %v4673_v16, %v567_v57 }
 0x1cd   : > { %3654 = vpow2.f32 %v610_v55 }
 0x1ce   : > { %v4732_v60 = vpop.eup %3646  ;;  %v612_v61 = vmul.f32 1.442695, %v591_v58  ;;  %v614_v62 = vmul.f32 1.442695, %v592_v59 }
 0x1cf   : > { %v569_v63 = vpop.xlane.xlu1 %568  ;;  %v571_v0 = vpop.xlane.xlu0 %570  ;;  %634 = vadd.xlane.f32.xlu0 %v4732_v60 }
 0x1d0   : > { %3656 = vpow2.f32 %v612_v61  ;;  %v593_v1 = vsub.f32 %v4683_v21, %v569_v63  ;;  %v594_v2 = vsub.f32 %v4685_v22, %v571_v0 }
 0x1d1   : > { %3658 = vpow2.f32 %v614_v62 }
 0x1d2   : > { %v4737_v3 = vpop.eup %3648  ;;  %v616_v4 = vmul.f32 1.442695, %v593_v1  ;;  %v618_v5 = vmul.f32 1.442695, %v594_v2 }
 0x1d3   : > { %v4739_v6 = vpop.eup %3650  ;;  %v573_v7 = vpop.xlane.xlu1 %572  ;;  %636 = vadd.xlane.f32.xlu1 %v4737_v3 }
 0x1d4   : > { %v575_v8 = vpop.xlane.xlu0 %574  ;;  %3660 = vpow2.f32 %v616_v4  ;;  %v595_v9 = vsub.f32 %v4695_v27, %v573_v7  ;;  %638 = vadd.xlane.f32.xlu0 %v4739_v6 }
 0x1d5   : > { %v596_v10 = vsub.f32 %v4697_v28, %v575_v8  ;;  %3662 = vpow2.f32 %v618_v5 }
 0x1d6   : > { %v4745_v11 = vpop.eup %3652  ;;  %v620_v12 = vmul.f32 1.442695, %v595_v9 }
 0x1d7   : > { %v622_v13 = vmul.f32 1.442695, %v596_v10  ;;  %v4747_v14 = vpop.eup %3654  ;;  %v577_v15 = vpop.xlane.xlu1 %576  ;;  %640 = vadd.xlane.f32.xlu1 %v4745_v11 }
 0x1d8   : > { %v579_v16 = vpop.xlane.xlu0 %578  ;;  %3664 = vpow2.f32 %v620_v12  ;;  %v597_v17 = vsub.f32 %v4707_v33, %v577_v15  ;;  %642 = vadd.xlane.f32.xlu0 %v4747_v14 }
 0x1d9   : > { %v598_v18 = vsub.f32 %v4709_v34, %v579_v16  ;;  %3666 = vpow2.f32 %v622_v13 }
 0x1da   : > { %v4753_v19 = vpop.eup %3656  ;;  %v624_v20 = vmul.f32 1.442695, %v597_v17 }
 0x1db   : > { %v626_v21 = vmul.f32 1.442695, %v598_v18  ;;  %v4755_v22 = vpop.eup %3658  ;;  %v581_v23 = vpop.xlane.xlu1 %580  ;;  %644 = vadd.xlane.f32.xlu1 %v4753_v19 }
 0x1dc   : > { %v583_v24 = vpop.xlane.xlu0 %582  ;;  %3668 = vpow2.f32 %v624_v20  ;;  %v599_v25 = vsub.f32 %v4716_v38, %v581_v23  ;;  %646 = vadd.xlane.f32.xlu0 %v4755_v22 }
 0x1dd   : > { %v600_v26 = vsub.f32 %v4718_v39, %v583_v24  ;;  %3670 = vpow2.f32 %v626_v21 }
 0x1de   : > { %v4761_v27 = vpop.eup %3660  ;;  %v628_v28 = vmul.f32 1.442695, %v599_v25 }
 0x1df   : > { %v630_v29 = vmul.f32 1.442695, %v600_v26  ;;  %v4763_v30 = vpop.eup %3662  ;;  %648 = vadd.xlane.f32.xlu1 %v4761_v27  ;;  %v585_v31 = vpop.xlane.xlu1 %584 }
 0x1e0   : > { %3672 = vpow2.f32 %v628_v28  ;;  %v601_v32 = vsub.f32 %v4722_v40, %v585_v31  ;;  %650 = vadd.xlane.f32.xlu0 %v4763_v30 }
 0x1e1   : > { %3674 = vpow2.f32 %v630_v29 }
 0x1e2   : > { %v4768_v33 = vpop.eup %3664  ;;  %v632_v34 = vmul.f32 1.442695, %v601_v32 }
 0x1e3   : > { %v4770_v35 = vpop.eup %3666  ;;  %652 = vadd.xlane.f32.xlu1 %v4768_v33 }
 0x1e4   : > { %3676 = vpow2.f32 %v632_v34  ;;  %654 = vadd.xlane.f32.xlu0 %v4770_v35 }
 0x1e6   : > { %v4774_v36 = vpop.eup %3668 }
 0x1e7   : > { %v4776_v37 = vpop.eup %3670  ;;  %656 = vadd.xlane.f32.xlu1 %v4774_v36 }
 0x1e8   : > { %658 = vadd.xlane.f32.xlu0 %v4776_v37 }
 0x1ea   : > { %v4780_v38 = vpop.eup %3672 }
 0x1eb   : > { %v4782_v39 = vpop.eup %3674  ;;  %660 = vadd.xlane.f32.xlu1 %v4780_v38 }
 0x1ec   : > { %662 = vadd.xlane.f32.xlu0 %v4782_v39 }
 0x1ee   : > { %v4786_v40 = vpop.eup %3676 }
 0x1ef   : > { %664 = vadd.xlane.f32.xlu1 %v4786_v40 }
 0x25c   : > { %v635_v41 = vpop.xlane.xlu0 %634 }
 0x25d   : > { %3678 = vrcp.f32 %v635_v41 }
 0x260   : > { %v637_v42 = vpop.xlane.xlu1 %636 }
 0x261   : > { %3680 = vrcp.f32 %v637_v42  ;;  %v639_v43 = vpop.xlane.xlu0 %638 }
 0x262   : > { %3682 = vrcp.f32 %v639_v43 }
 0x264   : > { %v641_v44 = vpop.xlane.xlu1 %640 }
 0x265   : > { %3684 = vrcp.f32 %v641_v44  ;;  %v643_v45 = vpop.xlane.xlu0 %642 }
 0x266   : > { %3686 = vrcp.f32 %v643_v45 }
 0x267   : > { %v3679_v47 = vpop.eup %3678 }
 0x268   : > { %v645_v46 = vpop.xlane.xlu1 %644  ;;  %v4790_v52 = vmul.f32 %v3679_v47, %v4732_v60 }
 0x269   : > { %3688 = vrcp.f32 %v645_v46  ;;  %v647_v48 = vpop.xlane.xlu0 %646 }
 0x26a   : > { %3690 = vrcp.f32 %v647_v48 }
 0x26b   : > { %v3681_v49 = vpop.eup %3680 }
 0x26c   : > { %v3683_v50 = vpop.eup %3682  ;;  %v649_v51 = vpop.xlane.xlu1 %648  ;;  %v4793_v53 = vmul.f32 %v3681_v49, %v4737_v3 }
 0x26d   : > { %3692 = vrcp.f32 %v649_v51  ;;  %v651_v54 = vpop.xlane.xlu0 %650  ;;  %v4796_v55 = vmul.f32 %v3683_v50, %v4739_v6 }
 0x26e   : > { %3694 = vrcp.f32 %v651_v54  ;;  %v698_v56 = vadd.f32 %v4793_v53, %v4790_v52 }
 0x26f   : > { %v3685_v57 = vpop.eup %3684 }
 0x270   : > { %v3687_v58 = vpop.eup %3686  ;;  %v653_v59 = vpop.xlane.xlu1 %652  ;;  %v4801_v61 = vmul.f32 %v3685_v57, %v4745_v11  ;;  %v699_v60 = vadd.f32 %v698_v56, %v4796_v55 }
 0x271   : > { %3696 = vrcp.f32 %v653_v59  ;;  %v655_v62 = vpop.xlane.xlu0 %654  ;;  %v4805_v63 = vmul.f32 %v3687_v58, %v4747_v14 }
 0x272   : > { %3698 = vrcp.f32 %v655_v62  ;;  %v700_v0 = vadd.f32 %v699_v60, %v4801_v61 }
 0x273   : > { %v3689_v1 = vpop.eup %3688 }
 0x274   : > { %v3691_v2 = vpop.eup %3690  ;;  %v687_v3 = vmul.f32 %v3689_v1, %v4753_v19  ;;  %v657_v4 = vpop.xlane.xlu1 %656  ;;  %v701_v5 = vadd.f32 %v700_v0, %v4805_v63 }
 0x275   : > { %3700 = vrcp.f32 %v657_v4  ;;  %v659_v6 = vpop.xlane.xlu0 %658  ;;  %v688_v7 = vmul.f32 %v3691_v2, %v4755_v22 }
 0x276   : > { %3702 = vrcp.f32 %v659_v6  ;;  %v702_v8 = vadd.f32 %v701_v5, %v687_v3 }
 0x277   : > { %v3693_v9 = vpop.eup %3692 }
 0x278   : > { %v3695_v10 = vpop.eup %3694  ;;  %v689_v11 = vmul.f32 %v3693_v9, %v4761_v27  ;;  %v661_v12 = vpop.xlane.xlu1 %660  ;;  %v703_v13 = vadd.f32 %v702_v8, %v688_v7 }
 0x279   : > { %3704 = vrcp.f32 %v661_v12  ;;  %v663_v14 = vpop.xlane.xlu0 %662  ;;  %v690_v15 = vmul.f32 %v3695_v10, %v4763_v30 }
 0x27a   : > { %3706 = vrcp.f32 %v663_v14  ;;  %v704_v16 = vadd.f32 %v703_v13, %v689_v11 }
 0x27b   : > { %v3697_v17 = vpop.eup %3696 }
 0x27c   : > { %v3699_v18 = vpop.eup %3698  ;;  %v691_v19 = vmul.f32 %v3697_v17, %v4768_v33  ;;  %v665_v20 = vpop.xlane.xlu1 %664  ;;  %v705_v21 = vadd.f32 %v704_v16, %v690_v15 }
 0x27d   : > { %3708 = vrcp.f32 %v665_v20  ;;  %v692_v22 = vmul.f32 %v3699_v18, %v4770_v35 }
 0x27e   : > { %v706_v23 = vadd.f32 %v705_v21, %v691_v19 }
 0x27f   : > { %v3701_v24 = vpop.eup %3700 }
 0x280   : > { %v3703_v25 = vpop.eup %3702  ;;  %v693_v26 = vmul.f32 %v3701_v24, %v4774_v36  ;;  %v707_v27 = vadd.f32 %v706_v23, %v692_v22 }
 0x281   : > { %v694_v28 = vmul.f32 %v3703_v25, %v4776_v37 }
 0x282   : > { %v708_v29 = vadd.f32 %v707_v27, %v693_v26 }
 0x283   : > { %v3705_v30 = vpop.eup %3704 }
 0x284   : > { %v3707_v31 = vpop.eup %3706  ;;  %v695_v32 = vmul.f32 %v3705_v30, %v4780_v38  ;;  %v709_v34 = vadd.f32 %v708_v29, %v694_v28 }
 0x285   : > { %v696_v33 = vmul.f32 %v3707_v31, %v4782_v39 }
 0x286   : > { %v710_v41 = vadd.f32 %v709_v34, %v695_v32 }
 0x287   : > { %v3709_v42 = vpop.eup %3708 }
 0x288   : > { %v697_v35 = vmul.f32 %v3709_v42, %v4786_v40  ;;  %v711_v43 = vadd.f32 %v710_v41, %v696_v33 }
 0x28a   : > { %v712_v44 = vadd.f32 %v711_v43, %v697_v35 }
 0x28c   : > { %v713_v45 = vrot.slane %v712_v44, 4 }
 0x28e   : > { %v714_v46 = vadd.f32 %v713_v45, %v712_v44 }
 0x290   : > { %v715_v36 = vrot.slane %v714_v46, 2 }
 0x292   : > { %v716_v47 = vadd.f32 %v715_v36, %v714_v46 }
 0x294   : > { %v717_v48 = vrot.slane %v716_v47, 1 }
 0x296   : > { %v718_v37 = vadd.f32 %v717_v48, %v716_v47 }
 0x298   : > { %3710 = vrcp.f32 %v718_v37 }
 0x2a2   : > { %v3711_v49 = vpop.eup %3710 }
 0x2a3   : > { %v721_v50 = vmul.f32 %v3711_v49, %v4793_v53  ;;  %v720_v38 = vmul.f32 %v3711_v49, %v4790_v52  ;;  %v723_v39 = vmul.f32 %v3711_v49, %v4801_v61  ;;  %v722_v40 = vmul.f32 %v3711_v49, %v4796_v55 }
 0x2a4   : > { %v4824_v51 = vmul.f32 %v3711_v49, %v687_v3  ;;  %v724_v54 = vmul.f32 %v3711_v49, %v4805_v63  ;;  %v4828_v56 = vmul.f32 %v3711_v49, %v689_v11  ;;  %v4830_v53 = vmul.f32 %v3711_v49, %v688_v7 }
 0x2a5   : > { %738 = vadd.xlane.f32.xlu1 %v721_v50  ;;  %736 = vadd.xlane.f32.xlu0 %v720_v38  ;;  %v4834_v52 = vmul.f32 %v3711_v49, %v691_v19  ;;  %v4836_v55 = vmul.f32 %v3711_v49, %v690_v15  ;;  %v4840_v57 = vmul.f32 %v3711_v49, %v693_v26 }
 0x2a6   : > { %v4842_v58 = vmul.f32 %v3711_v49, %v692_v22  ;;  %v4846_v59 = vmul.f32 %v3711_v49, %v695_v32  ;;  %v4848_v61 = vmul.f32 %v3711_v49, %v694_v28  ;;  %v4852_v60 = vmul.f32 %v3711_v49, %v697_v35 }
 0x2a7   : > { %v4854_v62 = vmul.f32 %v3711_v49, %v696_v33 }
 0x2a9   : > { %742 = vadd.xlane.f32.xlu1 %v723_v39  ;;  %740 = vadd.xlane.f32.xlu0 %v722_v40 }
 0x2ad   : > { %746 = vadd.xlane.f32.xlu1 %v4824_v51  ;;  %744 = vadd.xlane.f32.xlu0 %v724_v54 }
 0x2b1   : > { %750 = vadd.xlane.f32.xlu1 %v4828_v56  ;;  %748 = vadd.xlane.f32.xlu0 %v4830_v53 }
 0x2b5   : > { %754 = vadd.xlane.f32.xlu1 %v4834_v52  ;;  %752 = vadd.xlane.f32.xlu0 %v4836_v55 }
 0x2b9   : > { %758 = vadd.xlane.f32.xlu1 %v4840_v57  ;;  %756 = vadd.xlane.f32.xlu0 %v4842_v58 }
 0x2bd   : > { %762 = vadd.xlane.f32.xlu1 %v4846_v59  ;;  %760 = vadd.xlane.f32.xlu0 %v4848_v61 }
 0x2c1   : > { %766 = vadd.xlane.f32.xlu1 %v4852_v60  ;;  %764 = vadd.xlane.f32.xlu0 %v4854_v62 }
 0x332   : > { %v739_v63 = vpop.xlane.xlu1 %738  ;;  %v737_v0 = vpop.xlane.xlu0 %736 }
 0x333   : > { %3712 = vrcp.f32 %v739_v63 }
 0x334   : > { %3714 = vrcp.f32 %v737_v0 }
 0x336   : > { %v743_v1 = vpop.xlane.xlu1 %742  ;;  %v741_v2 = vpop.xlane.xlu0 %740 }
 0x337   : > { %3716 = vrcp.f32 %v743_v1 }
 0x338   : > { %3718 = vrcp.f32 %v741_v2 }
 0x33a   : > { %v747_v3 = vpop.xlane.xlu1 %746  ;;  %v745_v4 = vpop.xlane.xlu0 %744 }
 0x33b   : > { %3720 = vrcp.f32 %v747_v3 }
 0x33c   : > { %3722 = vrcp.f32 %v745_v4 }
 0x33d   : > { %v3713_v5 = vpop.eup %3712 }
 0x33e   : > { %v3715_v6 = vpop.eup %3714  ;;  %v751_v7 = vpop.xlane.xlu1 %750  ;;  %v4860_v10 = vmul.f32 %v3713_v5, %v721_v50 }
 0x33f   : > { %v749_v8 = vpop.xlane.xlu0 %748  ;;  %3724 = vrcp.f32 %v751_v7  ;;  %v4858_v9 = vmul.f32 %v3715_v6, %v720_v38 }
 0x340   : > { %3726 = vrcp.f32 %v749_v8 }
 0x341   : > { %v3717_v11 = vpop.eup %3716  ;;  %v800_v16 = vadd.f32 %v4860_v10, %v4858_v9 }
 0x342   : > { %v3719_v12 = vpop.eup %3718  ;;  %v755_v13 = vpop.xlane.xlu1 %754  ;;  %v787_v18 = vmul.f32 %v3717_v11, %v723_v39 }
 0x343   : > { %v753_v14 = vpop.xlane.xlu0 %752  ;;  %3728 = vrcp.f32 %v755_v13  ;;  %v4862_v15 = vmul.f32 %v3719_v12, %v722_v40 }
 0x344   : > { %3730 = vrcp.f32 %v753_v14 }
 0x345   : > { %v3721_v17 = vpop.eup %3720  ;;  %v801_v19 = vadd.f32 %v800_v16, %v4862_v15 }
 0x346   : > { %v3723_v20 = vpop.eup %3722  ;;  %v759_v21 = vpop.xlane.xlu1 %758  ;;  %v789_v26 = vmul.f32 %v3721_v17, %v4824_v51 }
 0x347   : > { %v757_v22 = vpop.xlane.xlu0 %756  ;;  %v788_v23 = vmul.f32 %v3723_v20, %v724_v54  ;;  %3732 = vrcp.f32 %v759_v21  ;;  %v802_v24 = vadd.f32 %v801_v19, %v787_v18 }
 0x348   : > { %3734 = vrcp.f32 %v757_v22 }
 0x349   : > { %v3725_v25 = vpop.eup %3724  ;;  %v803_v27 = vadd.f32 %v802_v24, %v788_v23 }
 0x34a   : > { %v3727_v28 = vpop.eup %3726  ;;  %v763_v29 = vpop.xlane.xlu1 %762  ;;  %v791_v33 = vmul.f32 %v3725_v25, %v4828_v56 }
 0x34b   : > { %v761_v30 = vpop.xlane.xlu0 %760  ;;  %v790_v31 = vmul.f32 %v3727_v28, %v4830_v53  ;;  %3736 = vrcp.f32 %v763_v29  ;;  %v804_v32 = vadd.f32 %v803_v27, %v789_v26 }
 0x34c   : > { %3738 = vrcp.f32 %v761_v30 }
 0x34d   : > { %v3729_v34 = vpop.eup %3728  ;;  %v805_v41 = vadd.f32 %v804_v32, %v790_v31 }
 0x34e   : > { %v3731_v42 = vpop.eup %3730  ;;  %v767_v35 = vpop.xlane.xlu1 %766  ;;  %v793_v36 = vmul.f32 %v3729_v34, %v4834_v52 }
 0x34f   : > { %v765_v43 = vpop.xlane.xlu0 %764  ;;  %v792_v44 = vmul.f32 %v3731_v42, %v4836_v55  ;;  %3740 = vrcp.f32 %v767_v35  ;;  %v806_v45 = vadd.f32 %v805_v41, %v791_v33 }
 0x350   : > { %3742 = vrcp.f32 %v765_v43 }
 0x351   : > { %v3733_v46 = vpop.eup %3732  ;;  %v807_v47 = vadd.f32 %v806_v45, %v792_v44 }
 0x352   : > { %v3735_v48 = vpop.eup %3734  ;;  %v795_v38 = vmul.f32 %v3733_v46, %v4840_v57 }
 0x353   : > { %v794_v37 = vmul.f32 %v3735_v48, %v4842_v58  ;;  %v808_v49 = vadd.f32 %v807_v47, %v793_v36 }
 0x355   : > { %v3737_v50 = vpop.eup %3736  ;;  %v809_v39 = vadd.f32 %v808_v49, %v794_v37 }
 0x356   : > { %v3739_v40 = vpop.eup %3738  ;;  %v797_v53 = vmul.f32 %v3737_v50, %v4846_v59 }
 0x357   : > { %v796_v51 = vmul.f32 %v3739_v40, %v4848_v61  ;;  %v810_v54 = vadd.f32 %v809_v39, %v795_v38 }
 0x359   : > { %v3741_v56 = vpop.eup %3740  ;;  %v811_v55 = vadd.f32 %v810_v54, %v796_v51 }
 0x35a   : > { %v3743_v63 = vpop.eup %3742  ;;  %v799_v1 = vmul.f32 %v3741_v56, %v4852_v60 }
 0x35b   : > { %v798_v52 = vmul.f32 %v3743_v63, %v4854_v62  ;;  %v812_v0 = vadd.f32 %v811_v55, %v797_v53 }
 0x35d   : > { %v813_v58 = vadd.f32 %v812_v0, %v798_v52 }
 0x35f   : > { %v814_v2 = vadd.f32 %v813_v58, %v799_v1 }
 0x361   : > { %v815_v3 = vrot.slane %v814_v2, 4 }
 0x363   : > { %v816_v4 = vadd.f32 %v815_v3, %v814_v2 }
 0x365   : > { %v817_v57 = vrot.slane %v816_v4, 2 }
 0x367   : > { %v818_v5 = vadd.f32 %v817_v57, %v816_v4 }
 0x369   : > { %v819_v6 = vrot.slane %v818_v5, 1 }
 0x36b   : > { %v820_v7 = vadd.f32 %v819_v6, %v818_v5 }
 0x36d   : > { %3744 = vrcp.f32 %v820_v7 }
 0x377   : > { %v3745_v61 = vpop.eup %3744 }
 0x378   : > { %v823_v8 = vmul.f32 %v3745_v61, %v4860_v10  ;;  %v822_v59 = vmul.f32 %v3745_v61, %v4858_v9  ;;  %v825_v62 = vmul.f32 %v3745_v61, %v787_v18  ;;  %v824_v11 = vmul.f32 %v3745_v61, %v4862_v15 }
 0x379   : > { %v4881_v60 = vmul.f32 %v3745_v61, %v789_v26  ;;  %v826_v12 = vmul.f32 %v3745_v61, %v788_v23  ;;  %v4884_v13 = vmul.f32 %v3745_v61, %v791_v33  ;;  %v4886_v14 = vmul.f32 %v3745_v61, %v790_v31 }
 0x37a   : > { %840 = vadd.xlane.f32.xlu1 %v823_v8  ;;  %838 = vadd.xlane.f32.xlu0 %v822_v59  ;;  %v4890_v9 = vmul.f32 %v3745_v61, %v793_v36  ;;  %v4892_v10 = vmul.f32 %v3745_v61, %v792_v44  ;;  %v4896_v15 = vmul.f32 %v3745_v61, %v795_v38 }
 0x37b   : > { %v4898_v16 = vmul.f32 %v3745_v61, %v794_v37  ;;  %v4902_v17 = vmul.f32 %v3745_v61, %v797_v53  ;;  %v4904_v18 = vmul.f32 %v3745_v61, %v796_v51  ;;  %v4908_v19 = vmul.f32 %v3745_v61, %v799_v1 }
 0x37c   : > { %v4910_v20 = vmul.f32 %v3745_v61, %v798_v52 }
 0x37e   : > { %844 = vadd.xlane.f32.xlu1 %v825_v62  ;;  %842 = vadd.xlane.f32.xlu0 %v824_v11 }
 0x382   : > { %848 = vadd.xlane.f32.xlu1 %v4881_v60  ;;  %846 = vadd.xlane.f32.xlu0 %v826_v12 }
 0x386   : > { %852 = vadd.xlane.f32.xlu1 %v4884_v13  ;;  %850 = vadd.xlane.f32.xlu0 %v4886_v14 }
 0x38a   : > { %856 = vadd.xlane.f32.xlu1 %v4890_v9  ;;  %854 = vadd.xlane.f32.xlu0 %v4892_v10 }
 0x38e   : > { %860 = vadd.xlane.f32.xlu1 %v4896_v15  ;;  %858 = vadd.xlane.f32.xlu0 %v4898_v16 }
 0x392   : > { %864 = vadd.xlane.f32.xlu1 %v4902_v17  ;;  %862 = vadd.xlane.f32.xlu0 %v4904_v18 }
 0x396   : > { %868 = vadd.xlane.f32.xlu1 %v4908_v19  ;;  %866 = vadd.xlane.f32.xlu0 %v4910_v20 }
 0x407   : > { %v841_v21 = vpop.xlane.xlu1 %840  ;;  %v839_v22 = vpop.xlane.xlu0 %838 }
 0x408   : > { %3746 = vrcp.f32 %v841_v21 }
 0x409   : > { %3748 = vrcp.f32 %v839_v22 }
 0x40b   : > { %v845_v23 = vpop.xlane.xlu1 %844  ;;  %v843_v24 = vpop.xlane.xlu0 %842 }
 0x40c   : > { %3750 = vrcp.f32 %v845_v23 }
 0x40d   : > { %3752 = vrcp.f32 %v843_v24 }
 0x40f   : > { %v849_v25 = vpop.xlane.xlu1 %848  ;;  %v847_v26 = vpop.xlane.xlu0 %846 }
 0x410   : > { %3754 = vrcp.f32 %v849_v25 }
 0x411   : > { %3756 = vrcp.f32 %v847_v26 }
 0x412   : > { %v3747_v27 = vpop.eup %3746 }
 0x413   : > { %v3749_v28 = vpop.eup %3748  ;;  %v853_v29 = vpop.xlane.xlu1 %852  ;;  %v4916_v32 = vmul.f32 %v3747_v27, %v823_v8 }
 0x414   : > { %v851_v30 = vpop.xlane.xlu0 %850  ;;  %3758 = vrcp.f32 %v853_v29  ;;  %v4914_v31 = vmul.f32 %v3749_v28, %v822_v59 }
 0x415   : > { %3760 = vrcp.f32 %v851_v30 }
 0x416   : > { %v3751_v34 = vpop.eup %3750  ;;  %v902_v43 = vadd.f32 %v4916_v32, %v4914_v31 }
 0x417   : > { %v3753_v33 = vpop.eup %3752  ;;  %v857_v41 = vpop.xlane.xlu1 %856  ;;  %v889_v45 = vmul.f32 %v3751_v34, %v825_v62 }
 0x418   : > { %v855_v42 = vpop.xlane.xlu0 %854  ;;  %3762 = vrcp.f32 %v857_v41  ;;  %v4918_v35 = vmul.f32 %v3753_v33, %v824_v11 }
 0x419   : > { %3764 = vrcp.f32 %v855_v42 }
 0x41a   : > { %v3755_v44 = vpop.eup %3754  ;;  %v903_v46 = vadd.f32 %v902_v43, %v4918_v35 }
 0x41b   : > { %v3757_v36 = vpop.eup %3756  ;;  %v861_v47 = vpop.xlane.xlu1 %860  ;;  %v891_v38 = vmul.f32 %v3755_v44, %v4881_v60 }
 0x41c   : > { %v859_v48 = vpop.xlane.xlu0 %858  ;;  %v890_v37 = vmul.f32 %v3757_v36, %v826_v12  ;;  %3766 = vrcp.f32 %v861_v47  ;;  %v904_v49 = vadd.f32 %v903_v46, %v889_v45 }
 0x41d   : > { %3768 = vrcp.f32 %v859_v48 }
 0x41e   : > { %v3759_v50 = vpop.eup %3758  ;;  %v905_v39 = vadd.f32 %v904_v49, %v890_v37 }
 0x41f   : > { %v3761_v40 = vpop.eup %3760  ;;  %v865_v51 = vpop.xlane.xlu1 %864  ;;  %v893_v63 = vmul.f32 %v3759_v50, %v4884_v13 }
 0x420   : > { %v863_v54 = vpop.xlane.xlu0 %862  ;;  %v892_v56 = vmul.f32 %v3761_v40, %v4886_v14  ;;  %3770 = vrcp.f32 %v865_v51  ;;  %v906_v53 = vadd.f32 %v905_v39, %v891_v38 }
 0x421   : > { %3772 = vrcp.f32 %v863_v54 }
 0x422   : > { %v3763_v55 = vpop.eup %3762  ;;  %v907_v52 = vadd.f32 %v906_v53, %v892_v56 }
 0x423   : > { %v3765_v0 = vpop.eup %3764  ;;  %v869_v1 = vpop.xlane.xlu1 %868  ;;  %v895_v57 = vmul.f32 %v3763_v55, %v4890_v9 }
 0x424   : > { %v867_v58 = vpop.xlane.xlu0 %866  ;;  %v894_v2 = vmul.f32 %v3765_v0, %v4892_v10  ;;  %3774 = vrcp.f32 %v869_v1  ;;  %v908_v3 = vadd.f32 %v907_v52, %v893_v63 }
 0x425   : > { %3776 = vrcp.f32 %v867_v58 }
 0x426   : > { %v3767_v4 = vpop.eup %3766  ;;  %v909_v5 = vadd.f32 %v908_v3, %v894_v2 }
 0x427   : > { %v3769_v6 = vpop.eup %3768  ;;  %v897_v59 = vmul.f32 %v3767_v4, %v4896_v15 }
 0x428   : > { %v896_v7 = vmul.f32 %v3769_v6, %v4898_v16  ;;  %v910_v61 = vadd.f32 %v909_v5, %v895_v57 }
 0x42a   : > { %v3771_v8 = vpop.eup %3770  ;;  %v911_v62 = vadd.f32 %v910_v61, %v896_v7 }
 0x42b   : > { %v3773_v11 = vpop.eup %3772  ;;  %v899_v14 = vmul.f32 %v3771_v8, %v4902_v17 }
 0x42c   : > { %v898_v60 = vmul.f32 %v3773_v11, %v4904_v18  ;;  %v912_v12 = vadd.f32 %v911_v62, %v897_v59 }
 0x42e   : > { %v3775_v13 = vpop.eup %3774  ;;  %v913_v10 = vadd.f32 %v912_v12, %v898_v60 }
 0x42f   : > { %v3777_v21 = vpop.eup %3776  ;;  %v901_v23 = vmul.f32 %v3775_v13, %v4908_v19 }
 0x430   : > { %v900_v9 = vmul.f32 %v3777_v21, %v4910_v20  ;;  %v914_v22 = vadd.f32 %v913_v10, %v899_v14 }
 0x432   : > { %v915_v16 = vadd.f32 %v914_v22, %v900_v9 }
 0x434   : > { %v916_v24 = vadd.f32 %v915_v16, %v901_v23 }
 0x436   : > { %v917_v25 = vrot.slane %v916_v24, 4 }
 0x438   : > { %v918_v26 = vadd.f32 %v917_v25, %v916_v24 }
 0x43a   : > { %v919_v15 = vrot.slane %v918_v26, 2 }
 0x43c   : > { %v920_v27 = vadd.f32 %v919_v15, %v918_v26 }
 0x43e   : > { %v921_v28 = vrot.slane %v920_v27, 1 }
 0x440   : > { %v922_v29 = vadd.f32 %v921_v28, %v920_v27 }
 0x442   : > { %3778 = vrcp.f32 %v922_v29 }
 0x44c   : > { %v3779_v18 = vpop.eup %3778 }
 0x44d   : > { %v925_v30 = vmul.f32 %v3779_v18, %v4916_v32  ;;  %v924_v17 = vmul.f32 %v3779_v18, %v4914_v31  ;;  %v927_v20 = vmul.f32 %v3779_v18, %v889_v45  ;;  %v926_v34 = vmul.f32 %v3779_v18, %v4918_v35 }
 0x44e   : > { %v4937_v19 = vmul.f32 %v3779_v18, %v891_v38  ;;  %v928_v33 = vmul.f32 %v3779_v18, %v890_v37  ;;  %v4940_v41 = vmul.f32 %v3779_v18, %v893_v63  ;;  %v4942_v42 = vmul.f32 %v3779_v18, %v892_v56 }
 0x44f   : > { %942 = vadd.xlane.f32.xlu1 %v925_v30  ;;  %940 = vadd.xlane.f32.xlu0 %v924_v17  ;;  %v4946_v31 = vmul.f32 %v3779_v18, %v895_v57  ;;  %v4948_v32 = vmul.f32 %v3779_v18, %v894_v2  ;;  %v4952_v35 = vmul.f32 %v3779_v18, %v897_v59 }
 0x450   : > { %v4954_v43 = vmul.f32 %v3779_v18, %v896_v7  ;;  %v4958_v44 = vmul.f32 %v3779_v18, %v899_v14  ;;  %v4960_v45 = vmul.f32 %v3779_v18, %v898_v60  ;;  %v4964_v46 = vmul.f32 %v3779_v18, %v901_v23 }
 0x451   : > { %v4966_v36 = vmul.f32 %v3779_v18, %v900_v9 }
 0x453   : > { %946 = vadd.xlane.f32.xlu1 %v927_v20  ;;  %944 = vadd.xlane.f32.xlu0 %v926_v34 }
 0x457   : > { %950 = vadd.xlane.f32.xlu1 %v4937_v19  ;;  %948 = vadd.xlane.f32.xlu0 %v928_v33 }
 0x45b   : > { %954 = vadd.xlane.f32.xlu1 %v4940_v41  ;;  %952 = vadd.xlane.f32.xlu0 %v4942_v42 }
 0x45f   : > { %958 = vadd.xlane.f32.xlu1 %v4946_v31  ;;  %956 = vadd.xlane.f32.xlu0 %v4948_v32 }
 0x463   : > { %962 = vadd.xlane.f32.xlu1 %v4952_v35  ;;  %960 = vadd.xlane.f32.xlu0 %v4954_v43 }
 0x467   : > { %966 = vadd.xlane.f32.xlu1 %v4958_v44  ;;  %964 = vadd.xlane.f32.xlu0 %v4960_v45 }
 0x46b   : > { %970 = vadd.xlane.f32.xlu1 %v4964_v46  ;;  %968 = vadd.xlane.f32.xlu0 %v4966_v36 }
 0x4dc   : > { %v943_v47 = vpop.xlane.xlu1 %942  ;;  %v941_v48 = vpop.xlane.xlu0 %940 }
 0x4dd   : > { %3780 = vrcp.f32 %v943_v47 }
 0x4de   : > { %3782 = vrcp.f32 %v941_v48 }
 0x4e0   : > { %v947_v37 = vpop.xlane.xlu1 %946  ;;  %v945_v49 = vpop.xlane.xlu0 %944 }
 0x4e1   : > { %3784 = vrcp.f32 %v947_v37 }
 0x4e2   : > { %3786 = vrcp.f32 %v945_v49 }
 0x4e4   : > { %v951_v50 = vpop.xlane.xlu1 %950  ;;  %v949_v38 = vpop.xlane.xlu0 %948 }
 0x4e5   : > { %3788 = vrcp.f32 %v951_v50 }
 0x4e6   : > { %3790 = vrcp.f32 %v949_v38 }
 0x4e7   : > { %v3781_v39 = vpop.eup %3780 }
 0x4e8   : > { %v3783_v40 = vpop.eup %3782  ;;  %v955_v51 = vpop.xlane.xlu1 %954  ;;  %v4972_v53 = vmul.f32 %v3781_v39, %v925_v30 }
 0x4e9   : > { %v953_v54 = vpop.xlane.xlu0 %952  ;;  %3792 = vrcp.f32 %v955_v51  ;;  %v4970_v56 = vmul.f32 %v3783_v40, %v924_v17 }
 0x4ea   : > { %3794 = vrcp.f32 %v953_v54 }
 0x4eb   : > { %v3785_v55 = vpop.eup %3784  ;;  %v1004_v58 = vadd.f32 %v4972_v53, %v4970_v56 }
 0x4ec   : > { %v3787_v63 = vpop.eup %3786  ;;  %v959_v52 = vpop.xlane.xlu1 %958  ;;  %v991_v3 = vmul.f32 %v3785_v55, %v927_v20 }
 0x4ed   : > { %v957_v0 = vpop.xlane.xlu0 %956  ;;  %3796 = vrcp.f32 %v959_v52  ;;  %v4974_v1 = vmul.f32 %v3787_v63, %v926_v34 }
 0x4ee   : > { %3798 = vrcp.f32 %v957_v0 }
 0x4ef   : > { %v3789_v2 = vpop.eup %3788  ;;  %v1005_v4 = vadd.f32 %v1004_v58, %v4974_v1 }
 0x4f0   : > { %v3791_v57 = vpop.eup %3790  ;;  %v963_v5 = vpop.xlane.xlu1 %962  ;;  %v993_v59 = vmul.f32 %v3789_v2, %v4937_v19 }
 0x4f1   : > { %v961_v6 = vpop.xlane.xlu0 %960  ;;  %v992_v7 = vmul.f32 %v3791_v57, %v928_v33  ;;  %3800 = vrcp.f32 %v963_v5  ;;  %v1006_v61 = vadd.f32 %v1005_v4, %v991_v3 }
 0x4f2   : > { %3802 = vrcp.f32 %v961_v6 }
 0x4f3   : > { %v3793_v8 = vpop.eup %3792  ;;  %v1007_v62 = vadd.f32 %v1006_v61, %v992_v7 }
 0x4f4   : > { %v3795_v11 = vpop.eup %3794  ;;  %v967_v60 = vpop.xlane.xlu1 %966  ;;  %v995_v21 = vmul.f32 %v3793_v8, %v4940_v41 }
 0x4f5   : > { %v965_v12 = vpop.xlane.xlu0 %964  ;;  %v994_v13 = vmul.f32 %v3795_v11, %v4942_v42  ;;  %3804 = vrcp.f32 %v967_v60  ;;  %v1008_v14 = vadd.f32 %v1007_v62, %v993_v59 }
 0x4f6   : > { %3806 = vrcp.f32 %v965_v12 }
 0x4f7   : > { %v3797_v10 = vpop.eup %3796  ;;  %v1009_v9 = vadd.f32 %v1008_v14, %v994_v13 }
 0x4f8   : > { %v3799_v22 = vpop.eup %3798  ;;  %v971_v23 = vpop.xlane.xlu1 %970  ;;  %v997_v15 = vmul.f32 %v3797_v10, %v4946_v31 }
 0x4f9   : > { %v969_v16 = vpop.xlane.xlu0 %968  ;;  %v996_v24 = vmul.f32 %v3799_v22, %v4948_v32  ;;  %3808 = vrcp.f32 %v971_v23  ;;  %v1010_v25 = vadd.f32 %v1009_v9, %v995_v21 }
 0x4fa   : > { %3810 = vrcp.f32 %v969_v16 }
 0x4fb   : > { %v3801_v26 = vpop.eup %3800  ;;  %v1011_v27 = vadd.f32 %v1010_v25, %v996_v24 }
 0x4fc   : > { %v3803_v28 = vpop.eup %3802  ;;  %v999_v17 = vmul.f32 %v3801_v26, %v4952_v35 }
 0x4fd   : > { %v998_v29 = vmul.f32 %v3803_v28, %v4954_v43  ;;  %v1012_v18 = vadd.f32 %v1011_v27, %v997_v15 }
 0x4ff   : > { %v3805_v30 = vpop.eup %3804  ;;  %v1013_v20 = vadd.f32 %v1012_v18, %v998_v29 }
 0x500   : > { %v3807_v34 = vpop.eup %3806  ;;  %v1001_v42 = vmul.f32 %v3805_v30, %v4958_v44 }
 0x501   : > { %v1000_v19 = vmul.f32 %v3807_v34, %v4960_v45  ;;  %v1014_v33 = vadd.f32 %v1013_v20, %v999_v17 }
 0x503   : > { %v3809_v41 = vpop.eup %3808  ;;  %v1015_v32 = vadd.f32 %v1014_v33, %v1000_v19 }
 0x504   : > { %v3811_v47 = vpop.eup %3810  ;;  %v1003_v37 = vmul.f32 %v3809_v41, %v4964_v46 }
 0x505   : > { %v1002_v31 = vmul.f32 %v3811_v47, %v4966_v36  ;;  %v1016_v48 = vadd.f32 %v1015_v32, %v1001_v42 }
 0x507   : > { %v1017_v43 = vadd.f32 %v1016_v48, %v1002_v31 }
 0x509   : > { %v1018_v49 = vadd.f32 %v1017_v43, %v1003_v37 }
 0x50b   : > { %v1019_v50 = vrot.slane %v1018_v49, 4 }
 0x50d   : > { %v1020_v38 = vadd.f32 %v1019_v50, %v1018_v49 }
 0x50f   : > { %v1021_v35 = vrot.slane %v1020_v38, 2 }
 0x511   : > { %v1022_v39 = vadd.f32 %v1021_v35, %v1020_v38 }
 0x513   : > { %v1023_v40 = vrot.slane %v1022_v39, 1 }
 0x515   : > { %v1024_v51 = vadd.f32 %v1023_v40, %v1022_v39 }
 0x517   : > { %3812 = vrcp.f32 %v1024_v51 }
 0x521   : > { %v3813_v45 = vpop.eup %3812 }
 0x522   : > { %v1027_v54 = vmul.f32 %v3813_v45, %v4972_v53  ;;  %v1026_v44 = vmul.f32 %v3813_v45, %v4970_v56  ;;  %v1029_v36 = vmul.f32 %v3813_v45, %v991_v3  ;;  %v1028_v55 = vmul.f32 %v3813_v45, %v4974_v1 }
 0x523   : > { %v4993_v46 = vmul.f32 %v3813_v45, %v993_v59  ;;  %v1030_v63 = vmul.f32 %v3813_v45, %v992_v7  ;;  %v4996_v52 = vmul.f32 %v3813_v45, %v995_v21  ;;  %v4998_v0 = vmul.f32 %v3813_v45, %v994_v13 }
 0x524   : > { %1044 = vadd.xlane.f32.xlu1 %v1027_v54  ;;  %1042 = vadd.xlane.f32.xlu0 %v1026_v44  ;;  %v5002_v56 = vmul.f32 %v3813_v45, %v997_v15  ;;  %v5004_v53 = vmul.f32 %v3813_v45, %v996_v24  ;;  %v5008_v1 = vmul.f32 %v3813_v45, %v999_v17 }
 0x525   : > { %v5010_v58 = vmul.f32 %v3813_v45, %v998_v29  ;;  %v5014_v2 = vmul.f32 %v3813_v45, %v1001_v42  ;;  %v5016_v3 = vmul.f32 %v3813_v45, %v1000_v19  ;;  %v5020_v4 = vmul.f32 %v3813_v45, %v1003_v37 }
 0x526   : > { %v5022_v57 = vmul.f32 %v3813_v45, %v1002_v31 }
 0x528   : > { %1048 = vadd.xlane.f32.xlu1 %v1029_v36  ;;  %1046 = vadd.xlane.f32.xlu0 %v1028_v55 }
 0x52c   : > { %1052 = vadd.xlane.f32.xlu1 %v4993_v46  ;;  %1050 = vadd.xlane.f32.xlu0 %v1030_v63 }
 0x530   : > { %1056 = vadd.xlane.f32.xlu1 %v4996_v52  ;;  %1054 = vadd.xlane.f32.xlu0 %v4998_v0 }
 0x534   : > { %1060 = vadd.xlane.f32.xlu1 %v5002_v56  ;;  %1058 = vadd.xlane.f32.xlu0 %v5004_v53 }
 0x538   : > { %1064 = vadd.xlane.f32.xlu1 %v5008_v1  ;;  %1062 = vadd.xlane.f32.xlu0 %v5010_v58 }
 0x53c   : > { %1068 = vadd.xlane.f32.xlu1 %v5014_v2  ;;  %1066 = vadd.xlane.f32.xlu0 %v5016_v3 }
 0x540   : > { %1072 = vadd.xlane.f32.xlu1 %v5020_v4  ;;  %1070 = vadd.xlane.f32.xlu0 %v5022_v57 }
 0x5b1   : > { %v1045_v5 = vpop.xlane.xlu1 %1044  ;;  %v1043_v6 = vpop.xlane.xlu0 %1042 }
 0x5b2   : > { %3814 = vrcp.f32 %v1045_v5 }
 0x5b3   : > { %3816 = vrcp.f32 %v1043_v6 }
 0x5b5   : > { %v1049_v7 = vpop.xlane.xlu1 %1048  ;;  %v1047_v61 = vpop.xlane.xlu0 %1046 }
 0x5b6   : > { %3818 = vrcp.f32 %v1049_v7 }
 0x5b7   : > { %3820 = vrcp.f32 %v1047_v61 }
 0x5b9   : > { %v1053_v8 = vpop.xlane.xlu1 %1052  ;;  %v1051_v59 = vpop.xlane.xlu0 %1050 }
 0x5ba   : > { %3822 = vrcp.f32 %v1053_v8 }
 0x5bb   : > { %3824 = vrcp.f32 %v1051_v59 }
 0x5bc   : > { %v3815_v62 = vpop.eup %3814 }
 0x5bd   : > { %v3817_v11 = vpop.eup %3816  ;;  %v1057_v60 = vpop.xlane.xlu1 %1056  ;;  %v5028_v14 = vmul.f32 %v3815_v62, %v1027_v54 }
 0x5be   : > { %v1055_v12 = vpop.xlane.xlu0 %1054  ;;  %3826 = vrcp.f32 %v1057_v60  ;;  %v5026_v13 = vmul.f32 %v3817_v11, %v1026_v44 }
 0x5bf   : > { %3828 = vrcp.f32 %v1055_v12 }
 0x5c0   : > { %v3819_v10 = vpop.eup %3818  ;;  %v1106_v16 = vadd.f32 %v5028_v14, %v5026_v13 }
 0x5c1   : > { %v3821_v21 = vpop.eup %3820  ;;  %v1061_v9 = vpop.xlane.xlu1 %1060  ;;  %v1093_v25 = vmul.f32 %v3819_v10, %v1029_v36 }
 0x5c2   : > { %v1059_v22 = vpop.xlane.xlu0 %1058  ;;  %3830 = vrcp.f32 %v1061_v9  ;;  %v5030_v23 = vmul.f32 %v3821_v21, %v1028_v55 }
 0x5c3   : > { %3832 = vrcp.f32 %v1059_v22 }
 0x5c4   : > { %v3823_v24 = vpop.eup %3822  ;;  %v1107_v26 = vadd.f32 %v1106_v16, %v5030_v23 }
 0x5c5   : > { %v3825_v15 = vpop.eup %3824  ;;  %v1065_v27 = vpop.xlane.xlu1 %1064  ;;  %v1095_v17 = vmul.f32 %v3823_v24, %v4993_v46 }
 0x5c6   : > { %v1063_v28 = vpop.xlane.xlu0 %1062  ;;  %v1094_v29 = vmul.f32 %v3825_v15, %v1030_v63  ;;  %3834 = vrcp.f32 %v1065_v27  ;;  %v1108_v18 = vadd.f32 %v1107_v26, %v1093_v25 }
 0x5c7   : > { %3836 = vrcp.f32 %v1063_v28 }
 0x5c8   : > { %v3827_v30 = vpop.eup %3826  ;;  %v1109_v20 = vadd.f32 %v1108_v18, %v1094_v29 }
 0x5c9   : > { %v3829_v34 = vpop.eup %3828  ;;  %v1069_v19 = vpop.xlane.xlu1 %1068  ;;  %v1097_v47 = vmul.f32 %v3827_v30, %v4996_v52 }
 0x5ca   : > { %v1067_v33 = vpop.xlane.xlu0 %1066  ;;  %v1096_v41 = vmul.f32 %v3829_v34, %v4998_v0  ;;  %3838 = vrcp.f32 %v1069_v19  ;;  %v1110_v42 = vadd.f32 %v1109_v20, %v1095_v17 }
 0x5cb   : > { %3840 = vrcp.f32 %v1067_v33 }
 0x5cc   : > { %v3831_v32 = vpop.eup %3830  ;;  %v1111_v31 = vadd.f32 %v1110_v42, %v1096_v41 }
 0x5cd   : > { %v3833_v48 = vpop.eup %3832  ;;  %v1073_v37 = vpop.xlane.xlu1 %1072  ;;  %v1099_v35 = vmul.f32 %v3831_v32, %v5002_v56 }
 0x5ce   : > { %v1071_v43 = vpop.xlane.xlu0 %1070  ;;  %v1098_v49 = vmul.f32 %v3833_v48, %v5004_v53  ;;  %3842 = vrcp.f32 %v1073_v37  ;;  %v1112_v50 = vadd.f32 %v1111_v31, %v1097_v47 }
 0x5cf   : > { %3844 = vrcp.f32 %v1071_v43 }
 0x5d0   : > { %v3835_v38 = vpop.eup %3834  ;;  %v1113_v39 = vadd.f32 %v1112_v50, %v1098_v49 }
 0x5d1   : > { %v3837_v40 = vpop.eup %3836  ;;  %v1101_v44 = vmul.f32 %v3835_v38, %v5008_v1 }
 0x5d2   : > { %v1100_v51 = vmul.f32 %v3837_v40, %v5010_v58  ;;  %v1114_v45 = vadd.f32 %v1113_v39, %v1099_v35 }
 0x5d4   : > { %v3839_v54 = vpop.eup %3838  ;;  %v1115_v36 = vadd.f32 %v1114_v45, %v1100_v51 }
 0x5d5   : > { %v3841_v55 = vpop.eup %3840  ;;  %v1103_v0 = vmul.f32 %v3839_v54, %v5014_v2 }
 0x5d6   : > { %v1102_v46 = vmul.f32 %v3841_v55, %v5016_v3  ;;  %v1116_v63 = vadd.f32 %v1115_v36, %v1101_v44 }
 0x5d8   : > { %v3843_v52 = vpop.eup %3842  ;;  %v1117_v53 = vadd.f32 %v1116_v63, %v1102_v46 }
 0x5d9   : > { %v3845_v5 = vpop.eup %3844  ;;  %v1105_v7 = vmul.f32 %v3843_v52, %v5020_v4 }
 0x5da   : > { %v1104_v56 = vmul.f32 %v3845_v5, %v5022_v57  ;;  %v1118_v6 = vadd.f32 %v1117_v53, %v1103_v0 }
 0x5dc   : > { %v1119_v58 = vadd.f32 %v1118_v6, %v1104_v56 }
 0x5de   : > { %v1120_v61 = vadd.f32 %v1119_v58, %v1105_v7 }
 0x5e0   : > { %v1121_v8 = vrot.slane %v1120_v61, 4 }
 0x5e2   : > { %v1122_v59 = vadd.f32 %v1121_v8, %v1120_v61 }
 0x5e4   : > { %v1123_v1 = vrot.slane %v1122_v59, 2 }
 0x5e6   : > { %v1124_v62 = vadd.f32 %v1123_v1, %v1122_v59 }
 0x5e8   : > { %v1125_v11 = vrot.slane %v1124_v62, 1 }
 0x5ea   : > { %v1126_v60 = vadd.f32 %v1125_v11, %v1124_v62 }
 0x5ec   : > { %3846 = vrcp.f32 %v1126_v60 }
 0x5f6   : > { %v3847_v3 = vpop.eup %3846 }
 0x5f7   : > { %v1129_v12 = vmul.f32 %v3847_v3, %v5028_v14  ;;  %v1128_v2 = vmul.f32 %v3847_v3, %v5026_v13  ;;  %v1131_v57 = vmul.f32 %v3847_v3, %v1093_v25  ;;  %v1130_v10 = vmul.f32 %v3847_v3, %v5030_v23 }
 0x5f8   : > { %v5049_v4 = vmul.f32 %v3847_v3, %v1095_v17  ;;  %v1132_v21 = vmul.f32 %v3847_v3, %v1094_v29  ;;  %v5052_v9 = vmul.f32 %v3847_v3, %v1097_v47  ;;  %v5054_v22 = vmul.f32 %v3847_v3, %v1096_v41 }
 0x5f9   : > { %1146 = vadd.xlane.f32.xlu1 %v1129_v12  ;;  %1144 = vadd.xlane.f32.xlu0 %v1128_v2  ;;  %v5058_v13 = vmul.f32 %v3847_v3, %v1099_v35  ;;  %v5060_v14 = vmul.f32 %v3847_v3, %v1098_v49  ;;  %v5064_v23 = vmul.f32 %v3847_v3, %v1101_v44 }
 0x5fa   : > { %v5066_v16 = vmul.f32 %v3847_v3, %v1100_v51  ;;  %v5070_v24 = vmul.f32 %v3847_v3, %v1103_v0  ;;  %v5072_v25 = vmul.f32 %v3847_v3, %v1102_v46  ;;  %v5076_v26 = vmul.f32 %v3847_v3, %v1105_v7 }
 0x5fb   : > { %v5078_v15 = vmul.f32 %v3847_v3, %v1104_v56 }
 0x5fd   : > { %1150 = vadd.xlane.f32.xlu1 %v1131_v57  ;;  %1148 = vadd.xlane.f32.xlu0 %v1130_v10 }
 0x601   : > { %1154 = vadd.xlane.f32.xlu1 %v5049_v4  ;;  %1152 = vadd.xlane.f32.xlu0 %v1132_v21 }
 0x605   : > { %1158 = vadd.xlane.f32.xlu1 %v5052_v9  ;;  %1156 = vadd.xlane.f32.xlu0 %v5054_v22 }
 0x609   : > { %1162 = vadd.xlane.f32.xlu1 %v5058_v13  ;;  %1160 = vadd.xlane.f32.xlu0 %v5060_v14 }
 0x60d   : > { %1166 = vadd.xlane.f32.xlu1 %v5064_v23  ;;  %1164 = vadd.xlane.f32.xlu0 %v5066_v16 }
 0x611   : > { %1170 = vadd.xlane.f32.xlu1 %v5070_v24  ;;  %1168 = vadd.xlane.f32.xlu0 %v5072_v25 }
 0x615   : > { %1174 = vadd.xlane.f32.xlu1 %v5076_v26  ;;  %1172 = vadd.xlane.f32.xlu0 %v5078_v15 }
 0x686   : > { %v1147_v27 = vpop.xlane.xlu1 %1146  ;;  %v1145_v28 = vpop.xlane.xlu0 %1144 }
 0x687   : > { %3848 = vrcp.f32 %v1147_v27 }
 0x688   : > { %3850 = vrcp.f32 %v1145_v28 }
 0x68a   : > { %v1151_v29 = vpop.xlane.xlu1 %1150  ;;  %v1149_v18 = vpop.xlane.xlu0 %1148 }
 0x68b   : > { %3852 = vrcp.f32 %v1151_v29 }
 0x68c   : > { %3854 = vrcp.f32 %v1149_v18 }
 0x68e   : > { %v1155_v30 = vpop.xlane.xlu1 %1154  ;;  %v1153_v17 = vpop.xlane.xlu0 %1152 }
 0x68f   : > { %3856 = vrcp.f32 %v1155_v30 }
 0x690   : > { %3858 = vrcp.f32 %v1153_v17 }
 0x691   : > { %v3849_v20 = vpop.eup %3848 }
 0x692   : > { %v3851_v34 = vpop.eup %3850  ;;  %v1159_v19 = vpop.xlane.xlu1 %1158  ;;  %v5084_v42 = vmul.f32 %v3849_v20, %v1129_v12 }
 0x693   : > { %v1157_v33 = vpop.xlane.xlu0 %1156  ;;  %3860 = vrcp.f32 %v1159_v19  ;;  %v5082_v41 = vmul.f32 %v3851_v34, %v1128_v2 }
 0x694   : > { %3862 = vrcp.f32 %v1157_v33 }
 0x695   : > { %v3853_v32 = vpop.eup %3852  ;;  %v1208_v43 = vadd.f32 %v5084_v42, %v5082_v41 }
 0x696   : > { %v3855_v47 = vpop.eup %3854  ;;  %v1163_v31 = vpop.xlane.xlu1 %1162  ;;  %v1195_v50 = vmul.f32 %v3853_v32, %v1131_v57 }
 0x697   : > { %v1161_v48 = vpop.xlane.xlu0 %1160  ;;  %3864 = vrcp.f32 %v1163_v31  ;;  %v5086_v37 = vmul.f32 %v3855_v47, %v1130_v10 }
 0x698   : > { %3866 = vrcp.f32 %v1161_v48 }
 0x699   : > { %v3857_v49 = vpop.eup %3856  ;;  %v1209_v38 = vadd.f32 %v1208_v43, %v5086_v37 }
 0x69a   : > { %v3859_v35 = vpop.eup %3858  ;;  %v1167_v39 = vpop.xlane.xlu1 %1166  ;;  %v1197_v44 = vmul.f32 %v3857_v49, %v5049_v4 }
 0x69b   : > { %v1165_v40 = vpop.xlane.xlu0 %1164  ;;  %v1196_v51 = vmul.f32 %v3859_v35, %v1132_v21  ;;  %3868 = vrcp.f32 %v1167_v39  ;;  %v1210_v45 = vadd.f32 %v1209_v38, %v1195_v50 }
 0x69c   : > { %3870 = vrcp.f32 %v1165_v40 }
 0x69d   : > { %v3861_v54 = vpop.eup %3860  ;;  %v1211_v36 = vadd.f32 %v1210_v45, %v1196_v51 }
 0x69e   : > { %v3863_v55 = vpop.eup %3862  ;;  %v1171_v46 = vpop.xlane.xlu1 %1170  ;;  %v1199_v5 = vmul.f32 %v3861_v54, %v5052_v9 }
 0x69f   : > { %v1169_v63 = vpop.xlane.xlu0 %1168  ;;  %v1198_v52 = vmul.f32 %v3863_v55, %v5054_v22  ;;  %3872 = vrcp.f32 %v1171_v46  ;;  %v1212_v0 = vadd.f32 %v1211_v36, %v1197_v44 }
 0x6a0   : > { %3874 = vrcp.f32 %v1169_v63 }
 0x6a1   : > { %v3865_v53 = vpop.eup %3864  ;;  %v1213_v56 = vadd.f32 %v1212_v0, %v1198_v52 }
 0x6a2   : > { %v3867_v6 = vpop.eup %3866  ;;  %v1175_v7 = vpop.xlane.xlu1 %1174  ;;  %v1201_v1 = vmul.f32 %v3865_v53, %v5058_v13 }
 0x6a3   : > { %v1173_v58 = vpop.xlane.xlu0 %1172  ;;  %v1200_v61 = vmul.f32 %v3867_v6, %v5060_v14  ;;  %3876 = vrcp.f32 %v1175_v7  ;;  %v1214_v8 = vadd.f32 %v1213_v56, %v1199_v5 }
 0x6a4   : > { %3878 = vrcp.f32 %v1173_v58 }
 0x6a5   : > { %v3869_v59 = vpop.eup %3868  ;;  %v1215_v62 = vadd.f32 %v1214_v8, %v1200_v61 }
 0x6a6   : > { %v3871_v11 = vpop.eup %3870  ;;  %v1203_v2 = vmul.f32 %v3869_v59, %v5064_v23 }
 0x6a7   : > { %v1202_v60 = vmul.f32 %v3871_v11, %v5066_v16  ;;  %v1216_v3 = vadd.f32 %v1215_v62, %v1201_v1 }
 0x6a9   : > { %v3873_v12 = vpop.eup %3872  ;;  %v1217_v57 = vadd.f32 %v1216_v3, %v1202_v60 }
 0x6aa   : > { %v3875_v10 = vpop.eup %3874  ;;  %v1205_v22 = vmul.f32 %v3873_v12, %v5070_v24 }
 0x6ab   : > { %v1204_v4 = vmul.f32 %v3875_v10, %v5072_v25  ;;  %v1218_v21 = vadd.f32 %v1217_v57, %v1203_v2 }
 0x6ad   : > { %v3877_v9 = vpop.eup %3876  ;;  %v1219_v14 = vadd.f32 %v1218_v21, %v1204_v4 }
 0x6ae   : > { %v3879_v27 = vpop.eup %3878  ;;  %v1207_v29 = vmul.f32 %v3877_v9, %v5076_v26 }
 0x6af   : > { %v1206_v13 = vmul.f32 %v3879_v27, %v5078_v15  ;;  %v1220_v28 = vadd.f32 %v1219_v14, %v1205_v22 }
 0x6b1   : > { %v1221_v16 = vadd.f32 %v1220_v28, %v1206_v13 }
 0x6b3   : > { %v1222_v18 = vadd.f32 %v1221_v16, %v1207_v29 }
 0x6b5   : > { %v1223_v30 = vrot.slane %v1222_v18, 4 }
 0x6b7   : > { %v1224_v17 = vadd.f32 %v1223_v30, %v1222_v18 }
 0x6b9   : > { %v1225_v23 = vrot.slane %v1224_v17, 2 }
 0x6bb   : > { %v1226_v20 = vadd.f32 %v1225_v23, %v1224_v17 }
 0x6bd   : > { %v1227_v34 = vrot.slane %v1226_v20, 1 }
 0x6bf   : > { %v1228_v19 = vadd.f32 %v1227_v34, %v1226_v20 }
 0x6c1   : > { %3880 = vrcp.f32 %v1228_v19 }
 0x6cb   : > { %v3881_v25 = vpop.eup %3880 }
 0x6cc   : > { %v1231_v33 = vmul.f32 %v3881_v25, %v5084_v42  ;;  %v1230_v24 = vmul.f32 %v3881_v25, %v5082_v41  ;;  %v1233_v15 = vmul.f32 %v3881_v25, %v1195_v50  ;;  %v1232_v32 = vmul.f32 %v3881_v25, %v5086_v37 }
 0x6cd   : > { %v5105_v26 = vmul.f32 %v3881_v25, %v1197_v44  ;;  %v1234_v47 = vmul.f32 %v3881_v25, %v1196_v51  ;;  %v5108_v31 = vmul.f32 %v3881_v25, %v1199_v5  ;;  %v5110_v48 = vmul.f32 %v3881_v25, %v1198_v52 }
 0x6ce   : > { %1248 = vadd.xlane.f32.xlu1 %v1231_v33  ;;  %1246 = vadd.xlane.f32.xlu0 %v1230_v24  ;;  %v5114_v41 = vmul.f32 %v3881_v25, %v1201_v1  ;;  %v5116_v42 = vmul.f32 %v3881_v25, %v1200_v61  ;;  %v5120_v37 = vmul.f32 %v3881_v25, %v1203_v2 }
 0x6cf   : > { %v5122_v43 = vmul.f32 %v3881_v25, %v1202_v60  ;;  %v5126_v49 = vmul.f32 %v3881_v25, %v1205_v22  ;;  %v5128_v50 = vmul.f32 %v3881_v25, %v1204_v4  ;;  %v5132_v38 = vmul.f32 %v3881_v25, %v1207_v29 }
 0x6d0   : > { %v5134_v35 = vmul.f32 %v3881_v25, %v1206_v13 }
 0x6d2   : > { %1252 = vadd.xlane.f32.xlu1 %v1233_v15  ;;  %1250 = vadd.xlane.f32.xlu0 %v1232_v32 }
 0x6d6   : > { %1256 = vadd.xlane.f32.xlu1 %v5105_v26  ;;  %1254 = vadd.xlane.f32.xlu0 %v1234_v47 }
 0x6da   : > { %1260 = vadd.xlane.f32.xlu1 %v5108_v31  ;;  %1258 = vadd.xlane.f32.xlu0 %v5110_v48 }
 0x6de   : > { %1264 = vadd.xlane.f32.xlu1 %v5114_v41  ;;  %1262 = vadd.xlane.f32.xlu0 %v5116_v42 }
 0x6e2   : > { %1268 = vadd.xlane.f32.xlu1 %v5120_v37  ;;  %1266 = vadd.xlane.f32.xlu0 %v5122_v43 }
 0x6e6   : > { %1272 = vadd.xlane.f32.xlu1 %v5126_v49  ;;  %1270 = vadd.xlane.f32.xlu0 %v5128_v50 }
 0x6ea   : > { %1276 = vadd.xlane.f32.xlu1 %v5132_v38  ;;  %1274 = vadd.xlane.f32.xlu0 %v5134_v35 }
 0x75b   : > { %v1249_v39 = vpop.xlane.xlu1 %1248  ;;  %v1247_v40 = vpop.xlane.xlu0 %1246 }
 0x75c   : > { %3882 = vrcp.f32 %v1249_v39 }
 0x75d   : > { %3884 = vrcp.f32 %v1247_v40 }
 0x75f   : > { %v1253_v51 = vpop.xlane.xlu1 %1252  ;;  %v1251_v45 = vpop.xlane.xlu0 %1250 }
 0x760   : > { %3886 = vrcp.f32 %v1253_v51 }
 0x761   : > { %3888 = vrcp.f32 %v1251_v45 }
 0x763   : > { %v1257_v54 = vpop.xlane.xlu1 %1256  ;;  %v1255_v44 = vpop.xlane.xlu0 %1254 }
 0x764   : > { %3890 = vrcp.f32 %v1257_v54 }
 0x765   : > { %3892 = vrcp.f32 %v1255_v44 }
 0x766   : > { %v3883_v36 = vpop.eup %3882 }
 0x767   : > { %v3885_v55 = vpop.eup %3884  ;;  %v1261_v46 = vpop.xlane.xlu1 %1260  ;;  %v5140_v0 = vmul.f32 %v3883_v36, %v1231_v33 }
 0x768   : > { %v1259_v63 = vpop.xlane.xlu0 %1258  ;;  %3894 = vrcp.f32 %v1261_v46  ;;  %v5138_v52 = vmul.f32 %v3885_v55, %v1230_v24 }
 0x769   : > { %3896 = vrcp.f32 %v1259_v63 }
 0x76a   : > { %v3887_v53 = vpop.eup %3886  ;;  %v1310_v58 = vadd.f32 %v5140_v0, %v5138_v52 }
 0x76b   : > { %v3889_v5 = vpop.eup %3888  ;;  %v1265_v56 = vpop.xlane.xlu1 %1264  ;;  %v1297_v8 = vmul.f32 %v3887_v53, %v1233_v15 }
 0x76c   : > { %v1263_v6 = vpop.xlane.xlu0 %1262  ;;  %3898 = vrcp.f32 %v1265_v56  ;;  %v5142_v7 = vmul.f32 %v3889_v5, %v1232_v32 }
 0x76d   : > { %3900 = vrcp.f32 %v1263_v6 }
 0x76e   : > { %v3891_v61 = vpop.eup %3890  ;;  %v1311_v59 = vadd.f32 %v1310_v58, %v5142_v7 }
 0x76f   : > { %v3893_v1 = vpop.eup %3892  ;;  %v1269_v62 = vpop.xlane.xlu1 %1268  ;;  %v1299_v2 = vmul.f32 %v3891_v61, %v5105_v26 }
 0x770   : > { %v1267_v11 = vpop.xlane.xlu0 %1266  ;;  %v1298_v60 = vmul.f32 %v3893_v1, %v1234_v47  ;;  %3902 = vrcp.f32 %v1269_v62  ;;  %v1312_v3 = vadd.f32 %v1311_v59, %v1297_v8 }
 0x771   : > { %3904 = vrcp.f32 %v1267_v11 }
 0x772   : > { %v3895_v12 = vpop.eup %3894  ;;  %v1313_v57 = vadd.f32 %v1312_v3, %v1298_v60 }
 0x773   : > { %v3897_v10 = vpop.eup %3896  ;;  %v1273_v4 = vpop.xlane.xlu1 %1272  ;;  %v1301_v27 = vmul.f32 %v3895_v12, %v5108_v31 }
 0x774   : > { %v1271_v21 = vpop.xlane.xlu0 %1270  ;;  %v1300_v9 = vmul.f32 %v3897_v10, %v5110_v48  ;;  %3906 = vrcp.f32 %v1273_v4  ;;  %v1314_v22 = vadd.f32 %v1313_v57, %v1299_v2 }
 0x775   : > { %3908 = vrcp.f32 %v1271_v21 }
 0x776   : > { %v3899_v14 = vpop.eup %3898  ;;  %v1315_v13 = vadd.f32 %v1314_v22, %v1300_v9 }
 0x777   : > { %v3901_v28 = vpop.eup %3900  ;;  %v1277_v29 = vpop.xlane.xlu1 %1276  ;;  %v1303_v23 = vmul.f32 %v3899_v14, %v5114_v41 }
 0x778   : > { %v1275_v16 = vpop.xlane.xlu0 %1274  ;;  %v1302_v18 = vmul.f32 %v3901_v28, %v5116_v42  ;;  %3910 = vrcp.f32 %v1277_v29  ;;  %v1316_v30 = vadd.f32 %v1315_v13, %v1301_v27 }
 0x779   : > { %3912 = vrcp.f32 %v1275_v16 }
 0x77a   : > { %v3903_v17 = vpop.eup %3902  ;;  %v1317_v20 = vadd.f32 %v1316_v30, %v1302_v18 }
 0x77b   : > { %v3905_v34 = vpop.eup %3904  ;;  %v1305_v24 = vmul.f32 %v3903_v17, %v5120_v37 }
 0x77c   : > { %v1304_v19 = vmul.f32 %v3905_v34, %v5122_v43  ;;  %v1318_v25 = vadd.f32 %v1317_v20, %v1303_v23 }
 0x77e   : > { %v3907_v33 = vpop.eup %3906  ;;  %v1319_v15 = vadd.f32 %v1318_v25, %v1304_v19 }
 0x77f   : > { %v3909_v32 = vpop.eup %3908  ;;  %v1307_v48 = vmul.f32 %v3907_v33, %v5126_v49 }
 0x780   : > { %v1306_v26 = vmul.f32 %v3909_v32, %v5128_v50  ;;  %v1320_v47 = vadd.f32 %v1319_v15, %v1305_v24 }
 0x782   : > { %v3911_v31 = vpop.eup %3910  ;;  %v1321_v42 = vadd.f32 %v1320_v47, %v1306_v26 }
 0x783   : > { %v3913_v39 = vpop.eup %3912  ;;  %v1309_v51 = vmul.f32 %v3911_v31, %v5132_v38 }
 0x784   : > { %v1308_v41 = vmul.f32 %v3913_v39, %v5134_v35  ;;  %v1322_v40 = vadd.f32 %v1321_v42, %v1307_v48 }
 0x786   : > { %v1323_v43 = vadd.f32 %v1322_v40, %v1308_v41 }
 0x788   : > { %v1324_v45 = vadd.f32 %v1323_v43, %v1309_v51 }
 0x78a   : > { %v1325_v54 = vrot.slane %v1324_v45, 4 }
 0x78c   : > { %v1326_v44 = vadd.f32 %v1325_v54, %v1324_v45 }
 0x78e   : > { %v1327_v37 = vrot.slane %v1326_v44, 2 }
 0x790   : > { %v1328_v36 = vadd.f32 %v1327_v37, %v1326_v44 }
 0x792   : > { %v1329_v55 = vrot.slane %v1328_v36, 1 }
 0x794   : > { %v1330_v46 = vadd.f32 %v1329_v55, %v1328_v36 }
 0x796   : > { %3914 = vrcp.f32 %v1330_v46 }
 0x7a0   : > { %v3915_v50 = vpop.eup %3914 }
 0x7a1   : > { %v1333_v63 = vmul.f32 %v3915_v50, %v5140_v0  ;;  %v1332_v49 = vmul.f32 %v3915_v50, %v5138_v52  ;;  %v1335_v35 = vmul.f32 %v3915_v50, %v1297_v8  ;;  %v1334_v53 = vmul.f32 %v3915_v50, %v5142_v7 }
 0x7a2   : > { %v5161_v38 = vmul.f32 %v3915_v50, %v1299_v2  ;;  %v1336_v5 = vmul.f32 %v3915_v50, %v1298_v60  ;;  %v5164_v56 = vmul.f32 %v3915_v50, %v1301_v27  ;;  %v5166_v6 = vmul.f32 %v3915_v50, %v1300_v9 }
 0x7a3   : > { %1350 = vadd.xlane.f32.xlu1 %v1333_v63  ;;  %1348 = vadd.xlane.f32.xlu0 %v1332_v49  ;;  %v5170_v52 = vmul.f32 %v3915_v50, %v1303_v23  ;;  %v5172_v0 = vmul.f32 %v3915_v50, %v1302_v18  ;;  %v5176_v7 = vmul.f32 %v3915_v50, %v1305_v24 }
 0x7a4   : > { %v5178_v58 = vmul.f32 %v3915_v50, %v1304_v19  ;;  %v5182_v61 = vmul.f32 %v3915_v50, %v1307_v48  ;;  %v5184_v8 = vmul.f32 %v3915_v50, %v1306_v26  ;;  %v5188_v59 = vmul.f32 %v3915_v50, %v1309_v51 }
 0x7a5   : > { %v5190_v1 = vmul.f32 %v3915_v50, %v1308_v41 }
 0x7a7   : > { %1354 = vadd.xlane.f32.xlu1 %v1335_v35  ;;  %1352 = vadd.xlane.f32.xlu0 %v1334_v53 }
 0x7ab   : > { %1358 = vadd.xlane.f32.xlu1 %v5161_v38  ;;  %1356 = vadd.xlane.f32.xlu0 %v1336_v5 }
 0x7af   : > { %1362 = vadd.xlane.f32.xlu1 %v5164_v56  ;;  %1360 = vadd.xlane.f32.xlu0 %v5166_v6 }
 0x7b3   : > { %1366 = vadd.xlane.f32.xlu1 %v5170_v52  ;;  %1364 = vadd.xlane.f32.xlu0 %v5172_v0 }
 0x7b7   : > { %1370 = vadd.xlane.f32.xlu1 %v5176_v7  ;;  %1368 = vadd.xlane.f32.xlu0 %v5178_v58 }
 0x7bb   : > { %1374 = vadd.xlane.f32.xlu1 %v5182_v61  ;;  %1372 = vadd.xlane.f32.xlu0 %v5184_v8 }
 0x7bf   : > { %1378 = vadd.xlane.f32.xlu1 %v5188_v59  ;;  %1376 = vadd.xlane.f32.xlu0 %v5190_v1 }
 0x830   : > { %v1351_v62 = vpop.xlane.xlu1 %1350  ;;  %v1349_v11 = vpop.xlane.xlu0 %1348 }
 0x831   : > { %3916 = vrcp.f32 %v1351_v62 }
 0x832   : > { %3918 = vrcp.f32 %v1349_v11 }
 0x834   : > { %v1355_v60 = vpop.xlane.xlu1 %1354  ;;  %v1353_v3 = vpop.xlane.xlu0 %1352 }
 0x835   : > { %3920 = vrcp.f32 %v1355_v60 }
 0x836   : > { %3922 = vrcp.f32 %v1353_v3 }
 0x838   : > { %v1359_v12 = vpop.xlane.xlu1 %1358  ;;  %v1357_v2 = vpop.xlane.xlu0 %1356 }
 0x839   : > { %3924 = vrcp.f32 %v1359_v12 }
 0x83a   : > { %3926 = vrcp.f32 %v1357_v2 }
 0x83b   : > { %v3917_v57 = vpop.eup %3916 }
 0x83c   : > { %v3919_v10 = vpop.eup %3918  ;;  %v1363_v4 = vpop.xlane.xlu1 %1362  ;;  %v5196_v22 = vmul.f32 %v3917_v57, %v1333_v63 }
 0x83d   : > { %v1361_v21 = vpop.xlane.xlu0 %1360  ;;  %3928 = vrcp.f32 %v1363_v4  ;;  %v5194_v9 = vmul.f32 %v3919_v10, %v1332_v49 }
 0x83e   : > { %3930 = vrcp.f32 %v1361_v21 }
 0x83f   : > { %v3921_v14 = vpop.eup %3920  ;;  %v1412_v16 = vadd.f32 %v5196_v22, %v5194_v9 }
 0x840   : > { %v3923_v27 = vpop.eup %3922  ;;  %v1367_v13 = vpop.xlane.xlu1 %1366  ;;  %v1399_v30 = vmul.f32 %v3921_v14, %v1335_v35 }
 0x841   : > { %v1365_v28 = vpop.xlane.xlu0 %1364  ;;  %3932 = vrcp.f32 %v1367_v13  ;;  %v5198_v29 = vmul.f32 %v3923_v27, %v1334_v53 }
 0x842   : > { %3934 = vrcp.f32 %v1365_v28 }
 0x843   : > { %v3925_v18 = vpop.eup %3924  ;;  %v1413_v17 = vadd.f32 %v1412_v16, %v5198_v29 }
 0x844   : > { %v3927_v23 = vpop.eup %3926  ;;  %v1371_v20 = vpop.xlane.xlu1 %1370  ;;  %v1401_v24 = vmul.f32 %v3925_v18, %v5161_v38 }
 0x845   : > { %v1369_v34 = vpop.xlane.xlu0 %1368  ;;  %v1400_v19 = vmul.f32 %v3927_v23, %v1336_v5  ;;  %3936 = vrcp.f32 %v1371_v20  ;;  %v1414_v25 = vadd.f32 %v1413_v17, %v1399_v30 }
 0x846   : > { %3938 = vrcp.f32 %v1369_v34 }
 0x847   : > { %v3929_v33 = vpop.eup %3928  ;;  %v1415_v15 = vadd.f32 %v1414_v25, %v1400_v19 }
 0x848   : > { %v3931_v32 = vpop.eup %3930  ;;  %v1375_v26 = vpop.xlane.xlu1 %1374  ;;  %v1403_v39 = vmul.f32 %v3929_v33, %v5164_v56 }
 0x849   : > { %v1373_v47 = vpop.xlane.xlu0 %1372  ;;  %v1402_v31 = vmul.f32 %v3931_v32, %v5166_v6  ;;  %3940 = vrcp.f32 %v1375_v26  ;;  %v1416_v48 = vadd.f32 %v1415_v15, %v1401_v24 }
 0x84a   : > { %3942 = vrcp.f32 %v1373_v47 }
 0x84b   : > { %v3933_v42 = vpop.eup %3932  ;;  %v1417_v41 = vadd.f32 %v1416_v48, %v1402_v31 }
 0x84c   : > { %v3935_v40 = vpop.eup %3934  ;;  %v1379_v51 = vpop.xlane.xlu1 %1378  ;;  %v1405_v37 = vmul.f32 %v3933_v42, %v5170_v52 }
 0x84d   : > { %v1377_v43 = vpop.xlane.xlu0 %1376  ;;  %v1404_v45 = vmul.f32 %v3935_v40, %v5172_v0  ;;  %3944 = vrcp.f32 %v1379_v51  ;;  %v1418_v54 = vadd.f32 %v1417_v41, %v1403_v39 }
 0x84e   : > { %3946 = vrcp.f32 %v1377_v43 }
 0x84f   : > { %v3937_v44 = vpop.eup %3936  ;;  %v1419_v36 = vadd.f32 %v1418_v54, %v1404_v45 }
 0x850   : > { %v3939_v55 = vpop.eup %3938  ;;  %v1407_v49 = vmul.f32 %v3937_v44, %v5176_v7 }
 0x851   : > { %v1406_v46 = vmul.f32 %v3939_v55, %v5178_v58  ;;  %v1420_v50 = vadd.f32 %v1419_v36, %v1405_v37 }
 0x853   : > { %v3941_v63 = vpop.eup %3940  ;;  %v1421_v35 = vadd.f32 %v1420_v50, %v1406_v46 }
 0x854   : > { %v3943_v53 = vpop.eup %3942  ;;  %v1409_v6 = vmul.f32 %v3941_v63, %v5182_v61 }
 0x855   : > { %v1408_v38 = vmul.f32 %v3943_v53, %v5184_v8  ;;  %v1422_v5 = vadd.f32 %v1421_v35, %v1407_v49 }
 0x857   : > { %v3945_v56 = vpop.eup %3944  ;;  %v1423_v0 = vadd.f32 %v1422_v5, %v1408_v38 }
 0x858   : > { %v3947_v62 = vpop.eup %3946  ;;  %v1411_v60 = vmul.f32 %v3945_v56, %v5188_v59 }
 0x859   : > { %v1410_v52 = vmul.f32 %v3947_v62, %v5190_v1  ;;  %v1424_v11 = vadd.f32 %v1423_v0, %v1409_v6 }
 0x85b   : > { %v1425_v58 = vadd.f32 %v1424_v11, %v1410_v52 }
 0x85d   : > { %v1426_v3 = vadd.f32 %v1425_v58, %v1411_v60 }
 0x85f   : > { %v1427_v12 = vrot.slane %v1426_v3, 4 }
 0x861   : > { %v1428_v2 = vadd.f32 %v1427_v12, %v1426_v3 }
 0x863   : > { %v1429_v7 = vrot.slane %v1428_v2, 2 }
 0x865   : > { %v1430_v57 = vadd.f32 %v1429_v7, %v1428_v2 }
 0x867   : > { %v1431_v10 = vrot.slane %v1430_v57, 1 }
 0x869   : > { %v1432_v4 = vadd.f32 %v1431_v10, %v1430_v57 }
 0x86b   : > { %3948 = vrcp.f32 %v1432_v4 }
 0x875   : > { %v3949_v8 = vpop.eup %3948 }
 0x876   : > { %v1435_v21 = vmul.f32 %v3949_v8, %v5196_v22  ;;  %v1434_v61 = vmul.f32 %v3949_v8, %v5194_v9  ;;  %v1437_v1 = vmul.f32 %v3949_v8, %v1399_v30  ;;  %v1436_v14 = vmul.f32 %v3949_v8, %v5198_v29 }
 0x877   : > { %v5217_v59 = vmul.f32 %v3949_v8, %v1401_v24  ;;  %v1438_v27 = vmul.f32 %v3949_v8, %v1400_v19  ;;  %v5220_v13 = vmul.f32 %v3949_v8, %v1403_v39  ;;  %v5222_v28 = vmul.f32 %v3949_v8, %v1402_v31 }
 0x878   : > { %1452 = vadd.xlane.f32.xlu1 %v1435_v21  ;;  %1450 = vadd.xlane.f32.xlu0 %v1434_v61  ;;  %v5226_v9 = vmul.f32 %v3949_v8, %v1405_v37  ;;  %v5228_v22 = vmul.f32 %v3949_v8, %v1404_v45  ;;  %v5232_v29 = vmul.f32 %v3949_v8, %v1407_v49 }
 0x879   : > { %v5234_v16 = vmul.f32 %v3949_v8, %v1406_v46  ;;  %v5238_v18 = vmul.f32 %v3949_v8, %v1409_v6  ;;  %v5240_v30 = vmul.f32 %v3949_v8, %v1408_v38  ;;  %v5244_v17 = vmul.f32 %v3949_v8, %v1411_v60 }
 0x87a   : > { %v5246_v23 = vmul.f32 %v3949_v8, %v1410_v52 }
 0x87c   : > { %1456 = vadd.xlane.f32.xlu1 %v1437_v1  ;;  %1454 = vadd.xlane.f32.xlu0 %v1436_v14 }
 0x880   : > { %1460 = vadd.xlane.f32.xlu1 %v5217_v59  ;;  %1458 = vadd.xlane.f32.xlu0 %v1438_v27 }
 0x884   : > { %1464 = vadd.xlane.f32.xlu1 %v5220_v13  ;;  %1462 = vadd.xlane.f32.xlu0 %v5222_v28 }
 0x888   : > { %1468 = vadd.xlane.f32.xlu1 %v5226_v9  ;;  %1466 = vadd.xlane.f32.xlu0 %v5228_v22 }
 0x88c   : > { %1472 = vadd.xlane.f32.xlu1 %v5232_v29  ;;  %1470 = vadd.xlane.f32.xlu0 %v5234_v16 }
 0x890   : > { %1476 = vadd.xlane.f32.xlu1 %v5238_v18  ;;  %1474 = vadd.xlane.f32.xlu0 %v5240_v30 }
 0x894   : > { %1480 = vadd.xlane.f32.xlu1 %v5244_v17  ;;  %1478 = vadd.xlane.f32.xlu0 %v5246_v23 }
 0x905   : > { %v1453_v20 = vpop.xlane.xlu1 %1452  ;;  %v1451_v34 = vpop.xlane.xlu0 %1450 }
 0x906   : > { %3950 = vrcp.f32 %v1453_v20 }
 0x907   : > { %3952 = vrcp.f32 %v1451_v34 }
 0x909   : > { %v1457_v19 = vpop.xlane.xlu1 %1456  ;;  %v1455_v25 = vpop.xlane.xlu0 %1454 }
 0x90a   : > { %3954 = vrcp.f32 %v1457_v19 }
 0x90b   : > { %3956 = vrcp.f32 %v1455_v25 }
 0x90d   : > { %v1461_v33 = vpop.xlane.xlu1 %1460  ;;  %v1459_v24 = vpop.xlane.xlu0 %1458 }
 0x90e   : > { %3958 = vrcp.f32 %v1461_v33 }
 0x90f   : > { %3960 = vrcp.f32 %v1459_v24 }
 0x910   : > { %v3951_v15 = vpop.eup %3950 }
 0x911   : > { %v3953_v32 = vpop.eup %3952  ;;  %v1465_v26 = vpop.xlane.xlu1 %1464  ;;  %v5252_v48 = vmul.f32 %v3951_v15, %v1435_v21 }
 0x912   : > { %v1463_v47 = vpop.xlane.xlu0 %1462  ;;  %3962 = vrcp.f32 %v1465_v26  ;;  %v5250_v31 = vmul.f32 %v3953_v32, %v1434_v61 }
 0x913   : > { %3964 = vrcp.f32 %v1463_v47 }
 0x914   : > { %v3955_v42 = vpop.eup %3954  ;;  %v1514_v43 = vadd.f32 %v5252_v48, %v5250_v31 }
 0x915   : > { %v3957_v39 = vpop.eup %3956  ;;  %v1469_v41 = vpop.xlane.xlu1 %1468  ;;  %v1501_v54 = vmul.f32 %v3955_v42, %v1437_v1 }
 0x916   : > { %v1467_v40 = vpop.xlane.xlu0 %1466  ;;  %3966 = vrcp.f32 %v1469_v41  ;;  %v5254_v51 = vmul.f32 %v3957_v39, %v1436_v14 }
 0x917   : > { %3968 = vrcp.f32 %v1467_v40 }
 0x918   : > { %v3959_v45 = vpop.eup %3958  ;;  %v1515_v44 = vadd.f32 %v1514_v43, %v5254_v51 }
 0x919   : > { %v3961_v37 = vpop.eup %3960  ;;  %v1473_v36 = vpop.xlane.xlu1 %1472  ;;  %v1503_v49 = vmul.f32 %v3959_v45, %v5217_v59 }
 0x91a   : > { %v1471_v55 = vpop.xlane.xlu0 %1470  ;;  %v1502_v46 = vmul.f32 %v3961_v37, %v1438_v27  ;;  %3970 = vrcp.f32 %v1473_v36  ;;  %v1516_v50 = vadd.f32 %v1515_v44, %v1501_v54 }
 0x91b   : > { %3972 = vrcp.f32 %v1471_v55 }
 0x91c   : > { %v3963_v63 = vpop.eup %3962  ;;  %v1517_v35 = vadd.f32 %v1516_v50, %v1502_v46 }
 0x91d   : > { %v3965_v53 = vpop.eup %3964  ;;  %v1477_v38 = vpop.xlane.xlu1 %1476  ;;  %v1505_v62 = vmul.f32 %v3963_v63, %v5220_v13 }
 0x91e   : > { %v1475_v5 = vpop.xlane.xlu0 %1474  ;;  %v1504_v56 = vmul.f32 %v3965_v53, %v5222_v28  ;;  %3974 = vrcp.f32 %v1477_v38  ;;  %v1518_v6 = vadd.f32 %v1517_v35, %v1503_v49 }
 0x91f   : > { %3976 = vrcp.f32 %v1475_v5 }
 0x920   : > { %v3967_v0 = vpop.eup %3966  ;;  %v1519_v52 = vadd.f32 %v1518_v6, %v1504_v56 }
 0x921   : > { %v3969_v11 = vpop.eup %3968  ;;  %v1481_v60 = vpop.xlane.xlu1 %1480  ;;  %v1507_v7 = vmul.f32 %v3967_v0, %v5226_v9 }
 0x922   : > { %v1479_v58 = vpop.xlane.xlu0 %1478  ;;  %v1506_v3 = vmul.f32 %v3969_v11, %v5228_v22  ;;  %3978 = vrcp.f32 %v1481_v60  ;;  %v1520_v12 = vadd.f32 %v1519_v52, %v1505_v62 }
 0x923   : > { %3980 = vrcp.f32 %v1479_v58 }
 0x924   : > { %v3971_v2 = vpop.eup %3970  ;;  %v1521_v57 = vadd.f32 %v1520_v12, %v1506_v3 }
 0x925   : > { %v3973_v10 = vpop.eup %3972  ;;  %v1509_v61 = vmul.f32 %v3971_v2, %v5232_v29 }
 0x926   : > { %v1508_v4 = vmul.f32 %v3973_v10, %v5234_v16  ;;  %v1522_v8 = vadd.f32 %v1521_v57, %v1507_v7 }
 0x928   : > { %v3975_v21 = vpop.eup %3974  ;;  %v1523_v1 = vadd.f32 %v1522_v8, %v1508_v4 }
 0x929   : > { %v3977_v14 = vpop.eup %3976  ;;  %v1511_v28 = vmul.f32 %v3975_v21, %v5238_v18 }
 0x92a   : > { %v1510_v59 = vmul.f32 %v3977_v14, %v5240_v30  ;;  %v1524_v27 = vadd.f32 %v1523_v1, %v1509_v61 }
 0x92c   : > { %v3979_v13 = vpop.eup %3978  ;;  %v1525_v22 = vadd.f32 %v1524_v27, %v1510_v59 }
 0x92d   : > { %v3981_v20 = vpop.eup %3980  ;;  %v1513_v19 = vmul.f32 %v3979_v13, %v5244_v17 }
 0x92e   : > { %v1512_v9 = vmul.f32 %v3981_v20, %v5246_v23  ;;  %v1526_v34 = vadd.f32 %v1525_v22, %v1511_v28 }
 0x930   : > { %v1527_v16 = vadd.f32 %v1526_v34, %v1512_v9 }
 0x932   : > { %v1528_v25 = vadd.f32 %v1527_v16, %v1513_v19 }
 0x934   : > { %v1529_v33 = vrot.slane %v1528_v25, 4 }
 0x936   : > { %v1530_v24 = vadd.f32 %v1529_v33, %v1528_v25 }
 0x938   : > { %v1531_v29 = vrot.slane %v1530_v24, 2 }
 0x93a   : > { %v1532_v15 = vadd.f32 %v1531_v29, %v1530_v24 }
 0x93c   : > { %v1533_v32 = vrot.slane %v1532_v15, 1 }
 0x93e   : > { %v1534_v26 = vadd.f32 %v1533_v32, %v1532_v15 }
 0x940   : > { %3982 = vrcp.f32 %v1534_v26 }
 0x94a   : > { %v3983_v30 = vpop.eup %3982 }
 0x94b   : > { %v1537_v47 = vmul.f32 %v3983_v30, %v5252_v48  ;;  %v1536_v18 = vmul.f32 %v3983_v30, %v5250_v31  ;;  %v1539_v23 = vmul.f32 %v3983_v30, %v1501_v54  ;;  %v1538_v42 = vmul.f32 %v3983_v30, %v5254_v51 }
 0x94c   : > { %v5273_v17 = vmul.f32 %v3983_v30, %v1503_v49  ;;  %v1540_v39 = vmul.f32 %v3983_v30, %v1502_v46  ;;  %v5276_v41 = vmul.f32 %v3983_v30, %v1505_v62  ;;  %v5278_v40 = vmul.f32 %v3983_v30, %v1504_v56 }
 0x94d   : > { %1554 = vadd.xlane.f32.xlu1 %v1537_v47  ;;  %1552 = vadd.xlane.f32.xlu0 %v1536_v18  ;;  %v5282_v31 = vmul.f32 %v3983_v30, %v1507_v7  ;;  %v5284_v48 = vmul.f32 %v3983_v30, %v1506_v3  ;;  %v5288_v51 = vmul.f32 %v3983_v30, %v1509_v61 }
 0x94e   : > { %v5290_v43 = vmul.f32 %v3983_v30, %v1508_v4  ;;  %v5294_v45 = vmul.f32 %v3983_v30, %v1511_v28  ;;  %v5296_v54 = vmul.f32 %v3983_v30, %v1510_v59  ;;  %v5300_v44 = vmul.f32 %v3983_v30, %v1513_v19 }
 0x94f   : > { %v5302_v37 = vmul.f32 %v3983_v30, %v1512_v9 }
 0x951   : > { %1558 = vadd.xlane.f32.xlu1 %v1539_v23  ;;  %1556 = vadd.xlane.f32.xlu0 %v1538_v42 }
 0x955   : > { %1562 = vadd.xlane.f32.xlu1 %v5273_v17  ;;  %1560 = vadd.xlane.f32.xlu0 %v1540_v39 }
 0x959   : > { %1566 = vadd.xlane.f32.xlu1 %v5276_v41  ;;  %1564 = vadd.xlane.f32.xlu0 %v5278_v40 }
 0x95d   : > { %1570 = vadd.xlane.f32.xlu1 %v5282_v31  ;;  %1568 = vadd.xlane.f32.xlu0 %v5284_v48 }
 0x961   : > { %1574 = vadd.xlane.f32.xlu1 %v5288_v51  ;;  %1572 = vadd.xlane.f32.xlu0 %v5290_v43 }
 0x965   : > { %1578 = vadd.xlane.f32.xlu1 %v5294_v45  ;;  %1576 = vadd.xlane.f32.xlu0 %v5296_v54 }
 0x969   : > { %1582 = vadd.xlane.f32.xlu1 %v5300_v44  ;;  %1580 = vadd.xlane.f32.xlu0 %v5302_v37 }
 0x9da   : > { %v1555_v36 = vpop.xlane.xlu1 %1554  ;;  %v1553_v55 = vpop.xlane.xlu0 %1552 }
 0x9db   : > { %3984 = vrcp.f32 %v1555_v36 }
 0x9dc   : > { %3986 = vrcp.f32 %v1553_v55 }
 0x9de   : > { %v1559_v46 = vpop.xlane.xlu1 %1558  ;;  %v1557_v50 = vpop.xlane.xlu0 %1556 }
 0x9df   : > { %3988 = vrcp.f32 %v1559_v46 }
 0x9e0   : > { %3990 = vrcp.f32 %v1557_v50 }
 0x9e2   : > { %v1563_v63 = vpop.xlane.xlu1 %1562  ;;  %v1561_v49 = vpop.xlane.xlu0 %1560 }
 0x9e3   : > { %3992 = vrcp.f32 %v1563_v63 }
 0x9e4   : > { %3994 = vrcp.f32 %v1561_v49 }
 0x9e5   : > { %v3985_v35 = vpop.eup %3984 }
 0x9e6   : > { %v3987_v53 = vpop.eup %3986  ;;  %v1567_v38 = vpop.xlane.xlu1 %1566  ;;  %v5308_v6 = vmul.f32 %v3985_v35, %v1537_v47 }
 0x9e7   : > { %v1565_v5 = vpop.xlane.xlu0 %1564  ;;  %3996 = vrcp.f32 %v1567_v38  ;;  %v5306_v56 = vmul.f32 %v3987_v53, %v1536_v18 }
 0x9e8   : > { %3998 = vrcp.f32 %v1565_v5 }
 0x9e9   : > { %v3989_v0 = vpop.eup %3988  ;;  %v1616_v58 = vadd.f32 %v5308_v6, %v5306_v56 }
 0x9ea   : > { %v3991_v62 = vpop.eup %3990  ;;  %v1571_v52 = vpop.xlane.xlu1 %1570  ;;  %v1603_v12 = vmul.f32 %v3989_v0, %v1539_v23 }
 0x9eb   : > { %v1569_v11 = vpop.xlane.xlu0 %1568  ;;  %4000 = vrcp.f32 %v1571_v52  ;;  %v5310_v60 = vmul.f32 %v3991_v62, %v1538_v42 }
 0x9ec   : > { %4002 = vrcp.f32 %v1569_v11 }
 0x9ed   : > { %v3993_v3 = vpop.eup %3992  ;;  %v1617_v2 = vadd.f32 %v1616_v58, %v5310_v60 }
 0x9ee   : > { %v3995_v7 = vpop.eup %3994  ;;  %v1575_v57 = vpop.xlane.xlu1 %1574  ;;  %v1605_v61 = vmul.f32 %v3993_v3, %v5273_v17 }
 0x9ef   : > { %v1573_v10 = vpop.xlane.xlu0 %1572  ;;  %v1604_v4 = vmul.f32 %v3995_v7, %v1540_v39  ;;  %4004 = vrcp.f32 %v1575_v57  ;;  %v1618_v8 = vadd.f32 %v1617_v2, %v1603_v12 }
 0x9f0   : > { %4006 = vrcp.f32 %v1573_v10 }
 0x9f1   : > { %v3997_v21 = vpop.eup %3996  ;;  %v1619_v1 = vadd.f32 %v1618_v8, %v1604_v4 }
 0x9f2   : > { %v3999_v14 = vpop.eup %3998  ;;  %v1579_v59 = vpop.xlane.xlu1 %1578  ;;  %v1607_v20 = vmul.f32 %v3997_v21, %v5276_v41 }
 0x9f3   : > { %v1577_v27 = vpop.xlane.xlu0 %1576  ;;  %v1606_v13 = vmul.f32 %v3999_v14, %v5278_v40  ;;  %4008 = vrcp.f32 %v1579_v59  ;;  %v1620_v28 = vadd.f32 %v1619_v1, %v1605_v61 }
 0x9f4   : > { %4010 = vrcp.f32 %v1577_v27 }
 0x9f5   : > { %v4001_v22 = vpop.eup %4000  ;;  %v1621_v9 = vadd.f32 %v1620_v28, %v1606_v13 }
 0x9f6   : > { %v4003_v34 = vpop.eup %4002  ;;  %v1583_v19 = vpop.xlane.xlu1 %1582  ;;  %v1609_v29 = vmul.f32 %v4001_v22, %v5282_v31 }
 0x9f7   : > { %v1581_v16 = vpop.xlane.xlu0 %1580  ;;  %v1608_v25 = vmul.f32 %v4003_v34, %v5284_v48  ;;  %4012 = vrcp.f32 %v1583_v19  ;;  %v1622_v33 = vadd.f32 %v1621_v9, %v1607_v20 }
 0x9f8   : > { %4014 = vrcp.f32 %v1581_v16 }
 0x9f9   : > { %v4005_v24 = vpop.eup %4004  ;;  %v1623_v15 = vadd.f32 %v1622_v33, %v1608_v25 }
 0x9fa   : > { %v4007_v32 = vpop.eup %4006  ;;  %v1611_v18 = vmul.f32 %v4005_v24, %v5288_v51 }
 0x9fb   : > { %v1610_v26 = vmul.f32 %v4007_v32, %v5290_v43  ;;  %v1624_v30 = vadd.f32 %v1623_v15, %v1609_v29 }
 0x9fd   : > { %v4009_v47 = vpop.eup %4008  ;;  %v1625_v23 = vadd.f32 %v1624_v30, %v1610_v26 }
 0x9fe   : > { %v4011_v42 = vpop.eup %4010  ;;  %v1613_v40 = vmul.f32 %v4009_v47, %v5294_v45 }
 0x9ff   : > { %v1612_v17 = vmul.f32 %v4011_v42, %v5296_v54  ;;  %v1626_v39 = vadd.f32 %v1625_v23, %v1611_v18 }
 0xa01   : > { %v4013_v41 = vpop.eup %4012  ;;  %v1627_v48 = vadd.f32 %v1626_v39, %v1612_v17 }
 0xa02   : > { %v4015_v36 = vpop.eup %4014  ;;  %v1615_v46 = vmul.f32 %v4013_v41, %v5300_v44 }
 0xa03   : > { %v1614_v31 = vmul.f32 %v4015_v36, %v5302_v37  ;;  %v1628_v55 = vadd.f32 %v1627_v48, %v1613_v40 }
 0xa05   : > { %v1629_v43 = vadd.f32 %v1628_v55, %v1614_v31 }
 0xa07   : > { %v1630_v50 = vadd.f32 %v1629_v43, %v1615_v46 }
 0xa09   : > { %v1631_v63 = vrot.slane %v1630_v50, 4 }
 0xa0b   : > { %v1632_v49 = vadd.f32 %v1631_v63, %v1630_v50 }
 0xa0d   : > { %v1633_v51 = vrot.slane %v1632_v49, 2 }
 0xa0f   : > { %v1634_v35 = vadd.f32 %v1633_v51, %v1632_v49 }
 0xa11   : > { %v1635_v53 = vrot.slane %v1634_v35, 1 }
 0xa13   : > { %v1636_v38 = vadd.f32 %v1635_v53, %v1634_v35 }
 0xa15   : > { %4016 = vrcp.f32 %v1636_v38 }
 0xa1f   : > { %v4017_v54 = vpop.eup %4016 }
 0xa20   : > { %v1639_v5 = vmul.f32 %v4017_v54, %v5308_v6  ;;  %v1638_v45 = vmul.f32 %v4017_v54, %v5306_v56  ;;  %v1641_v37 = vmul.f32 %v4017_v54, %v1603_v12  ;;  %v1640_v0 = vmul.f32 %v4017_v54, %v5310_v60 }
 0xa21   : > { %v5329_v44 = vmul.f32 %v4017_v54, %v1605_v61  ;;  %v1642_v62 = vmul.f32 %v4017_v54, %v1604_v4  ;;  %v5332_v52 = vmul.f32 %v4017_v54, %v1607_v20  ;;  %v5334_v11 = vmul.f32 %v4017_v54, %v1606_v13 }
 0xa22   : > { %1656 = vadd.xlane.f32.xlu1 %v1639_v5  ;;  %1654 = vadd.xlane.f32.xlu0 %v1638_v45  ;;  %v5338_v56 = vmul.f32 %v4017_v54, %v1609_v29  ;;  %v5340_v6 = vmul.f32 %v4017_v54, %v1608_v25  ;;  %v5344_v60 = vmul.f32 %v4017_v54, %v1611_v18 }
 0xa23   : > { %v5346_v58 = vmul.f32 %v4017_v54, %v1610_v26  ;;  %v5350_v3 = vmul.f32 %v4017_v54, %v1613_v40  ;;  %v5352_v12 = vmul.f32 %v4017_v54, %v1612_v17  ;;  %v5356_v2 = vmul.f32 %v4017_v54, %v1615_v46 }
 0xa24   : > { %v5358_v7 = vmul.f32 %v4017_v54, %v1614_v31 }
 0xa26   : > { %1660 = vadd.xlane.f32.xlu1 %v1641_v37  ;;  %1658 = vadd.xlane.f32.xlu0 %v1640_v0 }
 0xa2a   : > { %1664 = vadd.xlane.f32.xlu1 %v5329_v44  ;;  %1662 = vadd.xlane.f32.xlu0 %v1642_v62 }
 0xa2e   : > { %1668 = vadd.xlane.f32.xlu1 %v5332_v52  ;;  %1666 = vadd.xlane.f32.xlu0 %v5334_v11 }
 0xa32   : > { %1672 = vadd.xlane.f32.xlu1 %v5338_v56  ;;  %1670 = vadd.xlane.f32.xlu0 %v5340_v6 }
 0xa36   : > { %1676 = vadd.xlane.f32.xlu1 %v5344_v60  ;;  %1674 = vadd.xlane.f32.xlu0 %v5346_v58 }
 0xa3a   : > { %1680 = vadd.xlane.f32.xlu1 %v5350_v3  ;;  %1678 = vadd.xlane.f32.xlu0 %v5352_v12 }
 0xa3e   : > { %1684 = vadd.xlane.f32.xlu1 %v5356_v2  ;;  %1682 = vadd.xlane.f32.xlu0 %v5358_v7 }
 0xaaf   : > { %v1657_v57 = vpop.xlane.xlu1 %1656  ;;  %v1655_v10 = vpop.xlane.xlu0 %1654 }
 0xab0   : > { %4018 = vrcp.f32 %v1657_v57 }
 0xab1   : > { %4020 = vrcp.f32 %v1655_v10 }
 0xab3   : > { %v1661_v4 = vpop.xlane.xlu1 %1660  ;;  %v1659_v8 = vpop.xlane.xlu0 %1658 }
 0xab4   : > { %4022 = vrcp.f32 %v1661_v4 }
 0xab5   : > { %4024 = vrcp.f32 %v1659_v8 }
 0xab7   : > { %v1665_v21 = vpop.xlane.xlu1 %1664  ;;  %v1663_v61 = vpop.xlane.xlu0 %1662 }
 0xab8   : > { %4026 = vrcp.f32 %v1665_v21 }
 0xab9   : > { %4028 = vrcp.f32 %v1663_v61 }
 0xaba   : > { %v4019_v1 = vpop.eup %4018 }
 0xabb   : > { %v4021_v14 = vpop.eup %4020  ;;  %v1669_v59 = vpop.xlane.xlu1 %1668  ;;  %v5364_v28 = vmul.f32 %v4019_v1, %v1639_v5 }
 0xabc   : > { %v1667_v27 = vpop.xlane.xlu0 %1666  ;;  %4030 = vrcp.f32 %v1669_v59  ;;  %v5362_v13 = vmul.f32 %v4021_v14, %v1638_v45 }
 0xabd   : > { %4032 = vrcp.f32 %v1667_v27 }
 0xabe   : > { %v4023_v22 = vpop.eup %4022  ;;  %v1718_v16 = vadd.f32 %v5364_v28, %v5362_v13 }
 0xabf   : > { %v4025_v20 = vpop.eup %4024  ;;  %v1673_v9 = vpop.xlane.xlu1 %1672  ;;  %v1705_v33 = vmul.f32 %v4023_v22, %v1641_v37 }
 0xac0   : > { %v1671_v34 = vpop.xlane.xlu0 %1670  ;;  %4034 = vrcp.f32 %v1673_v9  ;;  %v5366_v19 = vmul.f32 %v4025_v20, %v1640_v0 }
 0xac1   : > { %4036 = vrcp.f32 %v1671_v34 }
 0xac2   : > { %v4027_v25 = vpop.eup %4026  ;;  %v1719_v24 = vadd.f32 %v1718_v16, %v5366_v19 }
 0xac3   : > { %v4029_v29 = vpop.eup %4028  ;;  %v1677_v15 = vpop.xlane.xlu1 %1676  ;;  %v1707_v18 = vmul.f32 %v4027_v25, %v5329_v44 }
 0xac4   : > { %v1675_v32 = vpop.xlane.xlu0 %1674  ;;  %v1706_v26 = vmul.f32 %v4029_v29, %v1642_v62  ;;  %4038 = vrcp.f32 %v1677_v15  ;;  %v1720_v30 = vadd.f32 %v1719_v24, %v1705_v33 }
 0xac5   : > { %4040 = vrcp.f32 %v1675_v32 }
 0xac6   : > { %v4031_v47 = vpop.eup %4030  ;;  %v1721_v23 = vadd.f32 %v1720_v30, %v1706_v26 }
 0xac7   : > { %v4033_v42 = vpop.eup %4032  ;;  %v1681_v17 = vpop.xlane.xlu1 %1680  ;;  %v1709_v36 = vmul.f32 %v4031_v47, %v5332_v52 }
 0xac8   : > { %v1679_v39 = vpop.xlane.xlu0 %1678  ;;  %v1708_v41 = vmul.f32 %v4033_v42, %v5334_v11  ;;  %4042 = vrcp.f32 %v1681_v17  ;;  %v1722_v40 = vadd.f32 %v1721_v23, %v1707_v18 }
 0xac9   : > { %4044 = vrcp.f32 %v1679_v39 }
 0xaca   : > { %v4035_v48 = vpop.eup %4034  ;;  %v1723_v31 = vadd.f32 %v1722_v40, %v1708_v41 }
 0xacb   : > { %v4037_v55 = vpop.eup %4036  ;;  %v1685_v46 = vpop.xlane.xlu1 %1684  ;;  %v1711_v51 = vmul.f32 %v4035_v48, %v5338_v56 }
 0xacc   : > { %v1683_v43 = vpop.xlane.xlu0 %1682  ;;  %v1710_v50 = vmul.f32 %v4037_v55, %v5340_v6  ;;  %4046 = vrcp.f32 %v1685_v46  ;;  %v1724_v63 = vadd.f32 %v1723_v31, %v1709_v36 }
 0xacd   : > { %4048 = vrcp.f32 %v1683_v43 }
 0xace   : > { %v4039_v49 = vpop.eup %4038  ;;  %v1725_v35 = vadd.f32 %v1724_v63, %v1710_v50 }
 0xacf   : > { %v4041_v53 = vpop.eup %4040  ;;  %v1713_v45 = vmul.f32 %v4039_v49, %v5344_v60 }
 0xad0   : > { %v1712_v38 = vmul.f32 %v4041_v53, %v5346_v58  ;;  %v1726_v54 = vadd.f32 %v1725_v35, %v1711_v51 }
 0xad2   : > { %v4043_v5 = vpop.eup %4042  ;;  %v1727_v37 = vadd.f32 %v1726_v54, %v1712_v38 }
 0xad3   : > { %v4045_v0 = vpop.eup %4044  ;;  %v1715_v11 = vmul.f32 %v4043_v5, %v5350_v3 }
 0xad4   : > { %v1714_v44 = vmul.f32 %v4045_v0, %v5352_v12  ;;  %v1728_v62 = vadd.f32 %v1727_v37, %v1713_v45 }
 0xad6   : > { %v4047_v52 = vpop.eup %4046  ;;  %v1729_v6 = vadd.f32 %v1728_v62, %v1714_v44 }
 0xad7   : > { %v4049_v57 = vpop.eup %4048  ;;  %v1717_v4 = vmul.f32 %v4047_v52, %v5356_v2 }
 0xad8   : > { %v1716_v56 = vmul.f32 %v4049_v57, %v5358_v7  ;;  %v1730_v10 = vadd.f32 %v1729_v6, %v1715_v11 }
 0xada   : > { %v1731_v58 = vadd.f32 %v1730_v10, %v1716_v56 }
 0xadc   : > { %v1732_v8 = vadd.f32 %v1731_v58, %v1717_v4 }
 0xade   : > { %v1733_v21 = vrot.slane %v1732_v8, 4 }
 0xae0   : > { %v1734_v61 = vadd.f32 %v1733_v21, %v1732_v8 }
 0xae2   : > { %v1735_v60 = vrot.slane %v1734_v61, 2 }
 0xae4   : > { %v1736_v1 = vadd.f32 %v1735_v60, %v1734_v61 }
 0xae6   : > { %v1737_v14 = vrot.slane %v1736_v1, 1 }
 0xae8   : > { %v1738_v59 = vadd.f32 %v1737_v14, %v1736_v1 }
 0xaea   : > { %4050 = vrcp.f32 %v1738_v59 }
 0xaf4   : > { %v4051_v12 = vpop.eup %4050 }
 0xaf5   : > { %v1741_v27 = vmul.f32 %v4051_v12, %v5364_v28  ;;  %v1740_v3 = vmul.f32 %v4051_v12, %v5362_v13  ;;  %v1743_v7 = vmul.f32 %v4051_v12, %v1705_v33  ;;  %v1742_v22 = vmul.f32 %v4051_v12, %v5366_v19 }
 0xaf6   : > { %v5385_v2 = vmul.f32 %v4051_v12, %v1707_v18  ;;  %v1744_v20 = vmul.f32 %v4051_v12, %v1706_v26  ;;  %v5388_v9 = vmul.f32 %v4051_v12, %v1709_v36  ;;  %v5390_v34 = vmul.f32 %v4051_v12, %v1708_v41 }
 0xaf7   : > { %1758 = vadd.xlane.f32.xlu1 %v1741_v27  ;;  %1756 = vadd.xlane.f32.xlu0 %v1740_v3  ;;  %v5394_v13 = vmul.f32 %v4051_v12, %v1711_v51  ;;  %v5396_v28 = vmul.f32 %v4051_v12, %v1710_v50  ;;  %v5400_v19 = vmul.f32 %v4051_v12, %v1713_v45 }
 0xaf8   : > { %v5402_v16 = vmul.f32 %v4051_v12, %v1712_v38  ;;  %v5406_v25 = vmul.f32 %v4051_v12, %v1715_v11  ;;  %v5408_v33 = vmul.f32 %v4051_v12, %v1714_v44  ;;  %v5412_v24 = vmul.f32 %v4051_v12, %v1717_v4 }
 0xaf9   : > { %v5414_v29 = vmul.f32 %v4051_v12, %v1716_v56 }
 0xafb   : > { %1762 = vadd.xlane.f32.xlu1 %v1743_v7  ;;  %1760 = vadd.xlane.f32.xlu0 %v1742_v22 }
 0xaff   : > { %1766 = vadd.xlane.f32.xlu1 %v5385_v2  ;;  %1764 = vadd.xlane.f32.xlu0 %v1744_v20 }
 0xb03   : > { %1770 = vadd.xlane.f32.xlu1 %v5388_v9  ;;  %1768 = vadd.xlane.f32.xlu0 %v5390_v34 }
 0xb07   : > { %1774 = vadd.xlane.f32.xlu1 %v5394_v13  ;;  %1772 = vadd.xlane.f32.xlu0 %v5396_v28 }
 0xb0b   : > { %1778 = vadd.xlane.f32.xlu1 %v5400_v19  ;;  %1776 = vadd.xlane.f32.xlu0 %v5402_v16 }
 0xb0f   : > { %1782 = vadd.xlane.f32.xlu1 %v5406_v25  ;;  %1780 = vadd.xlane.f32.xlu0 %v5408_v33 }
 0xb13   : > { %1786 = vadd.xlane.f32.xlu1 %v5412_v24  ;;  %1784 = vadd.xlane.f32.xlu0 %v5414_v29 }
 0xb84   : > { %v1759_v15 = vpop.xlane.xlu1 %1758  ;;  %v1757_v32 = vpop.xlane.xlu0 %1756 }
 0xb85   : > { %4052 = vrcp.f32 %v1759_v15 }
 0xb86   : > { %4054 = vrcp.f32 %v1757_v32 }
 0xb88   : > { %v1763_v26 = vpop.xlane.xlu1 %1762  ;;  %v1761_v30 = vpop.xlane.xlu0 %1760 }
 0xb89   : > { %4056 = vrcp.f32 %v1763_v26 }
 0xb8a   : > { %4058 = vrcp.f32 %v1761_v30 }
 0xb8c   : > { %v1767_v47 = vpop.xlane.xlu1 %1766  ;;  %v1765_v18 = vpop.xlane.xlu0 %1764 }
 0xb8d   : > { %4060 = vrcp.f32 %v1767_v47 }
 0xb8e   : > { %4062 = vrcp.f32 %v1765_v18 }
 0xb8f   : > { %v4053_v23 = vpop.eup %4052 }
 0xb90   : > { %v4055_v42 = vpop.eup %4054  ;;  %v1771_v17 = vpop.xlane.xlu1 %1770  ;;  %v5420_v40 = vmul.f32 %v4053_v23, %v1741_v27 }
 0xb91   : > { %v1769_v39 = vpop.xlane.xlu0 %1768  ;;  %4064 = vrcp.f32 %v1771_v17  ;;  %v5418_v41 = vmul.f32 %v4055_v42, %v1740_v3 }
 0xb92   : > { %4066 = vrcp.f32 %v1769_v39 }
 0xb93   : > { %v4057_v48 = vpop.eup %4056  ;;  %v1820_v43 = vadd.f32 %v5420_v40, %v5418_v41 }
 0xb94   : > { %v4059_v36 = vpop.eup %4058  ;;  %v1775_v31 = vpop.xlane.xlu1 %1774  ;;  %v1807_v63 = vmul.f32 %v4057_v48, %v1743_v7 }
 0xb95   : > { %v1773_v55 = vpop.xlane.xlu0 %1772  ;;  %4068 = vrcp.f32 %v1775_v31  ;;  %v5422_v46 = vmul.f32 %v4059_v36, %v1742_v22 }
 0xb96   : > { %4070 = vrcp.f32 %v1773_v55 }
 0xb97   : > { %v4061_v50 = vpop.eup %4060  ;;  %v1821_v49 = vadd.f32 %v1820_v43, %v5422_v46 }
 0xb98   : > { %v4063_v51 = vpop.eup %4062  ;;  %v1779_v35 = vpop.xlane.xlu1 %1778  ;;  %v1809_v45 = vmul.f32 %v4061_v50, %v5385_v2 }
 0xb99   : > { %v1777_v53 = vpop.xlane.xlu0 %1776  ;;  %v1808_v38 = vmul.f32 %v4063_v51, %v1744_v20  ;;  %4072 = vrcp.f32 %v1779_v35  ;;  %v1822_v54 = vadd.f32 %v1821_v49, %v1807_v63 }
 0xb9a   : > { %4074 = vrcp.f32 %v1777_v53 }
 0xb9b   : > { %v4065_v5 = vpop.eup %4064  ;;  %v1823_v37 = vadd.f32 %v1822_v54, %v1808_v38 }
 0xb9c   : > { %v4067_v0 = vpop.eup %4066  ;;  %v1783_v44 = vpop.xlane.xlu1 %1782  ;;  %v1811_v57 = vmul.f32 %v4065_v5, %v5388_v9 }
 0xb9d   : > { %v1781_v62 = vpop.xlane.xlu0 %1780  ;;  %v1810_v52 = vmul.f32 %v4067_v0, %v5390_v34  ;;  %4076 = vrcp.f32 %v1783_v44  ;;  %v1824_v11 = vadd.f32 %v1823_v37, %v1809_v45 }
 0xb9e   : > { %4078 = vrcp.f32 %v1781_v62 }
 0xb9f   : > { %v4069_v6 = vpop.eup %4068  ;;  %v1825_v56 = vadd.f32 %v1824_v11, %v1810_v52 }
 0xba0   : > { %v4071_v10 = vpop.eup %4070  ;;  %v1787_v4 = vpop.xlane.xlu1 %1786  ;;  %v1813_v60 = vmul.f32 %v4069_v6, %v5394_v13 }
 0xba1   : > { %v1785_v58 = vpop.xlane.xlu0 %1784  ;;  %v1812_v8 = vmul.f32 %v4071_v10, %v5396_v28  ;;  %4080 = vrcp.f32 %v1787_v4  ;;  %v1826_v21 = vadd.f32 %v1825_v56, %v1811_v57 }
 0xba2   : > { %4082 = vrcp.f32 %v1785_v58 }
 0xba3   : > { %v4073_v61 = vpop.eup %4072  ;;  %v1827_v1 = vadd.f32 %v1826_v21, %v1812_v8 }
 0xba4   : > { %v4075_v14 = vpop.eup %4074  ;;  %v1815_v3 = vmul.f32 %v4073_v61, %v5400_v19 }
 0xba5   : > { %v1814_v59 = vmul.f32 %v4075_v14, %v5402_v16  ;;  %v1828_v12 = vadd.f32 %v1827_v1, %v1813_v60 }
 0xba7   : > { %v4077_v27 = vpop.eup %4076  ;;  %v1829_v7 = vadd.f32 %v1828_v12, %v1814_v59 }
 0xba8   : > { %v4079_v22 = vpop.eup %4078  ;;  %v1817_v34 = vmul.f32 %v4077_v27, %v5406_v25 }
 0xba9   : > { %v1816_v2 = vmul.f32 %v4079_v22, %v5408_v33  ;;  %v1830_v20 = vadd.f32 %v1829_v7, %v1815_v3 }
 0xbab   : > { %v4081_v9 = vpop.eup %4080  ;;  %v1831_v28 = vadd.f32 %v1830_v20, %v1816_v2 }
 0xbac   : > { %v4083_v15 = vpop.eup %4082  ;;  %v1819_v26 = vmul.f32 %v4081_v9, %v5412_v24 }
 0xbad   : > { %v1818_v13 = vmul.f32 %v4083_v15, %v5414_v29  ;;  %v1832_v32 = vadd.f32 %v1831_v28, %v1817_v34 }
 0xbaf   : > { %v1833_v16 = vadd.f32 %v1832_v32, %v1818_v13 }
 0xbb1   : > { %v1834_v30 = vadd.f32 %v1833_v16, %v1819_v26 }
 0xbb3   : > { %v1835_v47 = vrot.slane %v1834_v30, 4 }
 0xbb5   : > { %v1836_v18 = vadd.f32 %v1835_v47, %v1834_v30 }
 0xbb7   : > { %v1837_v19 = vrot.slane %v1836_v18, 2 }
 0xbb9   : > { %v1838_v23 = vadd.f32 %v1837_v19, %v1836_v18 }
 0xbbb   : > { %v1839_v42 = vrot.slane %v1838_v23, 1 }
 0xbbd   : > { %v1840_v17 = vadd.f32 %v1839_v42, %v1838_v23 }
 0xbbf   : > { %4084 = vrcp.f32 %v1840_v17 }
 0xbc9   : > { %v4085_v33 = vpop.eup %4084 }
 0xbca   : > { %v1843_v39 = vmul.f32 %v4085_v33, %v5420_v40  ;;  %v1842_v25 = vmul.f32 %v4085_v33, %v5418_v41  ;;  %v1845_v29 = vmul.f32 %v4085_v33, %v1807_v63  ;;  %v1844_v48 = vmul.f32 %v4085_v33, %v5422_v46 }
 0xbcb   : > { %v5441_v24 = vmul.f32 %v4085_v33, %v1809_v45  ;;  %v1846_v36 = vmul.f32 %v4085_v33, %v1808_v38  ;;  %v5444_v31 = vmul.f32 %v4085_v33, %v1811_v57  ;;  %v5446_v55 = vmul.f32 %v4085_v33, %v1810_v52 }
 0xbcc   : > { %1860 = vadd.xlane.f32.xlu1 %v1843_v39  ;;  %1858 = vadd.xlane.f32.xlu0 %v1842_v25  ;;  %v5450_v41 = vmul.f32 %v4085_v33, %v1813_v60  ;;  %v5452_v40 = vmul.f32 %v4085_v33, %v1812_v8  ;;  %v5456_v46 = vmul.f32 %v4085_v33, %v1815_v3 }
 0xbcd   : > { %v5458_v43 = vmul.f32 %v4085_v33, %v1814_v59  ;;  %v5462_v50 = vmul.f32 %v4085_v33, %v1817_v34  ;;  %v5464_v63 = vmul.f32 %v4085_v33, %v1816_v2  ;;  %v5468_v49 = vmul.f32 %v4085_v33, %v1819_v26 }
 0xbce   : > { %v5470_v51 = vmul.f32 %v4085_v33, %v1818_v13 }
 0xbd0   : > { %1864 = vadd.xlane.f32.xlu1 %v1845_v29  ;;  %1862 = vadd.xlane.f32.xlu0 %v1844_v48 }
 0xbd4   : > { %1868 = vadd.xlane.f32.xlu1 %v5441_v24  ;;  %1866 = vadd.xlane.f32.xlu0 %v1846_v36 }
 0xbd8   : > { %1872 = vadd.xlane.f32.xlu1 %v5444_v31  ;;  %1870 = vadd.xlane.f32.xlu0 %v5446_v55 }
 0xbdc   : > { %1876 = vadd.xlane.f32.xlu1 %v5450_v41  ;;  %1874 = vadd.xlane.f32.xlu0 %v5452_v40 }
 0xbe0   : > { %1880 = vadd.xlane.f32.xlu1 %v5456_v46  ;;  %1878 = vadd.xlane.f32.xlu0 %v5458_v43 }
 0xbe4   : > { %1884 = vadd.xlane.f32.xlu1 %v5462_v50  ;;  %1882 = vadd.xlane.f32.xlu0 %v5464_v63 }
 0xbe8   : > { %1888 = vadd.xlane.f32.xlu1 %v5468_v49  ;;  %1886 = vadd.xlane.f32.xlu0 %v5470_v51 }
 0xc59   : > { %v1861_v35 = vpop.xlane.xlu1 %1860  ;;  %v1859_v53 = vpop.xlane.xlu0 %1858 }
 0xc5a   : > { %4086 = vrcp.f32 %v1861_v35 }
 0xc5b   : > { %4088 = vrcp.f32 %v1859_v53 }
 0xc5d   : > { %v1865_v38 = vpop.xlane.xlu1 %1864  ;;  %v1863_v54 = vpop.xlane.xlu0 %1862 }
 0xc5e   : > { %4090 = vrcp.f32 %v1865_v38 }
 0xc5f   : > { %4092 = vrcp.f32 %v1863_v54 }
 0xc61   : > { %v1869_v5 = vpop.xlane.xlu1 %1868  ;;  %v1867_v45 = vpop.xlane.xlu0 %1866 }
 0xc62   : > { %4094 = vrcp.f32 %v1869_v5 }
 0xc63   : > { %4096 = vrcp.f32 %v1867_v45 }
 0xc64   : > { %v4087_v37 = vpop.eup %4086 }
 0xc65   : > { %v4089_v0 = vpop.eup %4088  ;;  %v1873_v44 = vpop.xlane.xlu1 %1872  ;;  %v5476_v11 = vmul.f32 %v4087_v37, %v1843_v39 }
 0xc66   : > { %v1871_v62 = vpop.xlane.xlu0 %1870  ;;  %4098 = vrcp.f32 %v1873_v44  ;;  %v5474_v52 = vmul.f32 %v4089_v0, %v1842_v25 }
 0xc67   : > { %4100 = vrcp.f32 %v1871_v62 }
 0xc68   : > { %v4091_v6 = vpop.eup %4090  ;;  %v1922_v58 = vadd.f32 %v5476_v11, %v5474_v52 }
 0xc69   : > { %v4093_v57 = vpop.eup %4092  ;;  %v1877_v56 = vpop.xlane.xlu1 %1876  ;;  %v1909_v21 = vmul.f32 %v4091_v6, %v1845_v29 }
 0xc6a   : > { %v1875_v10 = vpop.xlane.xlu0 %1874  ;;  %4102 = vrcp.f32 %v1877_v56  ;;  %v5478_v4 = vmul.f32 %v4093_v57, %v1844_v48 }
 0xc6b   : > { %4104 = vrcp.f32 %v1875_v10 }
 0xc6c   : > { %v4095_v8 = vpop.eup %4094  ;;  %v1923_v61 = vadd.f32 %v1922_v58, %v5478_v4 }
 0xc6d   : > { %v4097_v60 = vpop.eup %4096  ;;  %v1881_v1 = vpop.xlane.xlu1 %1880  ;;  %v1911_v3 = vmul.f32 %v4095_v8, %v5441_v24 }
 0xc6e   : > { %v1879_v14 = vpop.xlane.xlu0 %1878  ;;  %v1910_v59 = vmul.f32 %v4097_v60, %v1846_v36  ;;  %4106 = vrcp.f32 %v1881_v1  ;;  %v1924_v12 = vadd.f32 %v1923_v61, %v1909_v21 }
 0xc6f   : > { %4108 = vrcp.f32 %v1879_v14 }
 0xc70   : > { %v4099_v27 = vpop.eup %4098  ;;  %v1925_v7 = vadd.f32 %v1924_v12, %v1910_v59 }
 0xc71   : > { %v4101_v22 = vpop.eup %4100  ;;  %v1885_v2 = vpop.xlane.xlu1 %1884  ;;  %v1913_v15 = vmul.f32 %v4099_v27, %v5444_v31 }
 0xc72   : > { %v1883_v20 = vpop.xlane.xlu0 %1882  ;;  %v1912_v9 = vmul.f32 %v4101_v22, %v5446_v55  ;;  %4110 = vrcp.f32 %v1885_v2  ;;  %v1926_v34 = vadd.f32 %v1925_v7, %v1911_v3 }
 0xc73   : > { %4112 = vrcp.f32 %v1883_v20 }
 0xc74   : > { %v4103_v28 = vpop.eup %4102  ;;  %v1927_v13 = vadd.f32 %v1926_v34, %v1912_v9 }
 0xc75   : > { %v4105_v32 = vpop.eup %4104  ;;  %v1889_v26 = vpop.xlane.xlu1 %1888  ;;  %v1915_v19 = vmul.f32 %v4103_v28, %v5450_v41 }
 0xc76   : > { %v1887_v16 = vpop.xlane.xlu0 %1886  ;;  %v1914_v30 = vmul.f32 %v4105_v32, %v5452_v40  ;;  %4114 = vrcp.f32 %v1889_v26  ;;  %v1928_v47 = vadd.f32 %v1927_v13, %v1913_v15 }
 0xc77   : > { %4116 = vrcp.f32 %v1887_v16 }
 0xc78   : > { %v4107_v18 = vpop.eup %4106  ;;  %v1929_v23 = vadd.f32 %v1928_v47, %v1914_v30 }
 0xc79   : > { %v4109_v42 = vpop.eup %4108  ;;  %v1917_v25 = vmul.f32 %v4107_v18, %v5456_v46 }
 0xc7a   : > { %v1916_v17 = vmul.f32 %v4109_v42, %v5458_v43  ;;  %v1930_v33 = vadd.f32 %v1929_v23, %v1915_v19 }
 0xc7c   : > { %v4111_v39 = vpop.eup %4110  ;;  %v1931_v29 = vadd.f32 %v1930_v33, %v1916_v17 }
 0xc7d   : > { %v4113_v48 = vpop.eup %4112  ;;  %v1919_v55 = vmul.f32 %v4111_v39, %v5462_v50 }
 0xc7e   : > { %v1918_v24 = vmul.f32 %v4113_v48, %v5464_v63  ;;  %v1932_v36 = vadd.f32 %v1931_v29, %v1917_v25 }
 0xc80   : > { %v4115_v31 = vpop.eup %4114  ;;  %v1933_v40 = vadd.f32 %v1932_v36, %v1918_v24 }
 0xc81   : > { %v4117_v35 = vpop.eup %4116  ;;  %v1921_v38 = vmul.f32 %v4115_v31, %v5468_v49 }
 0xc82   : > { %v1920_v41 = vmul.f32 %v4117_v35, %v5470_v51  ;;  %v1934_v53 = vadd.f32 %v1933_v40, %v1919_v55 }
 0xc84   : > { %v1935_v43 = vadd.f32 %v1934_v53, %v1920_v41 }
 0xc86   : > { %v1936_v54 = vadd.f32 %v1935_v43, %v1921_v38 }
 0xc88   : > { %v1937_v5 = vrot.slane %v1936_v54, 4 }
 0xc8a   : > { %v1938_v45 = vadd.f32 %v1937_v5, %v1936_v54 }
 0xc8c   : > { %v1939_v46 = vrot.slane %v1938_v45, 2 }
 0xc8e   : > { %v1940_v37 = vadd.f32 %v1939_v46, %v1938_v45 }
 0xc90   : > { %v1941_v0 = vrot.slane %v1940_v37, 1 }
 0xc92   : > { %v1942_v44 = vadd.f32 %v1941_v0, %v1940_v37 }
 0xc94   : > { %4118 = vrcp.f32 %v1942_v44 }
 0xc9e   : > { %v4119_v63 = vpop.eup %4118 }
 0xc9f   : > { %v1945_v62 = vmul.f32 %v4119_v63, %v5476_v11  ;;  %v1944_v50 = vmul.f32 %v4119_v63, %v5474_v52  ;;  %v1947_v51 = vmul.f32 %v4119_v63, %v1909_v21  ;;  %v1946_v6 = vmul.f32 %v4119_v63, %v5478_v4 }
 0xca0   : > { %v5497_v49 = vmul.f32 %v4119_v63, %v1911_v3  ;;  %v1948_v57 = vmul.f32 %v4119_v63, %v1910_v59  ;;  %v5500_v56 = vmul.f32 %v4119_v63, %v1913_v15  ;;  %v5502_v10 = vmul.f32 %v4119_v63, %v1912_v9 }
 0xca1   : > { %1962 = vadd.xlane.f32.xlu1 %v1945_v62  ;;  %1960 = vadd.xlane.f32.xlu0 %v1944_v50  ;;  %v5506_v52 = vmul.f32 %v4119_v63, %v1915_v19  ;;  %v5508_v11 = vmul.f32 %v4119_v63, %v1914_v30  ;;  %v5512_v4 = vmul.f32 %v4119_v63, %v1917_v25 }
 0xca2   : > { %v5514_v58 = vmul.f32 %v4119_v63, %v1916_v17  ;;  %v5518_v8 = vmul.f32 %v4119_v63, %v1919_v55  ;;  %v5520_v21 = vmul.f32 %v4119_v63, %v1918_v24  ;;  %v5524_v61 = vmul.f32 %v4119_v63, %v1921_v38 }
 0xca3   : > { %v5526_v60 = vmul.f32 %v4119_v63, %v1920_v41 }
 0xca5   : > { %1966 = vadd.xlane.f32.xlu1 %v1947_v51  ;;  %1964 = vadd.xlane.f32.xlu0 %v1946_v6 }
 0xca9   : > { %1970 = vadd.xlane.f32.xlu1 %v5497_v49  ;;  %1968 = vadd.xlane.f32.xlu0 %v1948_v57 }
 0xcad   : > { %1974 = vadd.xlane.f32.xlu1 %v5500_v56  ;;  %1972 = vadd.xlane.f32.xlu0 %v5502_v10 }
 0xcb1   : > { %1978 = vadd.xlane.f32.xlu1 %v5506_v52  ;;  %1976 = vadd.xlane.f32.xlu0 %v5508_v11 }
 0xcb5   : > { %1982 = vadd.xlane.f32.xlu1 %v5512_v4  ;;  %1980 = vadd.xlane.f32.xlu0 %v5514_v58 }
 0xcb9   : > { %1986 = vadd.xlane.f32.xlu1 %v5518_v8  ;;  %1984 = vadd.xlane.f32.xlu0 %v5520_v21 }
 0xcbd   : > { %1990 = vadd.xlane.f32.xlu1 %v5524_v61  ;;  %1988 = vadd.xlane.f32.xlu0 %v5526_v60 }
 0xd2e   : > { %v1963_v1 = vpop.xlane.xlu1 %1962  ;;  %v1961_v14 = vpop.xlane.xlu0 %1960 }
 0xd2f   : > { %4120 = vrcp.f32 %v1963_v1 }
 0xd30   : > { %4122 = vrcp.f32 %v1961_v14 }
 0xd32   : > { %v1967_v59 = vpop.xlane.xlu1 %1966  ;;  %v1965_v12 = vpop.xlane.xlu0 %1964 }
 0xd33   : > { %4124 = vrcp.f32 %v1967_v59 }
 0xd34   : > { %4126 = vrcp.f32 %v1965_v12 }
 0xd36   : > { %v1971_v27 = vpop.xlane.xlu1 %1970  ;;  %v1969_v3 = vpop.xlane.xlu0 %1968 }
 0xd37   : > { %4128 = vrcp.f32 %v1971_v27 }
 0xd38   : > { %4130 = vrcp.f32 %v1969_v3 }
 0xd39   : > { %v4121_v7 = vpop.eup %4120 }
 0xd3a   : > { %v4123_v22 = vpop.eup %4122  ;;  %v1975_v2 = vpop.xlane.xlu1 %1974  ;;  %v5532_v34 = vmul.f32 %v4121_v7, %v1945_v62 }
 0xd3b   : > { %v1973_v20 = vpop.xlane.xlu0 %1972  ;;  %4132 = vrcp.f32 %v1975_v2  ;;  %v5530_v9 = vmul.f32 %v4123_v22, %v1944_v50 }
 0xd3c   : > { %4134 = vrcp.f32 %v1973_v20 }
 0xd3d   : > { %v4125_v28 = vpop.eup %4124  ;;  %v2024_v16 = vadd.f32 %v5532_v34, %v5530_v9 }
 0xd3e   : > { %v4127_v15 = vpop.eup %4126  ;;  %v1979_v13 = vpop.xlane.xlu1 %1978  ;;  %v2011_v47 = vmul.f32 %v4125_v28, %v1947_v51 }
 0xd3f   : > { %v1977_v32 = vpop.xlane.xlu0 %1976  ;;  %4136 = vrcp.f32 %v1979_v13  ;;  %v5534_v26 = vmul.f32 %v4127_v15, %v1946_v6 }
 0xd40   : > { %4138 = vrcp.f32 %v1977_v32 }
 0xd41   : > { %v4129_v30 = vpop.eup %4128  ;;  %v2025_v18 = vadd.f32 %v2024_v16, %v5534_v26 }
 0xd42   : > { %v4131_v19 = vpop.eup %4130  ;;  %v1983_v23 = vpop.xlane.xlu1 %1982  ;;  %v2013_v25 = vmul.f32 %v4129_v30, %v5497_v49 }
 0xd43   : > { %v1981_v42 = vpop.xlane.xlu0 %1980  ;;  %v2012_v17 = vmul.f32 %v4131_v19, %v1948_v57  ;;  %4140 = vrcp.f32 %v1983_v23  ;;  %v2026_v33 = vadd.f32 %v2025_v18, %v2011_v47 }
 0xd44   : > { %4142 = vrcp.f32 %v1981_v42 }
 0xd45   : > { %v4133_v39 = vpop.eup %4132  ;;  %v2027_v29 = vadd.f32 %v2026_v33, %v2012_v17 }
 0xd46   : > { %v4135_v48 = vpop.eup %4134  ;;  %v1987_v24 = vpop.xlane.xlu1 %1986  ;;  %v2015_v35 = vmul.f32 %v4133_v39, %v5500_v56 }
 0xd47   : > { %v1985_v36 = vpop.xlane.xlu0 %1984  ;;  %v2014_v31 = vmul.f32 %v4135_v48, %v5502_v10  ;;  %4144 = vrcp.f32 %v1987_v24  ;;  %v2028_v55 = vadd.f32 %v2027_v29, %v2013_v25 }
 0xd48   : > { %4146 = vrcp.f32 %v1985_v36 }
 0xd49   : > { %v4137_v40 = vpop.eup %4136  ;;  %v2029_v41 = vadd.f32 %v2028_v55, %v2014_v31 }
 0xd4a   : > { %v4139_v53 = vpop.eup %4138  ;;  %v1991_v38 = vpop.xlane.xlu1 %1990  ;;  %v2017_v46 = vmul.f32 %v4137_v40, %v5506_v52 }
 0xd4b   : > { %v1989_v43 = vpop.xlane.xlu0 %1988  ;;  %v2016_v54 = vmul.f32 %v4139_v53, %v5508_v11  ;;  %4148 = vrcp.f32 %v1991_v38  ;;  %v2030_v5 = vadd.f32 %v2029_v41, %v2015_v35 }
 0xd4c   : > { %4150 = vrcp.f32 %v1989_v43 }
 0xd4d   : > { %v4141_v45 = vpop.eup %4140  ;;  %v2031_v37 = vadd.f32 %v2030_v5, %v2016_v54 }
 0xd4e   : > { %v4143_v0 = vpop.eup %4142  ;;  %v2019_v50 = vmul.f32 %v4141_v45, %v5512_v4 }
 0xd4f   : > { %v2018_v44 = vmul.f32 %v4143_v0, %v5514_v58  ;;  %v2032_v63 = vadd.f32 %v2031_v37, %v2017_v46 }
 0xd51   : > { %v4145_v62 = vpop.eup %4144  ;;  %v2033_v51 = vadd.f32 %v2032_v63, %v2018_v44 }
 0xd52   : > { %v4147_v6 = vpop.eup %4146  ;;  %v2021_v10 = vmul.f32 %v4145_v62, %v5518_v8 }
 0xd53   : > { %v2020_v49 = vmul.f32 %v4147_v6, %v5520_v21  ;;  %v2034_v57 = vadd.f32 %v2033_v51, %v2019_v50 }
 0xd55   : > { %v4149_v56 = vpop.eup %4148  ;;  %v2035_v11 = vadd.f32 %v2034_v57, %v2020_v49 }
 0xd56   : > { %v4151_v1 = vpop.eup %4150  ;;  %v2023_v59 = vmul.f32 %v4149_v56, %v5524_v61 }
 0xd57   : > { %v2022_v52 = vmul.f32 %v4151_v1, %v5526_v60  ;;  %v2036_v14 = vadd.f32 %v2035_v11, %v2021_v10 }
 0xd59   : > { %v2037_v58 = vadd.f32 %v2036_v14, %v2022_v52 }
 0xd5b   : > { %v2038_v12 = vadd.f32 %v2037_v58, %v2023_v59 }
 0xd5d   : > { %v2039_v27 = vrot.slane %v2038_v12, 4 }
 0xd5f   : > { %v2040_v3 = vadd.f32 %v2039_v27, %v2038_v12 }
 0xd61   : > { %v2041_v4 = vrot.slane %v2040_v3, 2 }
 0xd63   : > { %v2042_v7 = vadd.f32 %v2041_v4, %v2040_v3 }
 0xd65   : > { %v2043_v22 = vrot.slane %v2042_v7, 1 }
 0xd67   : > { %v2044_v2 = vadd.f32 %v2043_v22, %v2042_v7 }
 0xd69   : > { %4152 = vrcp.f32 %v2044_v2 }
 0xd73   : > { %v4153_v21 = vpop.eup %4152 }
 0xd74   : > { %v2047_v20 = vmul.f32 %v4153_v21, %v5532_v34  ;;  %v2046_v8 = vmul.f32 %v4153_v21, %v5530_v9  ;;  %v2049_v60 = vmul.f32 %v4153_v21, %v2011_v47  ;;  %v2048_v28 = vmul.f32 %v4153_v21, %v5534_v26 }
 0xd75   : > { %v5553_v61 = vmul.f32 %v4153_v21, %v2013_v25  ;;  %v2050_v15 = vmul.f32 %v4153_v21, %v2012_v17  ;;  %v5556_v13 = vmul.f32 %v4153_v21, %v2015_v35  ;;  %v5558_v32 = vmul.f32 %v4153_v21, %v2014_v31 }
 0xd76   : > { %2064 = vadd.xlane.f32.xlu1 %v2047_v20  ;;  %2062 = vadd.xlane.f32.xlu0 %v2046_v8  ;;  %v5562_v9 = vmul.f32 %v4153_v21, %v2017_v46  ;;  %v5564_v34 = vmul.f32 %v4153_v21, %v2016_v54  ;;  %v5568_v26 = vmul.f32 %v4153_v21, %v2019_v50 }
 0xd77   : > { %v5570_v16 = vmul.f32 %v4153_v21, %v2018_v44  ;;  %v5574_v30 = vmul.f32 %v4153_v21, %v2021_v10  ;;  %v5576_v47 = vmul.f32 %v4153_v21, %v2020_v49  ;;  %v5580_v18 = vmul.f32 %v4153_v21, %v2023_v59 }
 0xd78   : > { %v5582_v19 = vmul.f32 %v4153_v21, %v2022_v52 }
 0xd7a   : > { %2068 = vadd.xlane.f32.xlu1 %v2049_v60  ;;  %2066 = vadd.xlane.f32.xlu0 %v2048_v28 }
 0xd7e   : > { %2072 = vadd.xlane.f32.xlu1 %v5553_v61  ;;  %2070 = vadd.xlane.f32.xlu0 %v2050_v15 }
 0xd82   : > { %2076 = vadd.xlane.f32.xlu1 %v5556_v13  ;;  %2074 = vadd.xlane.f32.xlu0 %v5558_v32 }
 0xd86   : > { %2080 = vadd.xlane.f32.xlu1 %v5562_v9  ;;  %2078 = vadd.xlane.f32.xlu0 %v5564_v34 }
 0xd8a   : > { %2084 = vadd.xlane.f32.xlu1 %v5568_v26  ;;  %2082 = vadd.xlane.f32.xlu0 %v5570_v16 }
 0xd8e   : > { %2088 = vadd.xlane.f32.xlu1 %v5574_v30  ;;  %2086 = vadd.xlane.f32.xlu0 %v5576_v47 }
 0xd92   : > { %2092 = vadd.xlane.f32.xlu1 %v5580_v18  ;;  %2090 = vadd.xlane.f32.xlu0 %v5582_v19 }
 0xe03   : > { %v2065_v23 = vpop.xlane.xlu1 %2064  ;;  %v2063_v42 = vpop.xlane.xlu0 %2062 }
 0xe04   : > { %4154 = vrcp.f32 %v2065_v23 }
 0xe05   : > { %4156 = vrcp.f32 %v2063_v42 }
 0xe07   : > { %v2069_v17 = vpop.xlane.xlu1 %2068  ;;  %v2067_v33 = vpop.xlane.xlu0 %2066 }
 0xe08   : > { %4158 = vrcp.f32 %v2069_v17 }
 0xe09   : > { %4160 = vrcp.f32 %v2067_v33 }
 0xe0b   : > { %v2073_v39 = vpop.xlane.xlu1 %2072  ;;  %v2071_v25 = vpop.xlane.xlu0 %2070 }
 0xe0c   : > { %4162 = vrcp.f32 %v2073_v39 }
 0xe0d   : > { %4164 = vrcp.f32 %v2071_v25 }
 0xe0e   : > { %v4155_v29 = vpop.eup %4154 }
 0xe0f   : > { %v4157_v48 = vpop.eup %4156  ;;  %v2077_v24 = vpop.xlane.xlu1 %2076  ;;  %v5588_v55 = vmul.f32 %v4155_v29, %v2047_v20 }
 0xe10   : > { %v2075_v36 = vpop.xlane.xlu0 %2074  ;;  %4166 = vrcp.f32 %v2077_v24  ;;  %v5586_v31 = vmul.f32 %v4157_v48, %v2046_v8 }
 0xe11   : > { %4168 = vrcp.f32 %v2075_v36 }
 0xe12   : > { %v4159_v40 = vpop.eup %4158  ;;  %v2126_v43 = vadd.f32 %v5588_v55, %v5586_v31 }
 0xe13   : > { %v4161_v35 = vpop.eup %4160  ;;  %v2081_v41 = vpop.xlane.xlu1 %2080  ;;  %v2113_v5 = vmul.f32 %v4159_v40, %v2049_v60 }
 0xe14   : > { %v2079_v53 = vpop.xlane.xlu0 %2078  ;;  %v5590_v38 = vmul.f32 %v4161_v35, %v2048_v28  ;;  %4170 = vrcp.f32 %v2081_v41 }
 0xe15   : > { %4172 = vrcp.f32 %v2079_v53 }
 0xe16   : > { %v4163_v54 = vpop.eup %4162  ;;  %v2127_v45 = vadd.f32 %v2126_v43, %v5590_v38 }
 0xe17   : > { %v4165_v46 = vpop.eup %4164  ;;  %v2085_v37 = vpop.xlane.xlu1 %2084  ;;  %v2115_v50 = vmul.f32 %v4163_v54, %v5553_v61 }
 0xe18   : > { %v2083_v0 = vpop.xlane.xlu0 %2082  ;;  %v2114_v44 = vmul.f32 %v4165_v46, %v2050_v15  ;;  %4174 = vrcp.f32 %v2085_v37  ;;  %v2128_v63 = vadd.f32 %v2127_v45, %v2113_v5 }
 0xe19   : > { %4176 = vrcp.f32 %v2083_v0 }
 0xe1a   : > { %v4167_v62 = vpop.eup %4166  ;;  %v2129_v51 = vadd.f32 %v2128_v63, %v2114_v44 }
 0xe1b   : > { %v4169_v6 = vpop.eup %4168  ;;  %v2089_v49 = vpop.xlane.xlu1 %2088  ;;  %v2117_v1 = vmul.f32 %v4167_v62, %v5556_v13 }
 0xe1c   : > { %v2087_v57 = vpop.xlane.xlu0 %2086  ;;  %v2116_v56 = vmul.f32 %v4169_v6, %v5558_v32  ;;  %4178 = vrcp.f32 %v2089_v49  ;;  %v2130_v10 = vadd.f32 %v2129_v51, %v2115_v50 }
 0xe1d   : > { %4180 = vrcp.f32 %v2087_v57 }
 0xe1e   : > { %v4171_v11 = vpop.eup %4170  ;;  %v2131_v52 = vadd.f32 %v2130_v10, %v2116_v56 }
 0xe1f   : > { %v4173_v14 = vpop.eup %4172  ;;  %v2093_v59 = vpop.xlane.xlu1 %2092  ;;  %v2119_v4 = vmul.f32 %v4171_v11, %v5562_v9 }
 0xe20   : > { %v2091_v58 = vpop.xlane.xlu0 %2090  ;;  %v2118_v12 = vmul.f32 %v4173_v14, %v5564_v34  ;;  %4182 = vrcp.f32 %v2093_v59  ;;  %v2132_v27 = vadd.f32 %v2131_v52, %v2117_v1 }
 0xe21   : > { %4184 = vrcp.f32 %v2091_v58 }
 0xe22   : > { %v4175_v3 = vpop.eup %4174  ;;  %v2133_v7 = vadd.f32 %v2132_v27, %v2118_v12 }
 0xe23   : > { %v4177_v22 = vpop.eup %4176  ;;  %v2121_v8 = vmul.f32 %v4175_v3, %v5568_v26 }
 0xe24   : > { %v2120_v2 = vmul.f32 %v4177_v22, %v5570_v16  ;;  %v2134_v21 = vadd.f32 %v2133_v7, %v2119_v4 }
 0xe26   : > { %v4179_v20 = vpop.eup %4178  ;;  %v2135_v60 = vadd.f32 %v2134_v21, %v2120_v2 }
 0xe27   : > { %v4181_v28 = vpop.eup %4180  ;;  %v2123_v32 = vmul.f32 %v4179_v20, %v5574_v30 }
 0xe28   : > { %v2122_v61 = vmul.f32 %v4181_v28, %v5576_v47  ;;  %v2136_v15 = vadd.f32 %v2135_v60, %v2121_v8 }
 0xe2a   : > { %v4183_v13 = vpop.eup %4182  ;;  %v2137_v34 = vadd.f32 %v2136_v15, %v2122_v61 }
 0xe2b   : > { %v4185_v23 = vpop.eup %4184  ;;  %v2125_v17 = vmul.f32 %v4183_v13, %v5580_v18 }
 0xe2c   : > { %v2124_v9 = vmul.f32 %v4185_v23, %v5582_v19  ;;  %v2138_v42 = vadd.f32 %v2137_v34, %v2123_v32 }
 0xe2e   : > { %v2139_v16 = vadd.f32 %v2138_v42, %v2124_v9 }
 0xe30   : > { %v2140_v33 = vadd.f32 %v2139_v16, %v2125_v17 }
 0xe32   : > { %v2141_v39 = vrot.slane %v2140_v33, 4 }
 0xe34   : > { %v2142_v25 = vadd.f32 %v2141_v39, %v2140_v33 }
 0xe36   : > { %v2143_v26 = vrot.slane %v2142_v25, 2 }
 0xe38   : > { %v2144_v29 = vadd.f32 %v2143_v26, %v2142_v25 }
 0xe3a   : > { %v2145_v48 = vrot.slane %v2144_v29, 1 }
 0xe3c   : > { %v2146_v24 = vadd.f32 %v2145_v48, %v2144_v29 }
 0xe3e   : > { %4186 = vrcp.f32 %v2146_v24 }
 0xe48   : > { %v4187_v47 = vpop.eup %4186 }
 0xe49   : > { %v2149_v36 = vmul.f32 %v4187_v47, %v5588_v55  ;;  %v2148_v30 = vmul.f32 %v4187_v47, %v5586_v31  ;;  %v2151_v19 = vmul.f32 %v4187_v47, %v2113_v5  ;;  %v2150_v40 = vmul.f32 %v4187_v47, %v5590_v38 }
 0xe4a   : > { %v5609_v18 = vmul.f32 %v4187_v47, %v2115_v50  ;;  %v2152_v35 = vmul.f32 %v4187_v47, %v2114_v44  ;;  %v5612_v41 = vmul.f32 %v4187_v47, %v2117_v1  ;;  %v5614_v53 = vmul.f32 %v4187_v47, %v2116_v56 }
 0xe4b   : > { %2166 = vadd.xlane.f32.xlu1 %v2149_v36  ;;  %2164 = vadd.xlane.f32.xlu0 %v2148_v30  ;;  %v5618_v31 = vmul.f32 %v4187_v47, %v2119_v4  ;;  %v5620_v55 = vmul.f32 %v4187_v47, %v2118_v12  ;;  %v5624_v38 = vmul.f32 %v4187_v47, %v2121_v8 }
 0xe4c   : > { %v5626_v43 = vmul.f32 %v4187_v47, %v2120_v2  ;;  %v5630_v54 = vmul.f32 %v4187_v47, %v2123_v32  ;;  %v5632_v5 = vmul.f32 %v4187_v47, %v2122_v61  ;;  %v5636_v45 = vmul.f32 %v4187_v47, %v2125_v17 }
 0xe4d   : > { %v5638_v46 = vmul.f32 %v4187_v47, %v2124_v9 }
 0xe4f   : > { %2170 = vadd.xlane.f32.xlu1 %v2151_v19  ;;  %2168 = vadd.xlane.f32.xlu0 %v2150_v40 }
 0xe53   : > { %2174 = vadd.xlane.f32.xlu1 %v5609_v18  ;;  %2172 = vadd.xlane.f32.xlu0 %v2152_v35 }
 0xe57   : > { %2178 = vadd.xlane.f32.xlu1 %v5612_v41  ;;  %2176 = vadd.xlane.f32.xlu0 %v5614_v53 }
 0xe5b   : > { %2182 = vadd.xlane.f32.xlu1 %v5618_v31  ;;  %2180 = vadd.xlane.f32.xlu0 %v5620_v55 }
 0xe5f   : > { %2186 = vadd.xlane.f32.xlu1 %v5624_v38  ;;  %2184 = vadd.xlane.f32.xlu0 %v5626_v43 }
 0xe63   : > { %2190 = vadd.xlane.f32.xlu1 %v5630_v54  ;;  %2188 = vadd.xlane.f32.xlu0 %v5632_v5 }
 0xe67   : > { %2194 = vadd.xlane.f32.xlu1 %v5636_v45  ;;  %2192 = vadd.xlane.f32.xlu0 %v5638_v46 }
 0xed8   : > { %v2167_v37 = vpop.xlane.xlu1 %2166  ;;  %v2165_v0 = vpop.xlane.xlu0 %2164 }
 0xed9   : > { %4188 = vrcp.f32 %v2167_v37 }
 0xeda   : > { %4190 = vrcp.f32 %v2165_v0 }
 0xedc   : > { %v2171_v44 = vpop.xlane.xlu1 %2170  ;;  %v2169_v63 = vpop.xlane.xlu0 %2168 }
 0xedd   : > { %4192 = vrcp.f32 %v2171_v44 }
 0xede   : > { %4194 = vrcp.f32 %v2169_v63 }
 0xee0   : > { %v2175_v62 = vpop.xlane.xlu1 %2174  ;;  %v2173_v50 = vpop.xlane.xlu0 %2172 }
 0xee1   : > { %4196 = vrcp.f32 %v2175_v62 }
 0xee2   : > { %4198 = vrcp.f32 %v2173_v50 }
 0xee3   : > { %v4189_v51 = vpop.eup %4188 }
 0xee4   : > { %v4191_v6 = vpop.eup %4190  ;;  %v2179_v49 = vpop.xlane.xlu1 %2178  ;;  %v5644_v10 = vmul.f32 %v4189_v51, %v2149_v36 }
 0xee5   : > { %v2177_v57 = vpop.xlane.xlu0 %2176  ;;  %4200 = vrcp.f32 %v2179_v49  ;;  %v5642_v56 = vmul.f32 %v4191_v6, %v2148_v30 }
 0xee6   : > { %4202 = vrcp.f32 %v2177_v57 }
 0xee7   : > { %v4193_v11 = vpop.eup %4192  ;;  %v2228_v58 = vadd.f32 %v5644_v10, %v5642_v56 }
 0xee8   : > { %v4195_v1 = vpop.eup %4194  ;;  %v2183_v52 = vpop.xlane.xlu1 %2182  ;;  %v2215_v27 = vmul.f32 %v4193_v11, %v2151_v19 }
 0xee9   : > { %v2181_v14 = vpop.xlane.xlu0 %2180  ;;  %v5646_v59 = vmul.f32 %v4195_v1, %v2150_v40  ;;  %4204 = vrcp.f32 %v2183_v52 }
 0xeea   : > { %4206 = vrcp.f32 %v2181_v14 }
 0xeeb   : > { %v4197_v12 = vpop.eup %4196  ;;  %v2229_v3 = vadd.f32 %v2228_v58, %v5646_v59 }
 0xeec   : > { %v4199_v4 = vpop.eup %4198  ;;  %v2187_v7 = vpop.xlane.xlu1 %2186  ;;  %v2217_v8 = vmul.f32 %v4197_v12, %v5609_v18 }
 0xeed   : > { %v2185_v22 = vpop.xlane.xlu0 %2184  ;;  %v2216_v2 = vmul.f32 %v4199_v4, %v2152_v35  ;;  %4208 = vrcp.f32 %v2187_v7  ;;  %v2230_v21 = vadd.f32 %v2229_v3, %v2215_v27 }
 0xeee   : > { %4210 = vrcp.f32 %v2185_v22 }
 0xeef   : > { %v4201_v20 = vpop.eup %4200  ;;  %v2231_v60 = vadd.f32 %v2230_v21, %v2216_v2 }
 0xef0   : > { %v4203_v28 = vpop.eup %4202  ;;  %v2191_v61 = vpop.xlane.xlu1 %2190  ;;  %v2219_v23 = vmul.f32 %v4201_v20, %v5612_v41 }
 0xef1   : > { %v2189_v15 = vpop.xlane.xlu0 %2188  ;;  %v2218_v13 = vmul.f32 %v4203_v28, %v5614_v53  ;;  %4212 = vrcp.f32 %v2191_v61  ;;  %v2232_v32 = vadd.f32 %v2231_v60, %v2217_v8 }
 0xef2   : > { %4214 = vrcp.f32 %v2189_v15 }
 0xef3   : > { %v4205_v34 = vpop.eup %4204  ;;  %v2233_v9 = vadd.f32 %v2232_v32, %v2218_v13 }
 0xef4   : > { %v4207_v42 = vpop.eup %4206  ;;  %v2195_v17 = vpop.xlane.xlu1 %2194  ;;  %v2221_v26 = vmul.f32 %v4205_v34, %v5618_v31 }
 0xef5   : > { %v2193_v16 = vpop.xlane.xlu0 %2192  ;;  %v2220_v33 = vmul.f32 %v4207_v42, %v5620_v55  ;;  %4216 = vrcp.f32 %v2195_v17  ;;  %v2234_v39 = vadd.f32 %v2233_v9, %v2219_v23 }
 0xef6   : > { %4218 = vrcp.f32 %v2193_v16 }
 0xef7   : > { %v4209_v25 = vpop.eup %4208  ;;  %v2235_v29 = vadd.f32 %v2234_v39, %v2220_v33 }
 0xef8   : > { %v4211_v48 = vpop.eup %4210  ;;  %v2223_v30 = vmul.f32 %v4209_v25, %v5624_v38 }
 0xef9   : > { %v2222_v24 = vmul.f32 %v4211_v48, %v5626_v43  ;;  %v2236_v47 = vadd.f32 %v2235_v29, %v2221_v26 }
 0xefb   : > { %v4213_v36 = vpop.eup %4212  ;;  %v2237_v19 = vadd.f32 %v2236_v47, %v2222_v24 }
 0xefc   : > { %v4215_v40 = vpop.eup %4214  ;;  %v2225_v53 = vmul.f32 %v4213_v36, %v5630_v54 }
 0xefd   : > { %v2224_v18 = vmul.f32 %v4215_v40, %v5632_v5  ;;  %v2238_v35 = vadd.f32 %v2237_v19, %v2223_v30 }
 0xeff   : > { %v4217_v41 = vpop.eup %4216  ;;  %v2239_v55 = vadd.f32 %v2238_v35, %v2224_v18 }
 0xf00   : > { %v4219_v37 = vpop.eup %4218  ;;  %v2227_v44 = vmul.f32 %v4217_v41, %v5636_v45 }
 0xf01   : > { %v2226_v31 = vmul.f32 %v4219_v37, %v5638_v46  ;;  %v2240_v0 = vadd.f32 %v2239_v55, %v2225_v53 }
 0xf03   : > { %v2241_v43 = vadd.f32 %v2240_v0, %v2226_v31 }
 0xf05   : > { %v2242_v63 = vadd.f32 %v2241_v43, %v2227_v44 }
 0xf07   : > { %v2243_v62 = vrot.slane %v2242_v63, 4 }
 0xf09   : > { %v2244_v50 = vadd.f32 %v2243_v62, %v2242_v63 }
 0xf0b   : > { %v2245_v38 = vrot.slane %v2244_v50, 2 }
 0xf0d   : > { %v2246_v51 = vadd.f32 %v2245_v38, %v2244_v50 }
 0xf0f   : > { %v2247_v6 = vrot.slane %v2246_v51, 1 }
 0xf11   : > { %v2248_v49 = vadd.f32 %v2247_v6, %v2246_v51 }
 0xf13   : > { %4220 = vrcp.f32 %v2248_v49 }
 0xf1d   : > { %v4221_v5 = vpop.eup %4220 }
 0xf1e   : > { %v2251_v57 = vmul.f32 %v4221_v5, %v5644_v10  ;;  %v2250_v54 = vmul.f32 %v4221_v5, %v5642_v56  ;;  %v2253_v46 = vmul.f32 %v4221_v5, %v2215_v27  ;;  %v2252_v11 = vmul.f32 %v4221_v5, %v5646_v59 }
 0xf1f   : > { %v5665_v45 = vmul.f32 %v4221_v5, %v2217_v8  ;;  %v2254_v1 = vmul.f32 %v4221_v5, %v2216_v2  ;;  %v5668_v52 = vmul.f32 %v4221_v5, %v2219_v23  ;;  %v5670_v14 = vmul.f32 %v4221_v5, %v2218_v13 }
 0xf20   : > { %2268 = vadd.xlane.f32.xlu1 %v2251_v57  ;;  %2266 = vadd.xlane.f32.xlu0 %v2250_v54  ;;  %v5674_v56 = vmul.f32 %v4221_v5, %v2221_v26  ;;  %v5676_v10 = vmul.f32 %v4221_v5, %v2220_v33  ;;  %v5680_v59 = vmul.f32 %v4221_v5, %v2223_v30 }
 0xf21   : > { %v5682_v58 = vmul.f32 %v4221_v5, %v2222_v24  ;;  %v5686_v12 = vmul.f32 %v4221_v5, %v2225_v53  ;;  %v5688_v27 = vmul.f32 %v4221_v5, %v2224_v18  ;;  %v5692_v3 = vmul.f32 %v4221_v5, %v2227_v44 }
 0xf22   : > { %v5694_v4 = vmul.f32 %v4221_v5, %v2226_v31 }
 0xf24   : > { %2272 = vadd.xlane.f32.xlu1 %v2253_v46  ;;  %2270 = vadd.xlane.f32.xlu0 %v2252_v11 }
 0xf28   : > { %2276 = vadd.xlane.f32.xlu1 %v5665_v45  ;;  %2274 = vadd.xlane.f32.xlu0 %v2254_v1 }
 0xf2c   : > { %2280 = vadd.xlane.f32.xlu1 %v5668_v52  ;;  %2278 = vadd.xlane.f32.xlu0 %v5670_v14 }
 0xf30   : > { %2284 = vadd.xlane.f32.xlu1 %v5674_v56  ;;  %2282 = vadd.xlane.f32.xlu0 %v5676_v10 }
 0xf34   : > { %2288 = vadd.xlane.f32.xlu1 %v5680_v59  ;;  %2286 = vadd.xlane.f32.xlu0 %v5682_v58 }
 0xf38   : > { %2292 = vadd.xlane.f32.xlu1 %v5686_v12  ;;  %2290 = vadd.xlane.f32.xlu0 %v5688_v27 }
 0xf3c   : > { %2296 = vadd.xlane.f32.xlu1 %v5692_v3  ;;  %2294 = vadd.xlane.f32.xlu0 %v5694_v4 }
 0xfad   : > { %v2269_v7 = vpop.xlane.xlu1 %2268  ;;  %v2267_v22 = vpop.xlane.xlu0 %2266 }
 0xfae   : > { %4222 = vrcp.f32 %v2269_v7 }
 0xfaf   : > { %4224 = vrcp.f32 %v2267_v22 }
 0xfb1   : > { %v2273_v2 = vpop.xlane.xlu1 %2272  ;;  %v2271_v21 = vpop.xlane.xlu0 %2270 }
 0xfb2   : > { %4226 = vrcp.f32 %v2273_v2 }
 0xfb3   : > { %4228 = vrcp.f32 %v2271_v21 }
 0xfb5   : > { %v2277_v20 = vpop.xlane.xlu1 %2276  ;;  %v2275_v8 = vpop.xlane.xlu0 %2274 }
 0xfb6   : > { %4230 = vrcp.f32 %v2277_v20 }
 0xfb7   : > { %4232 = vrcp.f32 %v2275_v8 }
 0xfb8   : > { %v4223_v60 = vpop.eup %4222 }
 0xfb9   : > { %v4225_v28 = vpop.eup %4224  ;;  %v2281_v61 = vpop.xlane.xlu1 %2280  ;;  %v5700_v32 = vmul.f32 %v4223_v60, %v2251_v57 }
 0xfba   : > { %v2279_v15 = vpop.xlane.xlu0 %2278  ;;  %4234 = vrcp.f32 %v2281_v61  ;;  %v5698_v13 = vmul.f32 %v4225_v28, %v2250_v54 }
 0xfbb   : > { %4236 = vrcp.f32 %v2279_v15 }
 0xfbc   : > { %v4227_v34 = vpop.eup %4226  ;;  %v2330_v16 = vadd.f32 %v5700_v32, %v5698_v13 }
 0xfbd   : > { %v4229_v23 = vpop.eup %4228  ;;  %v2285_v9 = vpop.xlane.xlu1 %2284  ;;  %v2317_v39 = vmul.f32 %v4227_v34, %v2253_v46 }
 0xfbe   : > { %v2283_v42 = vpop.xlane.xlu0 %2282  ;;  %v5702_v17 = vmul.f32 %v4229_v23, %v2252_v11  ;;  %4238 = vrcp.f32 %v2285_v9 }
 0xfbf   : > { %4240 = vrcp.f32 %v2283_v42 }
 0xfc0   : > { %v4231_v33 = vpop.eup %4230  ;;  %v2331_v25 = vadd.f32 %v2330_v16, %v5702_v17 }
 0xfc1   : > { %v4233_v26 = vpop.eup %4232  ;;  %v2289_v29 = vpop.xlane.xlu1 %2288  ;;  %v2319_v30 = vmul.f32 %v4231_v33, %v5665_v45 }
 0xfc2   : > { %v2287_v48 = vpop.xlane.xlu0 %2286  ;;  %v2318_v24 = vmul.f32 %v4233_v26, %v2254_v1  ;;  %4242 = vrcp.f32 %v2289_v29  ;;  %v2332_v47 = vadd.f32 %v2331_v25, %v2317_v39 }
 0xfc3   : > { %4244 = vrcp.f32 %v2287_v48 }
 0xfc4   : > { %v4235_v36 = vpop.eup %4234  ;;  %v2333_v19 = vadd.f32 %v2332_v47, %v2318_v24 }
 0xfc5   : > { %v4237_v40 = vpop.eup %4236  ;;  %v2293_v18 = vpop.xlane.xlu1 %2292  ;;  %v2321_v37 = vmul.f32 %v4235_v36, %v5668_v52 }
 0xfc6   : > { %v2291_v35 = vpop.xlane.xlu0 %2290  ;;  %v2320_v41 = vmul.f32 %v4237_v40, %v5670_v14  ;;  %4246 = vrcp.f32 %v2293_v18  ;;  %v2334_v53 = vadd.f32 %v2333_v19, %v2319_v30 }
 0xfc7   : > { %4248 = vrcp.f32 %v2291_v35 }
 0xfc8   : > { %v4239_v55 = vpop.eup %4238  ;;  %v2335_v31 = vadd.f32 %v2334_v53, %v2320_v41 }
 0xfc9   : > { %v4241_v0 = vpop.eup %4240  ;;  %v2297_v44 = vpop.xlane.xlu1 %2296  ;;  %v2323_v38 = vmul.f32 %v4239_v55, %v5674_v56 }
 0xfca   : > { %v2295_v43 = vpop.xlane.xlu0 %2294  ;;  %v2322_v63 = vmul.f32 %v4241_v0, %v5676_v10  ;;  %4250 = vrcp.f32 %v2297_v44  ;;  %v2336_v62 = vadd.f32 %v2335_v31, %v2321_v37 }
 0xfcb   : > { %4252 = vrcp.f32 %v2295_v43 }
 0xfcc   : > { %v4243_v50 = vpop.eup %4242  ;;  %v2337_v51 = vadd.f32 %v2336_v62, %v2322_v63 }
 0xfcd   : > { %v4245_v6 = vpop.eup %4244  ;;  %v2325_v54 = vmul.f32 %v4243_v50, %v5680_v59 }
 0xfce   : > { %v2324_v49 = vmul.f32 %v4245_v6, %v5682_v58  ;;  %v2338_v5 = vadd.f32 %v2337_v51, %v2323_v38 }
 0xfd0   : > { %v4247_v57 = vpop.eup %4246  ;;  %v2339_v46 = vadd.f32 %v2338_v5, %v2324_v49 }
 0xfd1   : > { %v4249_v11 = vpop.eup %4248  ;;  %v2327_v14 = vmul.f32 %v4247_v57, %v5686_v12 }
 0xfd2   : > { %v2326_v45 = vmul.f32 %v4249_v11, %v5688_v27  ;;  %v2340_v1 = vadd.f32 %v2339_v46, %v2325_v54 }
 0xfd4   : > { %v4251_v52 = vpop.eup %4250  ;;  %v2341_v10 = vadd.f32 %v2340_v1, %v2326_v45 }
 0xfd5   : > { %v4253_v7 = vpop.eup %4252  ;;  %v2329_v2 = vmul.f32 %v4251_v52, %v5692_v3 }
 0xfd6   : > { %v2328_v56 = vmul.f32 %v4253_v7, %v5694_v4  ;;  %v2342_v22 = vadd.f32 %v2341_v10, %v2327_v14 }
 0xfd8   : > { %v2343_v58 = vadd.f32 %v2342_v22, %v2328_v56 }
 0xfda   : > { %v2344_v21 = vadd.f32 %v2343_v58, %v2329_v2 }
 0xfdc   : > { %v2345_v20 = vrot.slane %v2344_v21, 4 }
 0xfde   : > { %v2346_v8 = vadd.f32 %v2345_v20, %v2344_v21 }
 0xfe0   : > { %v2347_v59 = vrot.slane %v2346_v8, 2 }
 0xfe2   : > { %v2348_v60 = vadd.f32 %v2347_v59, %v2346_v8 }
 0xfe4   : > { %v2349_v28 = vrot.slane %v2348_v60, 1 }
 0xfe6   : > { %v2350_v61 = vadd.f32 %v2349_v28, %v2348_v60 }
 0xfe8   : > { %4254 = vrcp.f32 %v2350_v61 }
 0xff2   : > { %v4255_v27 = vpop.eup %4254 }
 0xff3   : > { %v2353_v15 = vmul.f32 %v4255_v27, %v5700_v32  ;;  %v2352_v12 = vmul.f32 %v4255_v27, %v5698_v13  ;;  %v2355_v4 = vmul.f32 %v4255_v27, %v2317_v39  ;;  %v2354_v34 = vmul.f32 %v4255_v27, %v5702_v17 }
 0xff4   : > { %v5721_v3 = vmul.f32 %v4255_v27, %v2319_v30  ;;  %v2356_v23 = vmul.f32 %v4255_v27, %v2318_v24  ;;  %v5724_v9 = vmul.f32 %v4255_v27, %v2321_v37  ;;  %v5726_v42 = vmul.f32 %v4255_v27, %v2320_v41 }
 0xff5   : > { %2370 = vadd.xlane.f32.xlu1 %v2353_v15  ;;  %2368 = vadd.xlane.f32.xlu0 %v2352_v12  ;;  %v5730_v13 = vmul.f32 %v4255_v27, %v2323_v38  ;;  %v5732_v32 = vmul.f32 %v4255_v27, %v2322_v63  ;;  %v5736_v17 = vmul.f32 %v4255_v27, %v2325_v54 }
 0xff6   : > { %v5738_v16 = vmul.f32 %v4255_v27, %v2324_v49  ;;  %v5742_v33 = vmul.f32 %v4255_v27, %v2327_v14  ;;  %v5744_v39 = vmul.f32 %v4255_v27, %v2326_v45  ;;  %v5748_v25 = vmul.f32 %v4255_v27, %v2329_v2 }
 0xff7   : > { %v5750_v26 = vmul.f32 %v4255_v27, %v2328_v56 }
 0xff9   : > { %2374 = vadd.xlane.f32.xlu1 %v2355_v4  ;;  %2372 = vadd.xlane.f32.xlu0 %v2354_v34 }
 0xffd   : > { %2378 = vadd.xlane.f32.xlu1 %v5721_v3  ;;  %2376 = vadd.xlane.f32.xlu0 %v2356_v23 }
0x1001   : > { %2382 = vadd.xlane.f32.xlu1 %v5724_v9  ;;  %2380 = vadd.xlane.f32.xlu0 %v5726_v42 }
0x1005   : > { %2386 = vadd.xlane.f32.xlu1 %v5730_v13  ;;  %2384 = vadd.xlane.f32.xlu0 %v5732_v32 }
0x1009   : > { %2390 = vadd.xlane.f32.xlu1 %v5736_v17  ;;  %2388 = vadd.xlane.f32.xlu0 %v5738_v16 }
0x100d   : > { %2394 = vadd.xlane.f32.xlu1 %v5742_v33  ;;  %2392 = vadd.xlane.f32.xlu0 %v5744_v39 }
0x1011   : > { %2398 = vadd.xlane.f32.xlu1 %v5748_v25  ;;  %2396 = vadd.xlane.f32.xlu0 %v5750_v26 }
0x1082   : > { %v2371_v29 = vpop.xlane.xlu1 %2370  ;;  %v2369_v48 = vpop.xlane.xlu0 %2368 }
0x1083   : > { %4256 = vrcp.f32 %v2371_v29 }
0x1084   : > { %4258 = vrcp.f32 %v2369_v48 }
0x1086   : > { %v2375_v24 = vpop.xlane.xlu1 %2374  ;;  %v2373_v47 = vpop.xlane.xlu0 %2372 }
0x1087   : > { %4260 = vrcp.f32 %v2375_v24 }
0x1088   : > { %4262 = vrcp.f32 %v2373_v47 }
0x108a   : > { %v2379_v36 = vpop.xlane.xlu1 %2378  ;;  %v2377_v30 = vpop.xlane.xlu0 %2376 }
0x108b   : > { %4264 = vrcp.f32 %v2379_v36 }
0x108c   : > { %4266 = vrcp.f32 %v2377_v30 }
0x108d   : > { %v4257_v19 = vpop.eup %4256 }
0x108e   : > { %v4259_v40 = vpop.eup %4258  ;;  %v2383_v18 = vpop.xlane.xlu1 %2382  ;;  %v5756_v53 = vmul.f32 %v4257_v19, %v2353_v15 }
0x108f   : > { %v2381_v35 = vpop.xlane.xlu0 %2380  ;;  %4268 = vrcp.f32 %v2383_v18  ;;  %v5754_v41 = vmul.f32 %v4259_v40, %v2352_v12 }
0x1090   : > { %4270 = vrcp.f32 %v2381_v35 }
0x1091   : > { %v4261_v55 = vpop.eup %4260  ;;  %v2432_v43 = vadd.f32 %v5756_v53, %v5754_v41 }
0x1092   : > { %v4263_v37 = vpop.eup %4262  ;;  %v2387_v31 = vpop.xlane.xlu1 %2386  ;;  %v2419_v62 = vmul.f32 %v4261_v55, %v2355_v4 }
0x1093   : > { %v2385_v0 = vpop.xlane.xlu0 %2384  ;;  %v5758_v44 = vmul.f32 %v4263_v37, %v2354_v34  ;;  %4272 = vrcp.f32 %v2387_v31 }
0x1094   : > { %4274 = vrcp.f32 %v2385_v0 }
0x1095   : > { %v4265_v63 = vpop.eup %4264  ;;  %v2433_v50 = vadd.f32 %v2432_v43, %v5758_v44 }
0x1096   : > { %v4267_v38 = vpop.eup %4266  ;;  %v2391_v51 = vpop.xlane.xlu1 %2390  ;;  %v2421_v54 = vmul.f32 %v4265_v63, %v5721_v3 }
0x1097   : > { %v2389_v6 = vpop.xlane.xlu0 %2388  ;;  %v2420_v49 = vmul.f32 %v4267_v38, %v2356_v23  ;;  %4276 = vrcp.f32 %v2391_v51  ;;  %v2434_v5 = vadd.f32 %v2433_v50, %v2419_v62 }
0x1098   : > { %4278 = vrcp.f32 %v2389_v6 }
0x1099   : > { %v4269_v57 = vpop.eup %4268  ;;  %v2435_v46 = vadd.f32 %v2434_v5, %v2420_v49 }
0x109a   : > { %v4271_v11 = vpop.eup %4270  ;;  %v2395_v45 = vpop.xlane.xlu1 %2394  ;;  %v2423_v7 = vmul.f32 %v4269_v57, %v5724_v9 }
0x109b   : > { %v2393_v1 = vpop.xlane.xlu0 %2392  ;;  %v2422_v52 = vmul.f32 %v4271_v11, %v5726_v42  ;;  %4280 = vrcp.f32 %v2395_v45  ;;  %v2436_v14 = vadd.f32 %v2435_v46, %v2421_v54 }
0x109c   : > { %4282 = vrcp.f32 %v2393_v1 }
0x109d   : > { %v4273_v10 = vpop.eup %4272  ;;  %v2437_v56 = vadd.f32 %v2436_v14, %v2422_v52 }
0x109e   : > { %v4275_v22 = vpop.eup %4274  ;;  %v2399_v2 = vpop.xlane.xlu1 %2398  ;;  %v2425_v59 = vmul.f32 %v4273_v10, %v5730_v13 }
0x109f   : > { %v2397_v58 = vpop.xlane.xlu0 %2396  ;;  %v2424_v21 = vmul.f32 %v4275_v22, %v5732_v32  ;;  %4284 = vrcp.f32 %v2399_v2  ;;  %v2438_v20 = vadd.f32 %v2437_v56, %v2423_v7 }
0x10a0   : > { %4286 = vrcp.f32 %v2397_v58 }
0x10a1   : > { %v4277_v8 = vpop.eup %4276  ;;  %v2439_v60 = vadd.f32 %v2438_v20, %v2424_v21 }
0x10a2   : > { %v4279_v28 = vpop.eup %4278  ;;  %v2427_v12 = vmul.f32 %v4277_v8, %v5736_v17 }
0x10a3   : > { %v2426_v61 = vmul.f32 %v4279_v28, %v5738_v16  ;;  %v2440_v27 = vadd.f32 %v2439_v60, %v2425_v59 }
0x10a5   : > { %v4281_v15 = vpop.eup %4280  ;;  %v2441_v4 = vadd.f32 %v2440_v27, %v2426_v61 }
0x10a6   : > { %v4283_v34 = vpop.eup %4282  ;;  %v2429_v42 = vmul.f32 %v4281_v15, %v5742_v33 }
0x10a7   : > { %v2428_v3 = vmul.f32 %v4283_v34, %v5744_v39  ;;  %v2442_v23 = vadd.f32 %v2441_v4, %v2427_v12 }
0x10a9   : > { %v4285_v9 = vpop.eup %4284  ;;  %v2443_v32 = vadd.f32 %v2442_v23, %v2428_v3 }
0x10aa   : > { %v4287_v29 = vpop.eup %4286  ;;  %v2431_v24 = vmul.f32 %v4285_v9, %v5748_v25 }
0x10ab   : > { %v2430_v13 = vmul.f32 %v4287_v29, %v5750_v26  ;;  %v2444_v48 = vadd.f32 %v2443_v32, %v2429_v42 }
0x10ad   : > { %v2445_v16 = vadd.f32 %v2444_v48, %v2430_v13 }
0x10af   : > { %v2446_v47 = vadd.f32 %v2445_v16, %v2431_v24 }
0x10b1   : > { %v2447_v36 = vrot.slane %v2446_v47, 4 }
0x10b3   : > { %v2448_v30 = vadd.f32 %v2447_v36, %v2446_v47 }
0x10b5   : > { %v2449_v17 = vrot.slane %v2448_v30, 2 }
0x10b7   : > { %v2450_v19 = vadd.f32 %v2449_v17, %v2448_v30 }
0x10b9   : > { %v2451_v40 = vrot.slane %v2450_v19, 1 }
0x10bb   : > { %v2452_v18 = vadd.f32 %v2451_v40, %v2450_v19 }
0x10bd   : > { %4288 = vrcp.f32 %v2452_v18 }
0x10c7   : > { %v4289_v39 = vpop.eup %4288 }
0x10c8   : > { %v5775_v35 = vmul.f32 %v4289_v39, %v5756_v53  ;;  %v5778_v33 = vmul.f32 %v4289_v39, %v5754_v41  ;;  %v5782_v25 = vmul.f32 %v4289_v39, %v2419_v62  ;;  %v5785_v26 = vmul.f32 %v4289_v39, %v5758_v44 }
0x10c9   : > { %v5789_v55 = vmul.f32 %v4289_v39, %v2421_v54  ;;  %v5791_v53 = vmul.f32 %v4289_v39, %v2420_v49  ;;  %v5795_v41 = vmul.f32 %v4289_v39, %v2423_v7  ;;  %v5797_v37 = vmul.f32 %v4289_v39, %v2422_v52 }
0x10ca   : > { %2472 = vadd.xlane.f32.xlu1 %v5775_v35  ;;  %2470 = vadd.xlane.f32.xlu0 %v5778_v33  ;;  %v5801_v31 = vmul.f32 %v4289_v39, %v2425_v59  ;;  %v5803_v0 = vmul.f32 %v4289_v39, %v2424_v21  ;;  %v5807_v44 = vmul.f32 %v4289_v39, %v2427_v12 }
0x10cb   : > { %v5809_v43 = vmul.f32 %v4289_v39, %v2426_v61  ;;  %v5813_v63 = vmul.f32 %v4289_v39, %v2429_v42  ;;  %v5815_v62 = vmul.f32 %v4289_v39, %v2428_v3  ;;  %v5819_v50 = vmul.f32 %v4289_v39, %v2431_v24 }
0x10cc   : > { %v5821_v38 = vmul.f32 %v4289_v39, %v2430_v13 }
0x10ce   : > { %2476 = vadd.xlane.f32.xlu1 %v5782_v25  ;;  %2474 = vadd.xlane.f32.xlu0 %v5785_v26 }
0x10d2   : > { %2480 = vadd.xlane.f32.xlu1 %v5789_v55  ;;  %2478 = vadd.xlane.f32.xlu0 %v5791_v53 }
0x10d6   : > { %2484 = vadd.xlane.f32.xlu1 %v5795_v41  ;;  %2482 = vadd.xlane.f32.xlu0 %v5797_v37 }
0x10da   : > { %2488 = vadd.xlane.f32.xlu1 %v5801_v31  ;;  %2486 = vadd.xlane.f32.xlu0 %v5803_v0 }
0x10de   : > { %2492 = vadd.xlane.f32.xlu1 %v5807_v44  ;;  %2490 = vadd.xlane.f32.xlu0 %v5809_v43 }
0x10e2   : > { %2496 = vadd.xlane.f32.xlu1 %v5813_v63  ;;  %2494 = vadd.xlane.f32.xlu0 %v5815_v62 }
0x10e6   : > { %2500 = vadd.xlane.f32.xlu1 %v5819_v50  ;;  %2498 = vadd.xlane.f32.xlu0 %v5821_v38 }
0x1157   : > { %v2473_v51 = vpop.xlane.xlu1 %2472  ;;  %v2471_v6 = vpop.xlane.xlu0 %2470 }
0x1158   : > { %4290 = vrcp.f32 %v2473_v51 }
0x1159   : > { %4292 = vrcp.f32 %v2471_v6 }
0x115b   : > { %v2477_v49 = vpop.xlane.xlu1 %2476  ;;  %v2475_v5 = vpop.xlane.xlu0 %2474 }
0x115c   : > { %4294 = vrcp.f32 %v2477_v49 }
0x115d   : > { %4296 = vrcp.f32 %v2475_v5 }
0x115f   : > { %v2481_v57 = vpop.xlane.xlu1 %2480  ;;  %v2479_v54 = vpop.xlane.xlu0 %2478 }
0x1160   : > { %4298 = vrcp.f32 %v2481_v57 }
0x1161   : > { %4300 = vrcp.f32 %v2479_v54 }
0x1162   : > { %v4291_v46 = vpop.eup %4290 }
0x1163   : > { %v4293_v11 = vpop.eup %4292  ;;  %v2519_v45 = vmul.f32 %v4291_v46, %v2473_v51  ;;  %v2485_v1 = vpop.xlane.xlu1 %2484 }
0x1164   : > { %v2483_v52 = vpop.xlane.xlu0 %2482  ;;  %v2518_v14 = vmul.f32 %v4293_v11, %v2471_v6  ;;  %4302 = vrcp.f32 %v2485_v1 }
0x1165   : > { %v2535_v10 = vsub.f32 2.0, %v2519_v45  ;;  %4304 = vrcp.f32 %v2483_v52 }
0x1166   : > { %v4295_v7 = vpop.eup %4294  ;;  %v2534_v56 = vsub.f32 2.0, %v2518_v14 }
0x1167   : > { %v4297_v22 = vpop.eup %4296  ;;  %v2551_v2 = vmul.f32 %v4291_v46, %v2535_v10  ;;  %v2521_v58 = vmul.f32 %v4295_v7, %v2477_v49  ;;  %v2489_v21 = vpop.xlane.xlu1 %2488 }
0x1168   : > { %v2487_v20 = vpop.xlane.xlu0 %2486  ;;  %v2550_v8 = vmul.f32 %v4293_v11, %v2534_v56  ;;  %v2520_v59 = vmul.f32 %v4297_v22, %v2475_v5  ;;  %4306 = vrcp.f32 %v2489_v21 }
0x1169   : > { %v2537_v60 = vsub.f32 2.0, %v2521_v58  ;;  %4308 = vrcp.f32 %v2487_v20  ;;  %v5829_v15 = vmul.f32 %v2551_v2, %v5775_v35 }
0x116a   : > { %v4299_v28 = vpop.eup %4298  ;;  %v5826_v61 = vmul.f32 %v2550_v8, %v5778_v33  ;;  %v2536_v27 = vsub.f32 2.0, %v2520_v59 }
0x116b   : > { %v4301_v12 = vpop.eup %4300  ;;  %v2553_v4 = vmul.f32 %v4295_v7, %v2537_v60  ;;  %v2523_v34 = vmul.f32 %v4299_v28, %v2481_v57  ;;  %v2493_v3 = vpop.xlane.xlu1 %2492 }
0x116c   : > { %v2491_v23 = vpop.xlane.xlu0 %2490  ;;  %v2552_v9 = vmul.f32 %v4297_v22, %v2536_v27  ;;  %v2522_v42 = vmul.f32 %v4301_v12, %v2479_v54  ;;  %4310 = vrcp.f32 %v2493_v3  ;;  %v2582_v24 = vadd.f32 %v5829_v15, %v5826_v61 }
0x116d   : > { %v2539_v32 = vsub.f32 2.0, %v2523_v34  ;;  %4312 = vrcp.f32 %v2491_v23  ;;  %v5837_v47 = vmul.f32 %v2553_v4, %v5782_v25 }
0x116e   : > { %v4303_v29 = vpop.eup %4302  ;;  %v5832_v13 = vmul.f32 %v2552_v9, %v5785_v26  ;;  %v2538_v48 = vsub.f32 2.0, %v2522_v42 }
0x116f   : > { %v4305_v16 = vpop.eup %4304  ;;  %v2555_v36 = vmul.f32 %v4299_v28, %v2539_v32  ;;  %v2525_v30 = vmul.f32 %v4303_v29, %v2485_v1  ;;  %v2497_v17 = vpop.xlane.xlu1 %2496 }
0x1170   : > { %v2495_v19 = vpop.xlane.xlu0 %2494  ;;  %v2554_v40 = vmul.f32 %v4301_v12, %v2538_v48  ;;  %v2524_v18 = vmul.f32 %v4305_v16, %v2483_v52  ;;  %4314 = vrcp.f32 %v2497_v17  ;;  %v2583_v39 = vadd.f32 %v2582_v24, %v5832_v13 }
0x1171   : > { %v2541_v35 = vsub.f32 2.0, %v2525_v30  ;;  %4316 = vrcp.f32 %v2495_v19  ;;  %v5845_v49 = vmul.f32 %v2555_v36, %v5789_v55 }
0x1172   : > { %v4307_v33 = vpop.eup %4306  ;;  %v5841_v26 = vmul.f32 %v2554_v40, %v5791_v53  ;;  %v2540_v51 = vsub.f32 2.0, %v2524_v18  ;;  %v2584_v6 = vadd.f32 %v2583_v39, %v5837_v47 }
0x1173   : > { %v4309_v25 = vpop.eup %4308  ;;  %v2557_v5 = vmul.f32 %v4303_v29, %v2541_v35  ;;  %v2527_v57 = vmul.f32 %v4307_v33, %v2489_v21  ;;  %v2501_v54 = vpop.xlane.xlu1 %2500 }
0x1174   : > { %v2499_v46 = vpop.xlane.xlu0 %2498  ;;  %v2556_v11 = vmul.f32 %v4305_v16, %v2540_v51  ;;  %v2526_v45 = vmul.f32 %v4309_v25, %v2487_v20  ;;  %4318 = vrcp.f32 %v2501_v54  ;;  %v2585_v1 = vadd.f32 %v2584_v6, %v5841_v26 }
0x1175   : > { %v2543_v52 = vsub.f32 2.0, %v2527_v57  ;;  %4320 = vrcp.f32 %v2499_v46  ;;  %v5853_v56 = vmul.f32 %v2557_v5, %v5795_v41 }
0x1176   : > { %v4311_v53 = vpop.eup %4310  ;;  %v5849_v14 = vmul.f32 %v2556_v11, %v5797_v37  ;;  %v2542_v10 = vsub.f32 2.0, %v2526_v45  ;;  %v2586_v7 = vadd.f32 %v2585_v1, %v5845_v49 }
0x1177   : > { %v4313_v55 = vpop.eup %4312  ;;  %v2529_v22 = vmul.f32 %v4311_v53, %v2493_v3  ;;  %v2559_v2 = vmul.f32 %v4307_v33, %v2543_v52 }
0x1178   : > { %v2558_v58 = vmul.f32 %v4309_v25, %v2542_v10  ;;  %v2528_v21 = vmul.f32 %v4313_v55, %v2491_v23  ;;  %v2587_v20 = vadd.f32 %v2586_v7, %v5849_v14 }
0x1179   : > { %v2545_v8 = vsub.f32 2.0, %v2529_v22  ;;  %v2575_v41 = vmul.f32 %v2559_v2, %v5801_v31 }
0x117a   : > { %v4315_v59 = vpop.eup %4314  ;;  %v5857_v60 = vmul.f32 %v2558_v58, %v5803_v0  ;;  %v2544_v37 = vsub.f32 2.0, %v2528_v21  ;;  %v2588_v28 = vadd.f32 %v2587_v20, %v5853_v56 }
0x117b   : > { %v4317_v27 = vpop.eup %4316  ;;  %v2561_v12 = vmul.f32 %v4311_v53, %v2545_v8  ;;  %v2531_v4 = vmul.f32 %v4315_v59, %v2497_v17 }
0x117c   : > { %v2560_v34 = vmul.f32 %v4313_v55, %v2544_v37  ;;  %v2530_v3 = vmul.f32 %v4317_v27, %v2495_v19  ;;  %v2589_v9 = vadd.f32 %v2588_v28, %v5857_v60 }
0x117d   : > { %v2547_v23 = vsub.f32 2.0, %v2531_v4  ;;  %v2577_v24 = vmul.f32 %v2561_v12, %v5807_v44 }
0x117e   : > { %v4319_v42 = vpop.eup %4318  ;;  %v2576_v32 = vmul.f32 %v2560_v34, %v5809_v43  ;;  %v2546_v29 = vsub.f32 2.0, %v2530_v3  ;;  %v2590_v48 = vadd.f32 %v2589_v9, %v2575_v41 }
0x117f   : > { %v4321_v0 = vpop.eup %4320  ;;  %v2533_v16 = vmul.f32 %v4319_v42, %v2501_v54  ;;  %v2563_v36 = vmul.f32 %v4315_v59, %v2547_v23 }
0x1180   : > { %v2562_v30 = vmul.f32 %v4317_v27, %v2546_v29  ;;  %v2532_v40 = vmul.f32 %v4321_v0, %v2499_v46  ;;  %v2591_v17 = vadd.f32 %v2590_v48, %v2576_v32 }
0x1181   : > { %v2549_v18 = vsub.f32 2.0, %v2533_v16  ;;  %v2579_v35 = vmul.f32 %v2563_v36, %v5813_v63  ;;  %v4358_v16 = vld [vmem:[%s4551_s8] sm:$0xff]  ;;  %v4359_v36 = vld [vmem:[%s4551_s8 + $0x8] sm:$0xff] }
0x1182   : > { %v2578_v31 = vmul.f32 %v2562_v30, %v5815_v62  ;;  %v2548_v19 = vsub.f32 2.0, %v2532_v40  ;;  %v2592_v39 = vadd.f32 %v2591_v17, %v2577_v24  ;;  %v3538_v30 = vpack.c.bf16 %v4359_v36, %v4358_v16  ;;  %v4360_v40 = vld [vmem:[%s4551_s8 + $0x10] sm:$0xff]  ;;  %v4361_v17 = vld [vmem:[%s4551_s8 + $0x18] sm:$0xff]  ;;  %v4366_v36 = vld [vmem:[%s4551_s8 + $0x40] sm:$0xff] }
0x1183   : > { %v2565_v33 = vmul.f32 %v4319_v42, %v2549_v18  ;;  %v3542_v18 = vpack.c.bf16 %v4361_v17, %v4360_v40 }
0x1184   : > { %v2564_v51 = vmul.f32 %v4321_v0, %v2548_v19  ;;  %v2593_v43 = vadd.f32 %v2592_v39, %v2578_v31  ;;  %3539 = vmatprep.subr.bf16.mxu1 %v3538_v30 }
0x1185   : > { %v2581_v44 = vmul.f32 %v2565_v33, %v5819_v50  ;;  %3541 = vmatpush3.bf16.msra.mxu1 %v3538_v30  ;;  %v4367_v30 = vld [vmem:[%s4551_s8 + $0x48] sm:$0xff] }
0x1186   : > { %v2580_v6 = vmul.f32 %v2564_v51, %v5821_v38  ;;  %v2594_v25 = vadd.f32 %v2593_v43, %v2579_v35  ;;  %3543 = vmatprep.subr.bf16.mxu1 %v3542_v18  ;;  %v3554_v40 = vpack.c.bf16 %v4367_v30, %v4366_v36 }
0x1188   : > { %v2595_v5 = vadd.f32 %v2594_v25, %v2580_v6 }
0x1189   : > { %3545 = vmatpush3.bf16.msra.mxu1 %v3542_v18 }
0x118a   : > { %v2596_v57 = vadd.f32 %v2595_v5, %v2581_v44 }
0x118c   : > { %v2597_v54 = vrot.slane %v2596_v57, 4 }
0x118e   : > { %v2598_v46 = vadd.f32 %v2597_v54, %v2596_v57  ;;  %v4362_v54 = vld [vmem:[%s4551_s8 + $0x20] sm:$0xff] }
0x1190   : > { %v2599_v11 = vrot.slane %v2598_v46, 2 }
0x1192   : > { %v2600_v45 = vadd.f32 %v2599_v11, %v2598_v46  ;;  %v4363_v46 = vld [vmem:[%s4551_s8 + $0x28] sm:$0xff] }
0x1193   : > { %v3546_v11 = vpack.c.bf16 %v4363_v46, %v4362_v54 }
0x1194   : > { %v2601_v1 = vrot.slane %v2600_v45, 1 }
0x1195   : > { %3547 = vmatprep.subr.bf16.mxu1 %v3546_v11 }
0x1196   : > { %v2602_v62 = vadd.f32 %v2601_v1, %v2600_v45  ;;  %3549 = vmatpush3.bf16.msra.mxu1 %v3546_v11 }
0x1198   : > { %4322 = vrcp.f32 %v2602_v62 }
0x11a2   : > { %v4323_v52 = vpop.eup %4322 }
0x11a3   : > { %v2604_v53 = vmul.f32 %v4323_v52, %v2602_v62 }
0x11a5   : > { %v2605_v63 = vsub.f32 2.0, %v2604_v53 }
0x11a7   : > { %v2606_v10 = vmul.f32 %v4323_v52, %v2605_v63 }
0x11a9   : > { %v5869_v7 = vmul.f32 %v2606_v10, %v5829_v15  ;;  %v5872_v38 = vmul.f32 %v2606_v10, %v5826_v61  ;;  %v5877_v50 = vmul.f32 %v2606_v10, %v5837_v47  ;;  %v5880_v55 = vmul.f32 %v2606_v10, %v5832_v13 }
0x11aa   : > { %v5885_v15 = vmul.f32 %v2606_v10, %v5845_v49  ;;  %v5888_v61 = vmul.f32 %v2606_v10, %v5841_v26  ;;  %v5893_v47 = vmul.f32 %v2606_v10, %v5853_v56  ;;  %v5896_v13 = vmul.f32 %v2606_v10, %v5849_v14 }
0x11ab   : > { %2625 = vadd.xlane.f32.xlu1 %v5869_v7  ;;  %2623 = vadd.xlane.f32.xlu0 %v5872_v38  ;;  %v5900_v22 = vmul.f32 %v2606_v10, %v2575_v41  ;;  %v5903_v49 = vmul.f32 %v2606_v10, %v5857_v60  ;;  %v5907_v26 = vmul.f32 %v2606_v10, %v2577_v24 }
0x11ac   : > { %v5909_v56 = vmul.f32 %v2606_v10, %v2576_v32  ;;  %v5913_v14 = vmul.f32 %v2606_v10, %v2579_v35  ;;  %v5915_v2 = vmul.f32 %v2606_v10, %v2578_v31  ;;  %v5919_v58 = vmul.f32 %v2606_v10, %v2581_v44 }
0x11ad   : > { %v5921_v21 = vmul.f32 %v2606_v10, %v2580_v6 }
0x11af   : > { %2629 = vadd.xlane.f32.xlu1 %v5877_v50  ;;  %2627 = vadd.xlane.f32.xlu0 %v5880_v55 }
0x11b3   : > { %2633 = vadd.xlane.f32.xlu1 %v5885_v15  ;;  %2631 = vadd.xlane.f32.xlu0 %v5888_v61 }
0x11b7   : > { %2637 = vadd.xlane.f32.xlu1 %v5893_v47  ;;  %2635 = vadd.xlane.f32.xlu0 %v5896_v13 }
0x11bb   : > { %2641 = vadd.xlane.f32.xlu1 %v5900_v22  ;;  %2639 = vadd.xlane.f32.xlu0 %v5903_v49 }
0x11bf   : > { %2645 = vadd.xlane.f32.xlu1 %v5907_v26  ;;  %2643 = vadd.xlane.f32.xlu0 %v5909_v56 }
0x11c3   : > { %2649 = vadd.xlane.f32.xlu1 %v5913_v14  ;;  %2647 = vadd.xlane.f32.xlu0 %v5915_v2 }
0x11c7   : > { %2653 = vadd.xlane.f32.xlu1 %v5919_v58  ;;  %2651 = vadd.xlane.f32.xlu0 %v5921_v21 }
0x1238   : > { %v2626_v20 = vpop.xlane.xlu1 %2625  ;;  %v2624_v8 = vpop.xlane.xlu0 %2623 }
0x1239   : > { %4324 = vrcp.f32 %v2626_v20 }
0x123a   : > { %4326 = vrcp.f32 %v2624_v8 }
0x123c   : > { %v2630_v59 = vpop.xlane.xlu1 %2629  ;;  %v2628_v60 = vpop.xlane.xlu0 %2627 }
0x123d   : > { %4328 = vrcp.f32 %v2630_v59 }
0x123e   : > { %4330 = vrcp.f32 %v2628_v60 }
0x1240   : > { %v2634_v37 = vpop.xlane.xlu1 %2633  ;;  %v2632_v28 = vpop.xlane.xlu0 %2631 }
0x1241   : > { %4332 = vrcp.f32 %v2634_v37 }
0x1242   : > { %4334 = vrcp.f32 %v2632_v28 }
0x1243   : > { %v4325_v27 = vpop.eup %4324 }
0x1244   : > { %v4327_v12 = vpop.eup %4326  ;;  %v2672_v4 = vmul.f32 %v4325_v27, %v2626_v20  ;;  %v2638_v41 = vpop.xlane.xlu1 %2637 }
0x1245   : > { %v2636_v34 = vpop.xlane.xlu0 %2635  ;;  %v2671_v3 = vmul.f32 %v4327_v12, %v2624_v8  ;;  %4336 = vrcp.f32 %v2638_v41 }
0x1246   : > { %v2688_v9 = vsub.f32 2.0, %v2672_v4  ;;  %4338 = vrcp.f32 %v2636_v34 }
0x1247   : > { %v4329_v23 = vpop.eup %4328  ;;  %v2687_v42 = vsub.f32 2.0, %v2671_v3 }
0x1248   : > { %v4331_v32 = vpop.eup %4330  ;;  %v2704_v29 = vmul.f32 %v4325_v27, %v2688_v9  ;;  %v2674_v48 = vmul.f32 %v4329_v23, %v2630_v59  ;;  %v2642_v0 = vpop.xlane.xlu1 %2641 }
0x1249   : > { %v5925_v24 = vpop.xlane.xlu0 %2639  ;;  %v2703_v31 = vmul.f32 %v4327_v12, %v2687_v42  ;;  %v2673_v19 = vmul.f32 %v4331_v32, %v2628_v60  ;;  %4340 = vrcp.f32 %v2642_v0 }
0x124a   : > { %v2690_v39 = vsub.f32 2.0, %v2674_v48  ;;  %4342 = vrcp.f32 %v5925_v24  ;;  %v5933_v33 = vmul.f32 %v2704_v29, %v5869_v7 }
0x124b   : > { %v4333_v35 = vpop.eup %4332  ;;  %v2689_v51 = vsub.f32 2.0, %v2673_v19  ;;  %v5936_v43 = vmul.f32 %v2703_v31, %v5872_v38 }
0x124c   : > { %v4335_v6 = vpop.eup %4334  ;;  %v2706_v25 = vmul.f32 %v4329_v23, %v2690_v39  ;;  %v2676_v44 = vmul.f32 %v4333_v35, %v2634_v37  ;;  %v2646_v5 = vpop.xlane.xlu1 %2645  ;;  %v4364_v37 = vld [vmem:[%s4551_s8 + $0x30] sm:$0xff] }
0x124d   : > { %v5938_v57 = vpop.xlane.xlu0 %2643  ;;  %v2705_v45 = vmul.f32 %v4331_v32, %v2689_v51  ;;  %v2675_v1 = vmul.f32 %v4335_v6, %v2632_v28  ;;  %4344 = vrcp.f32 %v2646_v5  ;;  %v2735_v10 = vadd.f32 %v5933_v33, %v5936_v43  ;;  %v4365_v28 = vld [vmem:[%s4551_s8 + $0x38] sm:$0xff] }
0x124e   : > { %v2692_v62 = vsub.f32 2.0, %v2676_v44  ;;  %4346 = vrcp.f32 %v5938_v57  ;;  %v5949_v38 = vmul.f32 %v2706_v25, %v5877_v50  ;;  %v3550_v27 = vpack.c.bf16 %v4365_v28, %v4364_v37  ;;  %v4369_v25 = vld [vmem:[%s4551_s8 + $0x58] sm:$0xff] }
0x124f   : > { %v4337_v52 = vpop.eup %4336  ;;  %v5944_v53 = vmul.f32 %v2705_v45, %v5880_v55  ;;  %v2691_v63 = vsub.f32 2.0, %v2675_v1 }
0x1250   : > { %v4339_v7 = vpop.eup %4338  ;;  %v2708_v20 = vmul.f32 %v4333_v35, %v2692_v62  ;;  %v2678_v8 = vmul.f32 %v4337_v52, %v2638_v41  ;;  %v2650_v59 = vpop.xlane.xlu1 %2649  ;;  %3551 = vmatprep.subr.bf16.mxu1 %v3550_v27 }
0x1251   : > { %v5951_v60 = vpop.xlane.xlu0 %2647  ;;  %v2707_v55 = vmul.f32 %v4335_v6, %v2691_v63  ;;  %v2677_v12 = vmul.f32 %v4339_v7, %v2636_v34  ;;  %4348 = vrcp.f32 %v2650_v59  ;;  %v2736_v4 = vadd.f32 %v2735_v10, %v5944_v53  ;;  %3553 = vmatpush3.bf16.msra.mxu1 %v3550_v27 }
0x1252   : > { %v2694_v3 = vsub.f32 2.0, %v2678_v8  ;;  %4350 = vrcp.f32 %v5951_v60  ;;  %v5962_v32 = vmul.f32 %v2708_v20, %v5885_v15  ;;  %3555 = vmatprep.subr.bf16.mxu1 %v3554_v40  ;;  %v4371_v20 = vld [vmem:[%s4551_s8 + $0x68] sm:$0xff] }
0x1253   : > { %v4341_v50 = vpop.eup %4340  ;;  %v5958_v41 = vmul.f32 %v2707_v55, %v5888_v61  ;;  %v2693_v9 = vsub.f32 2.0, %v2677_v12  ;;  %v2737_v23 = vadd.f32 %v2736_v4, %v5949_v38 }
0x1254   : > { %v4343_v42 = vpop.eup %4342  ;;  %v2710_v34 = vmul.f32 %v4337_v52, %v2694_v3  ;;  %v2680_v29 = vmul.f32 %v4341_v50, %v2642_v0  ;;  %v2654_v48 = vpop.xlane.xlu1 %2653 }
0x1255   : > { %v2652_v16 = vpop.xlane.xlu0 %2651  ;;  %v2709_v17 = vmul.f32 %v4339_v7, %v2693_v9  ;;  %v2679_v61 = vmul.f32 %v4343_v42, %v5925_v24  ;;  %4352 = vrcp.f32 %v2654_v48  ;;  %v2738_v18 = vadd.f32 %v2737_v23, %v5958_v41  ;;  %v4368_v24 = vld [vmem:[%s4551_s8 + $0x50] sm:$0xff]  ;;  %3557 = vmatpush3.bf16.msra.mxu1 %v3554_v40  ;;  %v4370_v7 = vld [vmem:[%s4551_s8 + $0x60] sm:$0xff] }
0x1256   : > { %v2696_v31 = vsub.f32 2.0, %v2680_v29  ;;  %4354 = vrcp.f32 %v2652_v16  ;;  %v5973_v51 = vmul.f32 %v2710_v34, %v5893_v47  ;;  %v3558_v44 = vpack.c.bf16 %v4369_v25, %v4368_v24 }
0x1257   : > { %v4345_v15 = vpop.eup %4344  ;;  %v5969_v19 = vmul.f32 %v2709_v17, %v5896_v13  ;;  %v2695_v0 = vsub.f32 2.0, %v2679_v61  ;;  %v2739_v39 = vadd.f32 %v2738_v18, %v5962_v32  ;;  %v3562_v8 = vpack.c.bf16 %v4371_v20, %v4370_v7 }
0x1258   : > { %v4347_v35 = vpop.eup %4346  ;;  %v2682_v6 = vmul.f32 %v4345_v15, %v2646_v5  ;;  %v2712_v54 = vmul.f32 %v4341_v50, %v2696_v31  ;;  %3559 = vmatprep.subr.bf16.mxu1 %v3558_v44 }
0x1259   : > { %v2711_v46 = vmul.f32 %v4343_v42, %v2695_v0  ;;  %v2681_v13 = vmul.f32 %v4347_v35, %v5938_v57  ;;  %v2740_v11 = vadd.f32 %v2739_v39, %v5969_v19  ;;  %3561 = vmatpush3.bf16.msra.mxu1 %v3558_v44 }
0x125a   : > { %v2698_v45 = vsub.f32 2.0, %v2682_v6  ;;  %v5986_v57 = vmul.f32 %v2712_v54, %v5900_v22  ;;  %3563 = vmatprep.subr.bf16.mxu1 %v3562_v8  ;;  %v4372_v54 = vld [vmem:[%s4551_s8 + $0x70] sm:$0xff] }
0x125b   : > { %v4349_v1 = vpop.eup %4348  ;;  %v5980_v62 = vmul.f32 %v2711_v46, %v5903_v49  ;;  %v2697_v47 = vsub.f32 2.0, %v2681_v13  ;;  %v2741_v5 = vadd.f32 %v2740_v11, %v5973_v51  ;;  %v4373_v46 = vld [vmem:[%s4551_s8 + $0x78] sm:$0xff] }
0x125c   : > { %v4351_v52 = vpop.eup %4350  ;;  %v2714_v63 = vmul.f32 %v4345_v15, %v2698_v45  ;;  %v2684_v10 = vmul.f32 %v4349_v1, %v2650_v59  ;;  %v3566_v13 = vpack.c.bf16 %v4373_v46, %v4372_v54 }
0x125d   : > { %v2713_v37 = vmul.f32 %v4347_v35, %v2697_v47  ;;  %v2683_v28 = vmul.f32 %v4351_v52, %v5951_v60  ;;  %v2742_v49 = vadd.f32 %v2741_v5, %v5980_v62  ;;  %3565 = vmatpush3.bf16.msra.mxu1 %v3562_v8 }
0x125e   : > { %v2700_v27 = vsub.f32 2.0, %v2684_v10  ;;  %v2730_v50 = vmul.f32 %v2714_v63, %v5907_v26  ;;  %3567 = vmatprep.subr.bf16.mxu1 %v3566_v13 }
0x125f   : > { %v4353_v55 = vpop.eup %4352  ;;  %v2729_v12 = vmul.f32 %v2713_v37, %v5909_v56  ;;  %v2699_v4 = vsub.f32 2.0, %v2683_v28  ;;  %v2743_v3 = vadd.f32 %v2742_v49, %v5986_v57 }
0x1260   : > { %v4355_v59 = vpop.eup %4354  ;;  %v2686_v9 = vmul.f32 %v4353_v55, %v2654_v48  ;;  %v2716_v22 = vmul.f32 %v4349_v1, %v2700_v27 }
0x1261   : > { %v2715_v23 = vmul.f32 %v4351_v52, %v2699_v4  ;;  %v2685_v42 = vmul.f32 %v4355_v59, %v2652_v16  ;;  %v2744_v34 = vadd.f32 %v2743_v3, %v2729_v12  ;;  %3569 = vmatpush3.bf16.msra.mxu1 %v3566_v13 }
0x1262   : > { %v2702_v60 = vsub.f32 2.0, %v2686_v9  ;;  %v2732_v56 = vmul.f32 %v2716_v22, %v5913_v14  ;;  %v4374_v9 = vld [vmem:[%s4536_s5 + $0x8] sm:$0xff] }
0x1263   : > { %v2731_v29 = vmul.f32 %v2715_v23, %v5915_v2  ;;  %v2701_v36 = vsub.f32 2.0, %v2685_v42  ;;  %v2745_v30 = vadd.f32 %v2744_v34, %v2730_v50  ;;  %v4375_v42 = vld [vmem:[%s4536_s5] sm:$0xff] }
0x1264   : > { %v2718_v40 = vmul.f32 %v4353_v55, %v2702_v60 }
0x1265   : > { %v2717_v17 = vmul.f32 %v4355_v59, %v2701_v36  ;;  %v2746_v61 = vadd.f32 %v2745_v30, %v2731_v29 }
0x1266   : > { %v2734_v48 = vmul.f32 %v2718_v40, %v5919_v58 }
0x1267   : > { %v2733_v18 = vmul.f32 %v2717_v17, %v5921_v21  ;;  %v2747_v26 = vadd.f32 %v2746_v61, %v2732_v56 }
0x1269   : > { %v2748_v31 = vadd.f32 %v2747_v26, %v2733_v18 }
0x126b   : > { %v2749_v16 = vadd.f32 %v2748_v31, %v2734_v48 }
0x126d   : > { %v2750_v15 = vrot.slane %v2749_v16, 4 }
0x126f   : > { %v2751_v0 = vadd.f32 %v2750_v15, %v2749_v16 }
0x1271   : > { %v2752_v2 = vrot.slane %v2751_v0, 2 }
0x1273   : > { %v2753_v39 = vadd.f32 %v2752_v2, %v2751_v0  ;;  %v4378_v0 = vld [vmem:[%s4536_s5 + $0x28] sm:$0xff] }
0x1275   : > { %v2754_v35 = vrot.slane %v2753_v39, 1 }
0x1277   : > { %v2755_v6 = vadd.f32 %v2754_v35, %v2753_v39 }
0x1279   : > { %4356 = vrcp.f32 %v2755_v6 }
0x1283   : > { %v4357_v14 = vpop.eup %4356 }
0x1284   : > { %v2757_v24 = vmul.f32 %v4357_v14, %v2755_v6  ;;  %v4379_v6 = vld [vmem:[%s4536_s5 + $0x20] sm:$0xff] }
0x1286   : > { %v2758_v25 = vsub.f32 2.0, %v2757_v24 }
0x1288   : > { %v2759_v44 = vmul.f32 %v4357_v14, %v2758_v25 }
0x128a   : > { %v2760_v21 = vmul.f32 %v2759_v44, %v5936_v43  ;;  %v2761_v58 = vmul.f32 %v2759_v44, %v5933_v33  ;;  %v2762_v11 = vmul.f32 %v2759_v44, %v5944_v53  ;;  %v2763_v45 = vmul.f32 %v2759_v44, %v5949_v38 }
0x128b   : > { %v2764_v1 = vmul.f32 %v2759_v44, %v5958_v41  ;;  %v2765_v43 = vmul.f32 %v2759_v44, %v5962_v32  ;;  %v2766_v33 = vmul.f32 %v2759_v44, %v5969_v19  ;;  %v2767_v47 = vmul.f32 %v2759_v44, %v5973_v51 }
0x128c   : > { %2776 = vxpose.xlu0.b32.start [1/16] %v2760_v21, 128  ;;  %v2768_v5 = vmul.f32 %v2759_v44, %v5980_v62  ;;  %v2769_v53 = vmul.f32 %v2759_v44, %v5986_v57  ;;  %v2770_v38 = vmul.f32 %v2759_v44, %v2729_v12  ;;  %v2771_v52 = vmul.f32 %v2759_v44, %v2730_v50 }
0x128d   : > { %v2772_v41 = vmul.f32 %v2759_v44, %v2731_v29  ;;  %v2773_v32 = vmul.f32 %v2759_v44, %v2732_v56  ;;  %v2774_v63 = vmul.f32 %v2759_v44, %v2733_v18  ;;  %v2775_v19 = vmul.f32 %v2759_v44, %v2734_v48  ;;  %v4376_v56 = vld [vmem:[%s4536_s5 + $0x18] sm:$0xff]  ;;  %v4377_v18 = vld [vmem:[%s4536_s5 + $0x10] sm:$0xff] }
0x1290   : > { %2777 = vxpose.xlu0.b32.cont [2/16] %v2761_v58, 128  ;;  %v4380_v58 = vld [vmem:[%s4536_s5 + $0x38] sm:$0xff] }
0x1294   : > { %2778 = vxpose.xlu0.b32.cont [3/16] %v2762_v11, 128  ;;  %v4381_v11 = vld [vmem:[%s4536_s5 + $0x30] sm:$0xff] }
0x1298   : > { %2779 = vxpose.xlu0.b32.cont [4/16] %v2763_v45, 128 }
0x129c   : > { %2780 = vxpose.xlu0.b32.cont [5/16] %v2764_v1, 128 }
0x12a0   : > { %2781 = vxpose.xlu0.b32.cont [6/16] %v2765_v43, 128 }
0x12a4   : > { %2782 = vxpose.xlu0.b32.cont [7/16] %v2766_v33, 128 }
0x12a8   : > { %2783 = vxpose.xlu0.b32.cont [8/16] %v2767_v47, 128 }
0x12ac   : > { %2784 = vxpose.xlu0.b32.cont [9/16] %v2768_v5, 128  ;;  %v4382_v5 = vld [vmem:[%s4536_s5 + $0x48] sm:$0xff] }
0x12b0   : > { %2785 = vxpose.xlu0.b32.cont [10/16] %v2769_v53, 128 }
0x12b4   : > { %2786 = vxpose.xlu0.b32.cont [11/16] %v2770_v38, 128 }
0x12b8   : > { %2787 = vxpose.xlu0.b32.cont [12/16] %v2771_v52, 128 }
0x12bc   : > { %2788 = vxpose.xlu0.b32.cont [13/16] %v2772_v41, 128  ;;  %v4383_v41 = vld [vmem:[%s4536_s5 + $0x40] sm:$0xff] }
0x12c0   : > { %2789 = vxpose.xlu0.b32.cont [14/16] %v2773_v32, 128 }
0x12c4   : > { %2790 = vxpose.xlu0.b32.cont [15/16] %v2774_v63, 128 }
0x12c8   : > { %2791 = vxpose.xlu0.b32.end [16/16] %v2775_v19, 128 }
0x130c   : > { %v2792_v51 = vpop.trf.xlu0 }
0x130d   : > { %3431 = vmatprep.mubr.f32.mxu1 %v2792_v51 }
0x1310   : > { %v2793_v10 = vpop.trf.xlu0 }
0x1311   : > { %3432 = vmatmul.mubr.f32.vlgmr.msra.gmra.mrb[0].mxu1 %v2793_v10 }
0x1314   : > { %v2794_v62 = vpop.trf.xlu0 }
0x1315   : > { %3434 = vmatprep.mubr.f32.mxu1 %v2794_v62  ;;  %v4384_v62 = vld [vmem:[%s4536_s5 + $0x58] sm:$0xff] }
0x1318   : > { %v2795_v7 = vpop.trf.xlu0 }
0x1319   : > { %3435 = vmatmul.mubr.f32.gmra.mrb[2].mxu1 %v2795_v7 }
0x131c   : > { %v2796_v20 = vpop.trf.xlu0 }
0x131d   : > { %3437 = vmatprep.mubr.f32.mxu1 %v2796_v20 }
0x1320   : > { %v2797_v8 = vpop.trf.xlu0 }
0x1321   : > { %3438 = vmatmul.mubr.f32.gmra.mrb[4].mxu1 %v2797_v8 }
0x1324   : > { %v2798_v57 = vpop.trf.xlu0 }
0x1325   : > { %3440 = vmatprep.mubr.f32.mxu1 %v2798_v57  ;;  %v4385_v57 = vld [vmem:[%s4536_s5 + $0x50] sm:$0xff] }
0x1328   : > { %v2799_v37 = vpop.trf.xlu0 }
0x1329   : > { %3441 = vmatmul.mubr.f32.gmra.mrb[6].mxu1 %v2799_v37 }
0x132c   : > { %v2800_v28 = vpop.trf.xlu0 }
0x132d   : > { %3443 = vmatprep.mubr.f32.mxu1 %v2800_v28 }
0x1330   : > { %v2801_v49 = vpop.trf.xlu0 }
0x1331   : > { %3444 = vmatmul.mubr.f32.gmra.mrb[8].mxu1 %v2801_v49 }
0x1334   : > { %v2802_v27 = vpop.trf.xlu0 }
0x1335   : > { %3446 = vmatprep.mubr.f32.mxu1 %v2802_v27 }
0x1338   : > { %v2803_v55 = vpop.trf.xlu0 }
0x1339   : > { %3447 = vmatmul.mubr.f32.gmra.mrb[10].mxu1 %v2803_v55 }
0x133c   : > { %v2804_v12 = vpop.trf.xlu0 }
0x133d   : > { %3449 = vmatprep.mubr.f32.mxu1 %v2804_v12  ;;  %v4386_v12 = vld [vmem:[%s4536_s5 + $0x68] sm:$0xff] }
0x1340   : > { %v2805_v4 = vpop.trf.xlu0 }
0x1341   : > { %3450 = vmatmul.mubr.f32.gmra.mrb[12].mxu1 %v2805_v4 }
0x1344   : > { %v2806_v3 = vpop.trf.xlu0 }
0x1345   : > { %3452 = vmatprep.mubr.f32.mxu1 %v2806_v3 }
0x1348   : > { %v2807_v59 = vpop.trf.xlu0 }
0x1349   : > { %3453 = vmatmul.mubr.f32.gmra.mrb[14].mxu1 %v2807_v59 }
0x13e4   : > { %v3433_v50 = vpop.f32.mrb[0].mxu1 }
0x13e5   : > { %v2954_v22 = vsub.f32 %v3433_v50, %v4374_v9  ;;  %v2874_v23 = vpop.f32.mrb[1].mxu1  ;;  %v4387_v50 = vld [vmem:[%s4536_s5 + $0x60] sm:$0xff] }
0x13e6   : > { %v2953_v34 = vsub.f32 %v2874_v23, %v4375_v42 }
0x13e7   : > { %v2970_v60 = vmul.f32 %v2954_v22, %v2954_v22 }
0x13e8   : > { %v2969_v29 = vmul.f32 %v2953_v34, %v2953_v34 }
0x13e9   : > { %v2988_v36 = vsel %vm280_vm0, %v2970_v60, 0.0 }
0x13ea   : > { %2989 = vadd.xlane.f32.xlu1 %v2988_v36  ;;  %v2985_v61 = vsel %vm280_vm0, %v2969_v29, 0.0  ;;  %v4388_v36 = vld [vmem:[%s4536_s5 + $0x78] sm:$0xff] }
0x13ec   : > { %v3436_v30 = vpop.f32.mrb[2].mxu1 }
0x13ed   : > { %v2956_v40 = vsub.f32 %v3436_v30, %v4376_v56  ;;  %v2884_v17 = vpop.f32.mrb[3].mxu1  ;;  %v4389_v56 = vld [vmem:[%s4536_s5 + $0x70] sm:$0xff] }
0x13ee   : > { %v2955_v26 = vsub.f32 %v2884_v17, %v4377_v18  ;;  %2986 = vadd.xlane.f32.xlu1 %v2985_v61 }
0x13ef   : > { %v2972_v48 = vmul.f32 %v2956_v40, %v2956_v40 }
0x13f0   : > { %v2971_v31 = vmul.f32 %v2955_v26, %v2955_v26 }
0x13f1   : > { %v2994_v16 = vsel %vm280_vm0, %v2972_v48, 0.0  ;;  %v3033_v48 = vld [vmem:[%s6098_s1] sm:$0xff] }
0x13f2   : > { %2995 = vadd.xlane.f32.xlu1 %v2994_v16  ;;  %v2991_v35 = vsel %vm280_vm0, %v2971_v31, 0.0  ;;  %3487 = vmatprep.mubr.f32.mxu1 %v3033_v48 }
0x13f4   : > { %v3439_v15 = vpop.f32.mrb[4].mxu1 }
0x13f5   : > { %v2958_v2 = vsub.f32 %v3439_v15, %v4378_v0  ;;  %v2894_v39 = vpop.f32.mrb[5].mxu1 }
0x13f6   : > { %v2957_v14 = vsub.f32 %v2894_v39, %v4379_v6  ;;  %2992 = vadd.xlane.f32.xlu1 %v2991_v35 }
0x13f7   : > { %v2974_v24 = vmul.f32 %v2958_v2, %v2958_v2 }
0x13f8   : > { %v2973_v25 = vmul.f32 %v2957_v14, %v2957_v14 }
0x13f9   : > { %v3000_v44 = vsel %vm280_vm0, %v2974_v24, 0.0 }
0x13fa   : > { %3001 = vadd.xlane.f32.xlu1 %v3000_v44  ;;  %v2997_v13 = vsel %vm280_vm0, %v2973_v25, 0.0 }
0x13fc   : > { %v3442_v21 = vpop.f32.mrb[6].mxu1 }
0x13fd   : > { %v2960_v54 = vsub.f32 %v3442_v21, %v4380_v58  ;;  %v2904_v46 = vpop.f32.mrb[7].mxu1 }
0x13fe   : > { %v2959_v45 = vsub.f32 %v2904_v46, %v4381_v11  ;;  %2998 = vadd.xlane.f32.xlu1 %v2997_v13 }
0x13ff   : > { %v2976_v1 = vmul.f32 %v2960_v54, %v2960_v54 }
0x1400   : > { %v2975_v43 = vmul.f32 %v2959_v45, %v2959_v45 }
0x1401   : > { %v3006_v33 = vsel %vm280_vm0, %v2976_v1, 0.0 }
0x1402   : > { %3007 = vadd.xlane.f32.xlu1 %v3006_v33  ;;  %v3003_v52 = vsel %vm280_vm0, %v2975_v43, 0.0 }
0x1404   : > { %v3445_v47 = vpop.f32.mrb[8].mxu1 }
0x1405   : > { %v2962_v53 = vsub.f32 %v3445_v47, %v4382_v5  ;;  %v2914_v38 = vpop.f32.mrb[9].mxu1 }
0x1406   : > { %v2961_v32 = vsub.f32 %v2914_v38, %v4383_v41  ;;  %3004 = vadd.xlane.f32.xlu1 %v3003_v52  ;;  %v4454_v38 = vmov 0  }
0x1407   : > { %v2978_v63 = vmul.f32 %v2962_v53, %v2962_v53  ;;  %v3034_v53 = vld [vmem:[%s6098_s1 + $0x8] sm:$0xff]  ;;  %3644 = vset.pattern.permute.xlu1 %v4454_v38  ;;  %3645 = vset.pattern.permute.xlu0 %v4454_v38 }
0x1408   : > { %v2977_v19 = vmul.f32 %v2961_v32, %v2961_v32 }
0x1409   : > { %v3012_v51 = vsel %vm280_vm0, %v2978_v63, 0.0 }
0x140a   : > { %3013 = vadd.xlane.f32.xlu1 %v3012_v51  ;;  %v3009_v8 = vsel %vm280_vm0, %v2977_v19, 0.0 }
0x140c   : > { %v3448_v10 = vpop.f32.mrb[10].mxu1 }
0x140d   : > { %v2964_v7 = vsub.f32 %v3448_v10, %v4384_v62  ;;  %v2924_v20 = vpop.f32.mrb[11].mxu1 }
0x140e   : > { %v2963_v37 = vsub.f32 %v2924_v20, %v4385_v57  ;;  %3010 = vadd.xlane.f32.xlu1 %v3009_v8 }
0x140f   : > { %v2980_v28 = vmul.f32 %v2964_v7, %v2964_v7 }
0x1410   : > { %v2979_v49 = vmul.f32 %v2963_v37, %v2963_v37 }
0x1411   : > { %v3018_v27 = vsel %vm280_vm0, %v2980_v28, 0.0 }
0x1412   : > { %3019 = vadd.xlane.f32.xlu1 %v3018_v27  ;;  %v3015_v59 = vsel %vm280_vm0, %v2979_v49, 0.0 }
0x1414   : > { %v3451_v55 = vpop.f32.mrb[12].mxu1 }
0x1415   : > { %v2966_v4 = vsub.f32 %v3451_v55, %v4386_v12  ;;  %v2934_v3 = vpop.f32.mrb[13].mxu1 }
0x1416   : > { %v2965_v9 = vsub.f32 %v2934_v3, %v4387_v50  ;;  %3016 = vadd.xlane.f32.xlu1 %v3015_v59 }
0x1417   : > { %v2982_v22 = vmul.f32 %v2966_v4, %v2966_v4 }
0x1418   : > { %v2981_v23 = vmul.f32 %v2965_v9, %v2965_v9 }
0x1419   : > { %v3024_v42 = vsel %vm280_vm0, %v2982_v22, 0.0 }
0x141a   : > { %3025 = vadd.xlane.f32.xlu1 %v3024_v42  ;;  %v3021_v29 = vsel %vm280_vm0, %v2981_v23, 0.0 }
0x141c   : > { %v3454_v34 = vpop.f32.mrb[14].mxu1 }
0x141d   : > { %v2944_v60 = vpop.f32.mrb[15].mxu1  ;;  %v2968_v30 = vsub.f32 %v3454_v34, %v4388_v36 }
0x141e   : > { %v2967_v40 = vsub.f32 %v2944_v60, %v4389_v56  ;;  %3022 = vadd.xlane.f32.xlu1 %v3021_v29 }
0x141f   : > { %v2984_v61 = vmul.f32 %v2968_v30, %v2968_v30 }
0x1420   : > { %v2983_v17 = vmul.f32 %v2967_v40, %v2967_v40 }
0x1421   : > { %v3030_v26 = vsel %vm280_vm0, %v2984_v61, 0.0 }
0x1422   : > { %v3027_v18 = vsel %vm280_vm0, %v2983_v17, 0.0 }
0x1423   : > { %3028 = vadd.xlane.f32.xlu1 %v3027_v18 }
0x1427   : > { %3031 = vadd.xlane.f32.xlu1 %v3030_v26 }
0x1477   : > { %v2990_v31 = vpop.xlane.xlu1 %2989 }
0x147b   : > { %v2987_v16 = vpop.xlane.xlu1 %2986 }
0x147c   : > { %v3570_v15 = vpack.c.bf16 %v2990_v31, %v2987_v16 }
0x147e   : > { %3571 = vmatprep.subr.bf16.mxu1 %v3570_v15 }
0x147f   : > { %3573 = vmatpush3.bf16.msra.mxu1 %v3570_v15  ;;  %v2996_v0 = vpop.xlane.xlu1 %2995 }
0x1483   : > { %v2993_v2 = vpop.xlane.xlu1 %2992 }
0x1484   : > { %v3574_v39 = vpack.c.bf16 %v2996_v0, %v2993_v2 }
0x1486   : > { %3575 = vmatprep.subr.bf16.mxu1 %v3574_v39 }
0x1487   : > { %3577 = vmatpush3.bf16.msra.mxu1 %v3574_v39  ;;  %v3002_v35 = vpop.xlane.xlu1 %3001 }
0x148b   : > { %v2999_v6 = vpop.xlane.xlu1 %2998 }
0x148c   : > { %v3578_v14 = vpack.c.bf16 %v3002_v35, %v2999_v6 }
0x148e   : > { %3579 = vmatprep.subr.bf16.mxu1 %v3578_v14 }
0x148f   : > { %3581 = vmatpush3.bf16.msra.mxu1 %v3578_v14  ;;  %v3008_v24 = vpop.xlane.xlu1 %3007 }
0x1493   : > { %v3005_v25 = vpop.xlane.xlu1 %3004 }
0x1494   : > { %v3582_v44 = vpack.c.bf16 %v3008_v24, %v3005_v25 }
0x1496   : > { %3583 = vmatprep.subr.bf16.mxu1 %v3582_v44 }
0x1497   : > { %3585 = vmatpush3.bf16.msra.mxu1 %v3582_v44  ;;  %v3014_v21 = vpop.xlane.xlu1 %3013 }
0x149b   : > { %v3011_v58 = vpop.xlane.xlu1 %3010 }
0x149c   : > { %v3586_v54 = vpack.c.bf16 %v3014_v21, %v3011_v58 }
0x149e   : > { %3587 = vmatprep.subr.bf16.mxu1 %v3586_v54 }
0x149f   : > { %3589 = vmatpush3.bf16.msra.mxu1 %v3586_v54  ;;  %v3020_v46 = vpop.xlane.xlu1 %3019 }
0x14a3   : > { %v3017_v13 = vpop.xlane.xlu1 %3016 }
0x14a4   : > { %v3590_v11 = vpack.c.bf16 %v3020_v46, %v3017_v13 }
0x14a6   : > { %3591 = vmatprep.subr.bf16.mxu1 %v3590_v11 }
0x14a7   : > { %3593 = vmatpush3.bf16.msra.mxu1 %v3590_v11  ;;  %v3026_v45 = vpop.xlane.xlu1 %3025 }
0x14ab   : > { %v3023_v1 = vpop.xlane.xlu1 %3022 }
0x14ac   : > { %v3594_v43 = vpack.c.bf16 %v3026_v45, %v3023_v1 }
0x14ae   : > { %3595 = vmatprep.subr.bf16.mxu1 %v3594_v43 }
0x14af   : > { %3597 = vmatpush3.bf16.msra.mxu1 %v3594_v43 }
0x14b0   : > { %v3029_v33 = vpop.xlane.xlu1 %3028 }
0x14b4   : > { %v3032_v47 = vpop.xlane.xlu1 %3031 }
0x14b5   : > { %v3598_v5 = vpack.c.bf16 %v3032_v47, %v3029_v33 }
0x14b7   : > { %3599 = vmatprep.subr.bf16.mxu1 %v3598_v5 }
0x14b8   : > { %3601 = vmatpush3.bf16.msra.mxu1 %v3598_v5 }
0x14bb   : > { %3488 = vmatmul.mubr.f32.vlgmr.msra.gmra.mrb[16].mxu1 %v3034_v53 }
0x158e   : > { %v3489_v52 = vpop.f32.mrb[16].mxu1 }
0x158f   : > { %v3101_v41 = vpop.f32.mrb[17].mxu1  ;;  %v3111_v63 = vmul.f32 0.00390625, %v3489_v52 }
0x1590   : > { %v3110_v32 = vmul.f32 0.00390625, %v3101_v41 }
0x1592   : > { %3114 = vperm.xlu1 %3644, %v3110_v32  }
0x1596   : > { %3119 = vperm.xlu1 %3644, %v3111_v63  }
0x1611   : > { %v3115_v19 = vpop.permute.xlu1 %3114 }
0x1612   : > { %3122 = vst [vmem:[%s205_s20] sm:$0xff] %v3115_v19 }
0x1615   : > { %v3120_v51 = vpop.permute.xlu1 %3119 }
0x1616   : > { %3123 = vst [vmem:[%s205_s20 + $0x8] sm:$0xff] %v3120_v51 }
0x1617   : > { %4403 = shalt.err (!%p4400_p3)
}
0x1618   : > { %s4404_s10 = scalar_lea.hbm %s6054_s29, 256  ;;  %s4408_s5 = scalar_lea.hbm %s6101_s4, 512 }
0x1619   : > { %p4405_p4 = scmp.ne.s32.totalorder %s6054_s29, %s4404_s10  ;;  %p4409_p9 = scmp.lt.u32.totalorder %s6054_s29, %s6101_s4 }
0x161a   : > { %p4410_p10 = scmp.lt.u32.totalorder %s4408_s5, %s4404_s10  ;;  %p4412_p12 = scmp.lt.u32.totalorder %s4404_s10, %s6054_s29 }
0x161b   : > { %p4406_p7 = pnand %p4405_p4, %p4521_p5 }
0x161c   : > { %p4411_p11 = por %p4410_p10, %p4409_p9 }
0x161d   : > { %p4407_p8 = pneg %p4406_p7 }
0x161e   : > { %p4413_p13 = por %p4412_p12, %p4411_p11 }
0x1620   : > { %p4414_p0 = pnand %p4413_p13, %p4407_p8 }
0x1622   : > { %4417 = shalt.err (!%p4414_p0)
}
0x1623   : > { %s4456_s14 = smov 128   ;;  %s4457_s20 = smov 8  }
0x1624   : > { %3602 = dma.vmem_to_hbm [thread:$0]  (%p4521_p5), %s6049_s22, 256, %s6054_s29, %s6056_s30, %s4456_s14, %s4456_s14, %s4457_s20  }
0x1625 PF: > { %p3608_p1 = scmp.ge.s32.totalorder %s4452_s18, 2  ;;  %s3153_s23 = sand.u32 1, %s4440_s15  }
0x1626   : > { %s3154_s27 = scalar_lea.sflag [#allocation3], %s3153_s23 }
0x1627   : > { %p3605_p2 = pnand %p3608_p1, %p4525_p6 }
0x1629   : > { %4435 = dma.done.wait (!%p3605_p2), %s3154_s27, 256  }
0x162a   : > { %4437 = vsyncadd (!%p3605_p2), %s3154_s27, 4294967040  ;;  %p14_p3 = scmp.ge.s32.totalorder %s4508_s21, 4   ;;  %s6106_s15 = smov %s4444_s16 }
0x162b   : > { %s6107_s16 = smov %s4448_s17  ;;  %s6108_s17 = smov %s4519_s24 }
0x162c   : > { %s6109_s18 = smov %s4508_s21  ;;  %16 = sbr.rel (!%p14_p3) target bundleno = 3 (0x3), region = 74 }
0x1633   :  { %3159 = vsyncpa [#allocation3], 1 }
0x1634   :  { %3161 = vsyncpa [#allocation3 + $0x1], 1 }

</bundles_post_ra>
